<compile_context>
chip_gen: v6e
topology: v6e:2x2x1
jax: 0.10.0
libtpu: 0.0.40
codegen_flags: <defaults>
</compile_context>

<pallas_src>
import jax
import jax.numpy as jnp
from jax.experimental import pallas as pl
from jax.experimental.pallas import tpu as pltpu

EPS = 1e-5  # nn.BatchNorm2d default

_TAPS = tuple((dy, dx) for dy in range(3) for dx in range(3))


def _zero_halo(pad_ref):
    """Zero only the 1-pixel halo of a padded (N, H+2, W+2, C) scratch buffer."""
    N, Hp2, Wp2, C = pad_ref.shape
    Hh, Wh = Hp2 - 2, Wp2 - 2
    zr = jnp.zeros((N, 1, Wp2, C), pad_ref.dtype)
    zc = jnp.zeros((N, Hp2, 1, C), pad_ref.dtype)
    pad_ref[:, 0:1, :, :] = zr
    pad_ref[:, Hh + 1:Hh + 2, :, :] = zr
    pad_ref[:, :, 0:1, :] = zc
    pad_ref[:, :, Wh + 1:Wh + 2, :] = zc


def _conv3x3(pad_ref, w_ref, b_ref):
    """3x3 'same' conv as 9 per-tap accumulating MXU dots (no im2col buffer).

    pad_ref: (N, Hh+2, Wh+2, Cin) bf16 padded activations.
    w_ref:   (9, Cin, Cout) bf16 weights (tap-major).
    b_ref:   (1, Cout) f32 bias.
    Returns (N*Hh*Wh, Cout) f32.
    """
    N, Hp2, Wp2, Cin = pad_ref.shape
    Hh, Wh = Hp2 - 2, Wp2 - 2
    R = N * Hh * Wh
    acc = None
    for k, (dy, dx) in enumerate(_TAPS):
        # Shifted window read; reshape only collapses leading dims (minor dim kept).
        win = pad_ref[:, dy:dy + Hh, dx:dx + Wh, :].reshape(R, Cin)
        part = jnp.dot(win, w_ref[k], preferred_element_type=jnp.float32)
        acc = part if acc is None else acc + part
    return acc + b_ref[...]


def _bn_relu(acc, g_ref, be_ref):
    """Train-mode BatchNorm (batch stats, biased var, two-pass centered) + ReLU."""
    inv_r = 1.0 / acc.shape[0]
    mu = jnp.sum(acc, axis=0, keepdims=True) * inv_r
    d = acc - mu
    var = jnp.sum(d * d, axis=0, keepdims=True) * inv_r
    y = d * (g_ref[...] * jax.lax.rsqrt(var + EPS)) + be_ref[...]
    return jnp.maximum(y, 0.0)


def down_kernel(x_ref, w1_ref, b1_ref, g1_ref, be1_ref,
                w2_ref, b2_ref, g2_ref, be2_ref,
                o_ref, pad1_ref, pad2_ref):
    # Shapes recovered from the scratch buffers (x_ref is the pre-reshaped
    # (N*Hh, 2, Wh, 2*Cin) view of the NHWC input).
    N, Hp2, Wp2, Cin = pad1_ref.shape
    Hh, Wh = Hp2 - 2, Wp2 - 2
    Cmid = pad2_ref.shape[-1]

    # ---------------- MaxPool2d(2): fully vectorized ------------------------
    # H-direction pool: elementwise max of the two H-parity slabs.
    rows = jnp.maximum(x_ref[:, 0:1, :, :], x_ref[:, 1:2, :, :])
    # W-direction pool: the two W-parities live in contiguous lane halves.
    pooled = jnp.maximum(rows[..., :Cin], rows[..., Cin:])     # (N*Hh, 1, Wh, Cin) f32

    # ---------------- pad1 staging (bf16, halo-only zeroing) ----------------
    _zero_halo(pad1_ref)
    pad1_ref[:, 1:Hh + 1, 1:Wh + 1, :] = (
        pooled.astype(jnp.bfloat16).reshape(N, Hh, Wh, Cin))

    # ---------------- Conv1 -> BN1 (train stats) -> ReLU --------------------
    acc1 = _conv3x3(pad1_ref, w1_ref, b1_ref)                   # (R, Cmid) f32
    y = _bn_relu(acc1, g1_ref, be1_ref)

    # ---------------- pad2 staging (bf16, halo-only zeroing) ----------------
    _zero_halo(pad2_ref)
    pad2_ref[:, 1:Hh + 1, 1:Wh + 1, :] = (
        y.astype(jnp.bfloat16).reshape(N, Hh, Wh, Cmid))

    # ---------------- Conv2 -> BN2 (train stats) -> ReLU --------------------
    acc2 = _conv3x3(pad2_ref, w2_ref, b2_ref)                   # (R, Cout) f32
    # (R, Cout) slab is lane-dense once Cout >= 128 (production); 4 KiB here.
    o_ref[...] = _bn_relu(acc2, g2_ref, be2_ref)


def down_forward(x_nchw, params):
    """Forward of `Down(in_ch, out_ch)` (maxpool variant). Input/output NCHW."""
    w1, b1, g1, be1, w2, b2, g2, be2 = params

    x = jnp.transpose(x_nchw, (0, 2, 3, 1)).astype(jnp.float32)   # NCHW -> NHWC
    N, H, W, Cin = x.shape
    assert H % 2 == 0 and W % 2 == 0, "MaxPool2d(2) needs even H, W"
    Hh, Wh = H // 2, W // 2
    Cmid = w1.shape[-1]
    Cout = w2.shape[-1]
    R = N * Hh * Wh

    # Free row-major reshapes done wrapper-side so the kernel needs no
    # minor-dim-changing (relayout-heavy) reshapes:
    #   input   -> (N*Hh, 2, Wh, 2*Cin)  (pool parities split out)
    #   weights -> (9, Cin, Cmid) / (9, Cmid, Cout) bf16, tap-major
    x_k = x.reshape(N * Hh, 2, Wh, 2 * Cin)
    w1_k = w1.reshape(9, Cin, Cmid).astype(jnp.bfloat16)
    w2_k = w2.reshape(9, Cmid, Cout).astype(jnp.bfloat16)

    inputs = (x_k, w1_k, b1, g1, be1, w2_k, b2, g2, be2)

    def full_spec(shape):
        return pl.BlockSpec(shape, lambda i, _n=len(shape): (0,) * _n)

    out2d = pl.pallas_call(
        down_kernel,
        out_shape=jax.ShapeDtypeStruct((R, Cout), jnp.float32),
        grid=(1,),
        in_specs=[full_spec(a.shape) for a in inputs],
        out_specs=full_spec((R, Cout)),
        scratch_shapes=[
            pltpu.VMEM((N, Hh + 2, Wh + 2, Cin), jnp.bfloat16),   # padded pooled input
            pltpu.VMEM((N, Hh + 2, Wh + 2, Cmid), jnp.bfloat16),  # padded conv1 activation
        ],
        compiler_params=pltpu.CompilerParams(
            dimension_semantics=("arbitrary",),
            vmem_limit_bytes=32 * 1024 * 1024),   # safe on v5e/v6e/v7x at this size
    )(*inputs)

    out = out2d.reshape(N, Hh, Wh, Cout)          # free wrapper-side layout plumbing
    return jnp.transpose(out, (0, 3, 1, 2))       # NHWC -> NCHW


def init_params(key, cin, cout):
    """Deterministic synthetic parameters (shapes match Down(cin, cout))."""
    cmid = cout
    ks = jax.random.split(key, 8)
    w1 = jax.random.normal(ks[0], (3, 3, cin, cmid), jnp.float32) / (9 * cin) ** 0.5
    b1 = 0.1 * jax.random.normal(ks[1], (1, cmid), jnp.float32)
    g1 = 1.0 + 0.1 * jax.random.normal(ks[2], (1, cmid), jnp.float32)
    be1 = 0.1 * jax.random.normal(ks[3], (1, cmid), jnp.float32)
    w2 = jax.random.normal(ks[4], (3, 3, cmid, cout), jnp.float32) / (9 * cmid) ** 0.5
    b2 = 0.1 * jax.random.normal(ks[5], (1, cout), jnp.float32)
    g2 = 1.0 + 0.1 * jax.random.normal(ks[6], (1, cout), jnp.float32)
    be2 = 0.1 * jax.random.normal(ks[7], (1, cout), jnp.float32)
    return (w1, b1, g1, be1, w2, b2, g2, be2)


if __name__ == "__main__":
    key = jax.random.PRNGKey(0)
    kx, kp = jax.random.split(key)

    N, Cin, H, W = 2, 4, 16, 16
    Cout = 8

    x = jax.random.normal(kx, (N, Cin, H, W), jnp.float32)   # NCHW like PyTorch
    params = init_params(kp, Cin, Cout)

    y = down_forward(x, params)
    y = jax.block_until_ready(y)
    assert y.shape == (N, Cout, H // 2, W // 2), y.shape
    assert bool(jnp.all(jnp.isfinite(y)))
    print("KERNEL_OK")
</pallas_src>

<mosaic_0001>
module attributes {stable_mosaic.version = 11 : i64} {
  func.func @down_kernel(%arg0: i32, %arg1: memref<16x2x8x8xf32, #tpu.memory_space<vmem>>, %arg2: memref<9x4x8xbf16, #tpu.memory_space<vmem>>, %arg3: memref<1x8xf32, #tpu.memory_space<vmem>>, %arg4: memref<1x8xf32, #tpu.memory_space<vmem>>, %arg5: memref<1x8xf32, #tpu.memory_space<vmem>>, %arg6: memref<9x8x8xbf16, #tpu.memory_space<vmem>>, %arg7: memref<1x8xf32, #tpu.memory_space<vmem>>, %arg8: memref<1x8xf32, #tpu.memory_space<vmem>>, %arg9: memref<1x8xf32, #tpu.memory_space<vmem>>, %arg10: memref<128x8xf32, #tpu.memory_space<vmem>>, %arg11: memref<2x10x10x4xbf16, #tpu.memory_space<vmem>>, %arg12: memref<2x10x10x8xbf16, #tpu.memory_space<vmem>>) attributes {dimension_semantics = [#tpu.dimension_semantics<arbitrary>], iteration_bounds = array<i64: 1>, scalar_prefetch = 0 : i64, scratch_operands = 2 : i64, tpu.core_type = #tpu.core_type<tc>, window_params = [{pipeline_mode = #tpu.pipeline_mode<synchronous>, transform_indices = @transform_0, window_bounds = array<i64: 16, 2, 8, 8>}, {pipeline_mode = #tpu.pipeline_mode<synchronous>, transform_indices = @transform_1, window_bounds = array<i64: 9, 4, 8>}, {pipeline_mode = #tpu.pipeline_mode<synchronous>, transform_indices = @transform_2, window_bounds = array<i64: 1, 8>}, {pipeline_mode = #tpu.pipeline_mode<synchronous>, transform_indices = @transform_3, window_bounds = array<i64: 1, 8>}, {pipeline_mode = #tpu.pipeline_mode<synchronous>, transform_indices = @transform_4, window_bounds = array<i64: 1, 8>}, {pipeline_mode = #tpu.pipeline_mode<synchronous>, transform_indices = @transform_5, window_bounds = array<i64: 9, 8, 8>}, {pipeline_mode = #tpu.pipeline_mode<synchronous>, transform_indices = @transform_6, window_bounds = array<i64: 1, 8>}, {pipeline_mode = #tpu.pipeline_mode<synchronous>, transform_indices = @transform_7, window_bounds = array<i64: 1, 8>}, {pipeline_mode = #tpu.pipeline_mode<synchronous>, transform_indices = @transform_8, window_bounds = array<i64: 1, 8>}, {pipeline_mode = #tpu.pipeline_mode<synchronous>, transform_indices = @transform_9, window_bounds = array<i64: 128, 8>}]} {
    %c0 = arith.constant 0 : index
    %c0_0 = arith.constant 0 : index
    %c0_1 = arith.constant 0 : index
    %c0_2 = arith.constant 0 : index
    %0 = vector.load %arg1[%c0, %c0_0, %c0_1, %c0_2] : memref<16x2x8x8xf32, #tpu.memory_space<vmem>>, vector<16x1x8x8xf32>
    %c0_3 = arith.constant 0 : index
    %c1 = arith.constant 1 : index
    %c0_4 = arith.constant 0 : index
    %c0_5 = arith.constant 0 : index
    %1 = vector.load %arg1[%c0_3, %c1, %c0_4, %c0_5] : memref<16x2x8x8xf32, #tpu.memory_space<vmem>>, vector<16x1x8x8xf32>
    %2 = arith.maximumf %0, %1 : vector<16x1x8x8xf32>
    %3 = vector.extract_strided_slice %2 {offsets = [0, 0, 0, 0], sizes = [16, 1, 8, 4], strides = [1, 1, 1, 1]} : vector<16x1x8x8xf32> to vector<16x1x8x4xf32>
    %4 = vector.extract_strided_slice %2 {offsets = [0, 0, 0, 4], sizes = [16, 1, 8, 4], strides = [1, 1, 1, 1]} : vector<16x1x8x8xf32> to vector<16x1x8x4xf32>
    %5 = arith.maximumf %3, %4 : vector<16x1x8x4xf32>
    %cst = arith.constant 0.000000e+00 : bf16
    %6 = vector.broadcast %cst : bf16 to vector<2x1x10x4xbf16>
    %cst_6 = arith.constant 0.000000e+00 : bf16
    %7 = vector.broadcast %cst_6 : bf16 to vector<2x10x1x4xbf16>
    %c0_7 = arith.constant 0 : index
    %c0_8 = arith.constant 0 : index
    %c0_9 = arith.constant 0 : index
    %c0_10 = arith.constant 0 : index
    %8 = vector.load %arg11[%c0_7, %c0_8, %c0_9, %c0_10] : memref<2x10x10x4xbf16, #tpu.memory_space<vmem>>, vector<2x1x10x4xbf16>
    tpu.vector_store %arg11[%c0_7, %c0_8, %c0_9, %c0_10], %6 {strides = array<i32>} : memref<2x10x10x4xbf16, #tpu.memory_space<vmem>>, vector<2x1x10x4xbf16>,
    %c0_11 = arith.constant 0 : index
    %c9 = arith.constant 9 : index
    %c0_12 = arith.constant 0 : index
    %c0_13 = arith.constant 0 : index
    %9 = vector.load %arg11[%c0_11, %c9, %c0_12, %c0_13] : memref<2x10x10x4xbf16, #tpu.memory_space<vmem>>, vector<2x1x10x4xbf16>
    tpu.vector_store %arg11[%c0_11, %c9, %c0_12, %c0_13], %6 {strides = array<i32>} : memref<2x10x10x4xbf16, #tpu.memory_space<vmem>>, vector<2x1x10x4xbf16>,
    %c0_14 = arith.constant 0 : index
    %c0_15 = arith.constant 0 : index
    %c0_16 = arith.constant 0 : index
    %c0_17 = arith.constant 0 : index
    %10 = vector.load %arg11[%c0_14, %c0_15, %c0_16, %c0_17] : memref<2x10x10x4xbf16, #tpu.memory_space<vmem>>, vector<2x10x1x4xbf16>
    tpu.vector_store %arg11[%c0_14, %c0_15, %c0_16, %c0_17], %7 {strides = array<i32>} : memref<2x10x10x4xbf16, #tpu.memory_space<vmem>>, vector<2x10x1x4xbf16>,
    %c0_18 = arith.constant 0 : index
    %c0_19 = arith.constant 0 : index
    %c9_20 = arith.constant 9 : index
    %c0_21 = arith.constant 0 : index
    %11 = vector.load %arg11[%c0_18, %c0_19, %c9_20, %c0_21] : memref<2x10x10x4xbf16, #tpu.memory_space<vmem>>, vector<2x10x1x4xbf16>
    tpu.vector_store %arg11[%c0_18, %c0_19, %c9_20, %c0_21], %7 {strides = array<i32>} : memref<2x10x10x4xbf16, #tpu.memory_space<vmem>>, vector<2x10x1x4xbf16>,
    %12 = arith.truncf %5 : vector<16x1x8x4xf32> to vector<16x1x8x4xbf16>
    %13 = vector.shape_cast %12 : vector<16x1x8x4xbf16> to vector<2x8x8x4xbf16>
    %c0_22 = arith.constant 0 : index
    %c1_23 = arith.constant 1 : index
    %c1_24 = arith.constant 1 : index
    %c0_25 = arith.constant 0 : index
    %14 = vector.load %arg11[%c0_22, %c1_23, %c1_24, %c0_25] : memref<2x10x10x4xbf16, #tpu.memory_space<vmem>>, vector<2x8x8x4xbf16>
    tpu.vector_store %arg11[%c0_22, %c1_23, %c1_24, %c0_25], %13 {strides = array<i32>} : memref<2x10x10x4xbf16, #tpu.memory_space<vmem>>, vector<2x8x8x4xbf16>,
    %c0_26 = arith.constant 0 : index
    %c0_27 = arith.constant 0 : index
    %c0_28 = arith.constant 0 : index
    %c0_29 = arith.constant 0 : index
    %15 = vector.load %arg11[%c0_26, %c0_27, %c0_28, %c0_29] : memref<2x10x10x4xbf16, #tpu.memory_space<vmem>>, vector<2x8x8x4xbf16>
    %16 = vector.shape_cast %15 : vector<2x8x8x4xbf16> to vector<128x4xbf16>
    %c0_30 = arith.constant 0 : index
    %c0_31 = arith.constant 0 : index
    %c0_32 = arith.constant 0 : index
    %17 = vector.load %arg2[%c0_30, %c0_31, %c0_32] : memref<9x4x8xbf16, #tpu.memory_space<vmem>>, vector<1x4x8xbf16>
    %18 = vector.shape_cast %17 : vector<1x4x8xbf16> to vector<4x8xbf16>
    %cst_33 = arith.constant dense<0.000000e+00> : vector<128x8xf32>
    %19 = tpu.matmul %16, %18, %cst_33 {dimension_numbers = #tpu.dot_dimension_numbers<[1], [0], [0], [1], [0, 0, 1, 1], [], []>} : vector<128x4xbf16>, vector<4x8xbf16>, vector<128x8xf32> -> vector<128x8xf32>
    %c0_34 = arith.constant 0 : index
    %c0_35 = arith.constant 0 : index
    %c1_36 = arith.constant 1 : index
    %c0_37 = arith.constant 0 : index
    %20 = vector.load %arg11[%c0_34, %c0_35, %c1_36, %c0_37] : memref<2x10x10x4xbf16, #tpu.memory_space<vmem>>, vector<2x8x8x4xbf16>
    %21 = vector.shape_cast %20 : vector<2x8x8x4xbf16> to vector<128x4xbf16>
    %c1_38 = arith.constant 1 : index
    %c0_39 = arith.constant 0 : index
    %c0_40 = arith.constant 0 : index
    %22 = vector.load %arg2[%c1_38, %c0_39, %c0_40] : memref<9x4x8xbf16, #tpu.memory_space<vmem>>, vector<1x4x8xbf16>
    %23 = vector.shape_cast %22 : vector<1x4x8xbf16> to vector<4x8xbf16>
    %cst_41 = arith.constant dense<0.000000e+00> : vector<128x8xf32>
    %24 = tpu.matmul %21, %23, %cst_41 {dimension_numbers = #tpu.dot_dimension_numbers<[1], [0], [0], [1], [0, 0, 1, 1], [], []>} : vector<128x4xbf16>, vector<4x8xbf16>, vector<128x8xf32> -> vector<128x8xf32>
    %25 = arith.addf %19, %24 : vector<128x8xf32>
    %c0_42 = arith.constant 0 : index
    %c0_43 = arith.constant 0 : index
    %c2 = arith.constant 2 : index
    %c0_44 = arith.constant 0 : index
    %26 = vector.load %arg11[%c0_42, %c0_43, %c2, %c0_44] : memref<2x10x10x4xbf16, #tpu.memory_space<vmem>>, vector<2x8x8x4xbf16>
    %27 = vector.shape_cast %26 : vector<2x8x8x4xbf16> to vector<128x4xbf16>
    %c2_45 = arith.constant 2 : index
    %c0_46 = arith.constant 0 : index
    %c0_47 = arith.constant 0 : index
    %28 = vector.load %arg2[%c2_45, %c0_46, %c0_47] : memref<9x4x8xbf16, #tpu.memory_space<vmem>>, vector<1x4x8xbf16>
    %29 = vector.shape_cast %28 : vector<1x4x8xbf16> to vector<4x8xbf16>
    %cst_48 = arith.constant dense<0.000000e+00> : vector<128x8xf32>
    %30 = tpu.matmul %27, %29, %cst_48 {dimension_numbers = #tpu.dot_dimension_numbers<[1], [0], [0], [1], [0, 0, 1, 1], [], []>} : vector<128x4xbf16>, vector<4x8xbf16>, vector<128x8xf32> -> vector<128x8xf32>
    %31 = arith.addf %25, %30 : vector<128x8xf32>
    %c0_49 = arith.constant 0 : index
    %c1_50 = arith.constant 1 : index
    %c0_51 = arith.constant 0 : index
    %c0_52 = arith.constant 0 : index
    %32 = vector.load %arg11[%c0_49, %c1_50, %c0_51, %c0_52] : memref<2x10x10x4xbf16, #tpu.memory_space<vmem>>, vector<2x8x8x4xbf16>
    %33 = vector.shape_cast %32 : vector<2x8x8x4xbf16> to vector<128x4xbf16>
    %c3 = arith.constant 3 : index
    %c0_53 = arith.constant 0 : index
    %c0_54 = arith.constant 0 : index
    %34 = vector.load %arg2[%c3, %c0_53, %c0_54] : memref<9x4x8xbf16, #tpu.memory_space<vmem>>, vector<1x4x8xbf16>
    %35 = vector.shape_cast %34 : vector<1x4x8xbf16> to vector<4x8xbf16>
    %cst_55 = arith.constant dense<0.000000e+00> : vector<128x8xf32>
    %36 = tpu.matmul %33, %35, %cst_55 {dimension_numbers = #tpu.dot_dimension_numbers<[1], [0], [0], [1], [0, 0, 1, 1], [], []>} : vector<128x4xbf16>, vector<4x8xbf16>, vector<128x8xf32> -> vector<128x8xf32>
    %37 = arith.addf %31, %36 : vector<128x8xf32>
    %c0_56 = arith.constant 0 : index
    %c1_57 = arith.constant 1 : index
    %c1_58 = arith.constant 1 : index
    %c0_59 = arith.constant 0 : index
    %38 = vector.load %arg11[%c0_56, %c1_57, %c1_58, %c0_59] : memref<2x10x10x4xbf16, #tpu.memory_space<vmem>>, vector<2x8x8x4xbf16>
    %39 = vector.shape_cast %38 : vector<2x8x8x4xbf16> to vector<128x4xbf16>
    %c4 = arith.constant 4 : index
    %c0_60 = arith.constant 0 : index
    %c0_61 = arith.constant 0 : index
    %40 = vector.load %arg2[%c4, %c0_60, %c0_61] : memref<9x4x8xbf16, #tpu.memory_space<vmem>>, vector<1x4x8xbf16>
    %41 = vector.shape_cast %40 : vector<1x4x8xbf16> to vector<4x8xbf16>
    %cst_62 = arith.constant dense<0.000000e+00> : vector<128x8xf32>
    %42 = tpu.matmul %39, %41, %cst_62 {dimension_numbers = #tpu.dot_dimension_numbers<[1], [0], [0], [1], [0, 0, 1, 1], [], []>} : vector<128x4xbf16>, vector<4x8xbf16>, vector<128x8xf32> -> vector<128x8xf32>
    %43 = arith.addf %37, %42 : vector<128x8xf32>
    %c0_63 = arith.constant 0 : index
    %c1_64 = arith.constant 1 : index
    %c2_65 = arith.constant 2 : index
    %c0_66 = arith.constant 0 : index
    %44 = vector.load %arg11[%c0_63, %c1_64, %c2_65, %c0_66] : memref<2x10x10x4xbf16, #tpu.memory_space<vmem>>, vector<2x8x8x4xbf16>
    %45 = vector.shape_cast %44 : vector<2x8x8x4xbf16> to vector<128x4xbf16>
    %c5 = arith.constant 5 : index
    %c0_67 = arith.constant 0 : index
    %c0_68 = arith.constant 0 : index
    %46 = vector.load %arg2[%c5, %c0_67, %c0_68] : memref<9x4x8xbf16, #tpu.memory_space<vmem>>, vector<1x4x8xbf16>
    %47 = vector.shape_cast %46 : vector<1x4x8xbf16> to vector<4x8xbf16>
    %cst_69 = arith.constant dense<0.000000e+00> : vector<128x8xf32>
    %48 = tpu.matmul %45, %47, %cst_69 {dimension_numbers = #tpu.dot_dimension_numbers<[1], [0], [0], [1], [0, 0, 1, 1], [], []>} : vector<128x4xbf16>, vector<4x8xbf16>, vector<128x8xf32> -> vector<128x8xf32>
    %49 = arith.addf %43, %48 : vector<128x8xf32>
    %c0_70 = arith.constant 0 : index
    %c2_71 = arith.constant 2 : index
    %c0_72 = arith.constant 0 : index
    %c0_73 = arith.constant 0 : index
    %50 = vector.load %arg11[%c0_70, %c2_71, %c0_72, %c0_73] : memref<2x10x10x4xbf16, #tpu.memory_space<vmem>>, vector<2x8x8x4xbf16>
    %51 = vector.shape_cast %50 : vector<2x8x8x4xbf16> to vector<128x4xbf16>
    %c6 = arith.constant 6 : index
    %c0_74 = arith.constant 0 : index
    %c0_75 = arith.constant 0 : index
    %52 = vector.load %arg2[%c6, %c0_74, %c0_75] : memref<9x4x8xbf16, #tpu.memory_space<vmem>>, vector<1x4x8xbf16>
    %53 = vector.shape_cast %52 : vector<1x4x8xbf16> to vector<4x8xbf16>
    %cst_76 = arith.constant dense<0.000000e+00> : vector<128x8xf32>
    %54 = tpu.matmul %51, %53, %cst_76 {dimension_numbers = #tpu.dot_dimension_numbers<[1], [0], [0], [1], [0, 0, 1, 1], [], []>} : vector<128x4xbf16>, vector<4x8xbf16>, vector<128x8xf32> -> vector<128x8xf32>
    %55 = arith.addf %49, %54 : vector<128x8xf32>
    %c0_77 = arith.constant 0 : index
    %c2_78 = arith.constant 2 : index
    %c1_79 = arith.constant 1 : index
    %c0_80 = arith.constant 0 : index
    %56 = vector.load %arg11[%c0_77, %c2_78, %c1_79, %c0_80] : memref<2x10x10x4xbf16, #tpu.memory_space<vmem>>, vector<2x8x8x4xbf16>
    %57 = vector.shape_cast %56 : vector<2x8x8x4xbf16> to vector<128x4xbf16>
    %c7 = arith.constant 7 : index
    %c0_81 = arith.constant 0 : index
    %c0_82 = arith.constant 0 : index
    %58 = vector.load %arg2[%c7, %c0_81, %c0_82] : memref<9x4x8xbf16, #tpu.memory_space<vmem>>, vector<1x4x8xbf16>
    %59 = vector.shape_cast %58 : vector<1x4x8xbf16> to vector<4x8xbf16>
    %cst_83 = arith.constant dense<0.000000e+00> : vector<128x8xf32>
    %60 = tpu.matmul %57, %59, %cst_83 {dimension_numbers = #tpu.dot_dimension_numbers<[1], [0], [0], [1], [0, 0, 1, 1], [], []>} : vector<128x4xbf16>, vector<4x8xbf16>, vector<128x8xf32> -> vector<128x8xf32>
    %61 = arith.addf %55, %60 : vector<128x8xf32>
    %c0_84 = arith.constant 0 : index
    %c2_85 = arith.constant 2 : index
    %c2_86 = arith.constant 2 : index
    %c0_87 = arith.constant 0 : index
    %62 = vector.load %arg11[%c0_84, %c2_85, %c2_86, %c0_87] : memref<2x10x10x4xbf16, #tpu.memory_space<vmem>>, vector<2x8x8x4xbf16>
    %63 = vector.shape_cast %62 : vector<2x8x8x4xbf16> to vector<128x4xbf16>
    %c8 = arith.constant 8 : index
    %c0_88 = arith.constant 0 : index
    %c0_89 = arith.constant 0 : index
    %64 = vector.load %arg2[%c8, %c0_88, %c0_89] : memref<9x4x8xbf16, #tpu.memory_space<vmem>>, vector<1x4x8xbf16>
    %65 = vector.shape_cast %64 : vector<1x4x8xbf16> to vector<4x8xbf16>
    %cst_90 = arith.constant dense<0.000000e+00> : vector<128x8xf32>
    %66 = tpu.matmul %63, %65, %cst_90 {dimension_numbers = #tpu.dot_dimension_numbers<[1], [0], [0], [1], [0, 0, 1, 1], [], []>} : vector<128x4xbf16>, vector<4x8xbf16>, vector<128x8xf32> -> vector<128x8xf32>
    %67 = arith.addf %61, %66 : vector<128x8xf32>
    %c0_91 = arith.constant 0 : index
    %c0_92 = arith.constant 0 : index
    %68 = vector.load %arg3[%c0_91, %c0_92] : memref<1x8xf32, #tpu.memory_space<vmem>>, vector<1x8xf32>
    %69 = vector.broadcast %68 : vector<1x8xf32> to vector<128x8xf32>
    %70 = arith.addf %67, %69 : vector<128x8xf32>
    %cst_93 = arith.constant dense<0.000000e+00> : vector<8xf32>
    %71 = vector.multi_reduction <add>, %70, %cst_93 [0] : vector<128x8xf32> to vector<8xf32>
    %72 = vector.shape_cast %71 : vector<8xf32> to vector<1x8xf32>
    %cst_94 = arith.constant 7.812500e-03 : f32
    %73 = vector.broadcast %cst_94 : f32 to vector<1x8xf32>
    %74 = arith.mulf %72, %73 : vector<1x8xf32>
    %75 = vector.broadcast %74 : vector<1x8xf32> to vector<128x8xf32>
    %76 = arith.subf %70, %75 : vector<128x8xf32>
    %77 = arith.mulf %76, %76 : vector<128x8xf32>
    %cst_95 = arith.constant dense<0.000000e+00> : vector<8xf32>
    %78 = vector.multi_reduction <add>, %77, %cst_95 [0] : vector<128x8xf32> to vector<8xf32>
    %79 = vector.shape_cast %78 : vector<8xf32> to vector<1x8xf32>
    %cst_96 = arith.constant 7.812500e-03 : f32
    %80 = vector.broadcast %cst_96 : f32 to vector<1x8xf32>
    %81 = arith.mulf %79, %80 : vector<1x8xf32>
    %c0_97 = arith.constant 0 : index
    %c0_98 = arith.constant 0 : index
    %82 = vector.load %arg4[%c0_97, %c0_98] : memref<1x8xf32, #tpu.memory_space<vmem>>, vector<1x8xf32>
    %cst_99 = arith.constant 9.99999974E-6 : f32
    %83 = vector.broadcast %cst_99 : f32 to vector<1x8xf32>
    %84 = arith.addf %81, %83 : vector<1x8xf32>
    %85 = math.rsqrt %84 : vector<1x8xf32>
    %86 = arith.mulf %82, %85 : vector<1x8xf32>
    %87 = vector.broadcast %86 : vector<1x8xf32> to vector<128x8xf32>
    %88 = arith.mulf %76, %87 : vector<128x8xf32>
    %c0_100 = arith.constant 0 : index
    %c0_101 = arith.constant 0 : index
    %89 = vector.load %arg5[%c0_100, %c0_101] : memref<1x8xf32, #tpu.memory_space<vmem>>, vector<1x8xf32>
    %90 = vector.broadcast %89 : vector<1x8xf32> to vector<128x8xf32>
    %91 = arith.addf %88, %90 : vector<128x8xf32>
    %cst_102 = arith.constant 0.000000e+00 : f32
    %92 = vector.broadcast %cst_102 : f32 to vector<128x8xf32>
    %93 = arith.maximumf %91, %92 : vector<128x8xf32>
    %cst_103 = arith.constant 0.000000e+00 : bf16
    %94 = vector.broadcast %cst_103 : bf16 to vector<2x1x10x8xbf16>
    %cst_104 = arith.constant 0.000000e+00 : bf16
    %95 = vector.broadcast %cst_104 : bf16 to vector<2x10x1x8xbf16>
    %c0_105 = arith.constant 0 : index
    %c0_106 = arith.constant 0 : index
    %c0_107 = arith.constant 0 : index
    %c0_108 = arith.constant 0 : index
    %96 = vector.load %arg12[%c0_105, %c0_106, %c0_107, %c0_108] : memref<2x10x10x8xbf16, #tpu.memory_space<vmem>>, vector<2x1x10x8xbf16>
    tpu.vector_store %arg12[%c0_105, %c0_106, %c0_107, %c0_108], %94 {strides = array<i32>} : memref<2x10x10x8xbf16, #tpu.memory_space<vmem>>, vector<2x1x10x8xbf16>,
    %c0_109 = arith.constant 0 : index
    %c9_110 = arith.constant 9 : index
    %c0_111 = arith.constant 0 : index
    %c0_112 = arith.constant 0 : index
    %97 = vector.load %arg12[%c0_109, %c9_110, %c0_111, %c0_112] : memref<2x10x10x8xbf16, #tpu.memory_space<vmem>>, vector<2x1x10x8xbf16>
    tpu.vector_store %arg12[%c0_109, %c9_110, %c0_111, %c0_112], %94 {strides = array<i32>} : memref<2x10x10x8xbf16, #tpu.memory_space<vmem>>, vector<2x1x10x8xbf16>,
    %c0_113 = arith.constant 0 : index
    %c0_114 = arith.constant 0 : index
    %c0_115 = arith.constant 0 : index
    %c0_116 = arith.constant 0 : index
    %98 = vector.load %arg12[%c0_113, %c0_114, %c0_115, %c0_116] : memref<2x10x10x8xbf16, #tpu.memory_space<vmem>>, vector<2x10x1x8xbf16>
    tpu.vector_store %arg12[%c0_113, %c0_114, %c0_115, %c0_116], %95 {strides = array<i32>} : memref<2x10x10x8xbf16, #tpu.memory_space<vmem>>, vector<2x10x1x8xbf16>,
    %c0_117 = arith.constant 0 : index
    %c0_118 = arith.constant 0 : index
    %c9_119 = arith.constant 9 : index
    %c0_120 = arith.constant 0 : index
    %99 = vector.load %arg12[%c0_117, %c0_118, %c9_119, %c0_120] : memref<2x10x10x8xbf16, #tpu.memory_space<vmem>>, vector<2x10x1x8xbf16>
    tpu.vector_store %arg12[%c0_117, %c0_118, %c9_119, %c0_120], %95 {strides = array<i32>} : memref<2x10x10x8xbf16, #tpu.memory_space<vmem>>, vector<2x10x1x8xbf16>,
    %100 = arith.truncf %93 : vector<128x8xf32> to vector<128x8xbf16>
    %101 = vector.shape_cast %100 : vector<128x8xbf16> to vector<2x8x8x8xbf16>
    %c0_121 = arith.constant 0 : index
    %c1_122 = arith.constant 1 : index
    %c1_123 = arith.constant 1 : index
    %c0_124 = arith.constant 0 : index
    %102 = vector.load %arg12[%c0_121, %c1_122, %c1_123, %c0_124] : memref<2x10x10x8xbf16, #tpu.memory_space<vmem>>, vector<2x8x8x8xbf16>
    tpu.vector_store %arg12[%c0_121, %c1_122, %c1_123, %c0_124], %101 {strides = array<i32>} : memref<2x10x10x8xbf16, #tpu.memory_space<vmem>>, vector<2x8x8x8xbf16>,
    %c0_125 = arith.constant 0 : index
    %c0_126 = arith.constant 0 : index
    %c0_127 = arith.constant 0 : index
    %c0_128 = arith.constant 0 : index
    %103 = vector.load %arg12[%c0_125, %c0_126, %c0_127, %c0_128] : memref<2x10x10x8xbf16, #tpu.memory_space<vmem>>, vector<2x8x8x8xbf16>
    %104 = vector.shape_cast %103 : vector<2x8x8x8xbf16> to vector<128x8xbf16>
    %c0_129 = arith.constant 0 : index
    %c0_130 = arith.constant 0 : index
    %c0_131 = arith.constant 0 : index
    %105 = vector.load %arg6[%c0_129, %c0_130, %c0_131] : memref<9x8x8xbf16, #tpu.memory_space<vmem>>, vector<1x8x8xbf16>
    %106 = vector.shape_cast %105 : vector<1x8x8xbf16> to vector<8x8xbf16>
    %cst_132 = arith.constant dense<0.000000e+00> : vector<128x8xf32>
    %107 = tpu.matmul %104, %106, %cst_132 {dimension_numbers = #tpu.dot_dimension_numbers<[1], [0], [0], [1], [0, 0, 1, 1], [], []>} : vector<128x8xbf16>, vector<8x8xbf16>, vector<128x8xf32> -> vector<128x8xf32>
    %c0_133 = arith.constant 0 : index
    %c0_134 = arith.constant 0 : index
    %c1_135 = arith.constant 1 : index
    %c0_136 = arith.constant 0 : index
    %108 = vector.load %arg12[%c0_133, %c0_134, %c1_135, %c0_136] : memref<2x10x10x8xbf16, #tpu.memory_space<vmem>>, vector<2x8x8x8xbf16>
    %109 = vector.shape_cast %108 : vector<2x8x8x8xbf16> to vector<128x8xbf16>
    %c1_137 = arith.constant 1 : index
    %c0_138 = arith.constant 0 : index
    %c0_139 = arith.constant 0 : index
    %110 = vector.load %arg6[%c1_137, %c0_138, %c0_139] : memref<9x8x8xbf16, #tpu.memory_space<vmem>>, vector<1x8x8xbf16>
    %111 = vector.shape_cast %110 : vector<1x8x8xbf16> to vector<8x8xbf16>
    %cst_140 = arith.constant dense<0.000000e+00> : vector<128x8xf32>
    %112 = tpu.matmul %109, %111, %cst_140 {dimension_numbers = #tpu.dot_dimension_numbers<[1], [0], [0], [1], [0, 0, 1, 1], [], []>} : vector<128x8xbf16>, vector<8x8xbf16>, vector<128x8xf32> -> vector<128x8xf32>
    %113 = arith.addf %107, %112 : vector<128x8xf32>
    %c0_141 = arith.constant 0 : index
    %c0_142 = arith.constant 0 : index
    %c2_143 = arith.constant 2 : index
    %c0_144 = arith.constant 0 : index
    %114 = vector.load %arg12[%c0_141, %c0_142, %c2_143, %c0_144] : memref<2x10x10x8xbf16, #tpu.memory_space<vmem>>, vector<2x8x8x8xbf16>
    %115 = vector.shape_cast %114 : vector<2x8x8x8xbf16> to vector<128x8xbf16>
    %c2_145 = arith.constant 2 : index
    %c0_146 = arith.constant 0 : index
    %c0_147 = arith.constant 0 : index
    %116 = vector.load %arg6[%c2_145, %c0_146, %c0_147] : memref<9x8x8xbf16, #tpu.memory_space<vmem>>, vector<1x8x8xbf16>
    %117 = vector.shape_cast %116 : vector<1x8x8xbf16> to vector<8x8xbf16>
    %cst_148 = arith.constant dense<0.000000e+00> : vector<128x8xf32>
    %118 = tpu.matmul %115, %117, %cst_148 {dimension_numbers = #tpu.dot_dimension_numbers<[1], [0], [0], [1], [0, 0, 1, 1], [], []>} : vector<128x8xbf16>, vector<8x8xbf16>, vector<128x8xf32> -> vector<128x8xf32>
    %119 = arith.addf %113, %118 : vector<128x8xf32>
    %c0_149 = arith.constant 0 : index
    %c1_150 = arith.constant 1 : index
    %c0_151 = arith.constant 0 : index
    %c0_152 = arith.constant 0 : index
    %120 = vector.load %arg12[%c0_149, %c1_150, %c0_151, %c0_152] : memref<2x10x10x8xbf16, #tpu.memory_space<vmem>>, vector<2x8x8x8xbf16>
    %121 = vector.shape_cast %120 : vector<2x8x8x8xbf16> to vector<128x8xbf16>
    %c3_153 = arith.constant 3 : index
    %c0_154 = arith.constant 0 : index
    %c0_155 = arith.constant 0 : index
    %122 = vector.load %arg6[%c3_153, %c0_154, %c0_155] : memref<9x8x8xbf16, #tpu.memory_space<vmem>>, vector<1x8x8xbf16>
    %123 = vector.shape_cast %122 : vector<1x8x8xbf16> to vector<8x8xbf16>
    %cst_156 = arith.constant dense<0.000000e+00> : vector<128x8xf32>
    %124 = tpu.matmul %121, %123, %cst_156 {dimension_numbers = #tpu.dot_dimension_numbers<[1], [0], [0], [1], [0, 0, 1, 1], [], []>} : vector<128x8xbf16>, vector<8x8xbf16>, vector<128x8xf32> -> vector<128x8xf32>
    %125 = arith.addf %119, %124 : vector<128x8xf32>
    %c0_157 = arith.constant 0 : index
    %c1_158 = arith.constant 1 : index
    %c1_159 = arith.constant 1 : index
    %c0_160 = arith.constant 0 : index
    %126 = vector.load %arg12[%c0_157, %c1_158, %c1_159, %c0_160] : memref<2x10x10x8xbf16, #tpu.memory_space<vmem>>, vector<2x8x8x8xbf16>
    %127 = vector.shape_cast %126 : vector<2x8x8x8xbf16> to vector<128x8xbf16>
    %c4_161 = arith.constant 4 : index
    %c0_162 = arith.constant 0 : index
    %c0_163 = arith.constant 0 : index
    %128 = vector.load %arg6[%c4_161, %c0_162, %c0_163] : memref<9x8x8xbf16, #tpu.memory_space<vmem>>, vector<1x8x8xbf16>
    %129 = vector.shape_cast %128 : vector<1x8x8xbf16> to vector<8x8xbf16>
    %cst_164 = arith.constant dense<0.000000e+00> : vector<128x8xf32>
    %130 = tpu.matmul %127, %129, %cst_164 {dimension_numbers = #tpu.dot_dimension_numbers<[1], [0], [0], [1], [0, 0, 1, 1], [], []>} : vector<128x8xbf16>, vector<8x8xbf16>, vector<128x8xf32> -> vector<128x8xf32>
    %131 = arith.addf %125, %130 : vector<128x8xf32>
    %c0_165 = arith.constant 0 : index
    %c1_166 = arith.constant 1 : index
    %c2_167 = arith.constant 2 : index
    %c0_168 = arith.constant 0 : index
    %132 = vector.load %arg12[%c0_165, %c1_166, %c2_167, %c0_168] : memref<2x10x10x8xbf16, #tpu.memory_space<vmem>>, vector<2x8x8x8xbf16>
    %133 = vector.shape_cast %132 : vector<2x8x8x8xbf16> to vector<128x8xbf16>
    %c5_169 = arith.constant 5 : index
    %c0_170 = arith.constant 0 : index
    %c0_171 = arith.constant 0 : index
    %134 = vector.load %arg6[%c5_169, %c0_170, %c0_171] : memref<9x8x8xbf16, #tpu.memory_space<vmem>>, vector<1x8x8xbf16>
    %135 = vector.shape_cast %134 : vector<1x8x8xbf16> to vector<8x8xbf16>
    %cst_172 = arith.constant dense<0.000000e+00> : vector<128x8xf32>
    %136 = tpu.matmul %133, %135, %cst_172 {dimension_numbers = #tpu.dot_dimension_numbers<[1], [0], [0], [1], [0, 0, 1, 1], [], []>} : vector<128x8xbf16>, vector<8x8xbf16>, vector<128x8xf32> -> vector<128x8xf32>
    %137 = arith.addf %131, %136 : vector<128x8xf32>
    %c0_173 = arith.constant 0 : index
    %c2_174 = arith.constant 2 : index
    %c0_175 = arith.constant 0 : index
    %c0_176 = arith.constant 0 : index
    %138 = vector.load %arg12[%c0_173, %c2_174, %c0_175, %c0_176] : memref<2x10x10x8xbf16, #tpu.memory_space<vmem>>, vector<2x8x8x8xbf16>
    %139 = vector.shape_cast %138 : vector<2x8x8x8xbf16> to vector<128x8xbf16>
    %c6_177 = arith.constant 6 : index
    %c0_178 = arith.constant 0 : index
    %c0_179 = arith.constant 0 : index
    %140 = vector.load %arg6[%c6_177, %c0_178, %c0_179] : memref<9x8x8xbf16, #tpu.memory_space<vmem>>, vector<1x8x8xbf16>
    %141 = vector.shape_cast %140 : vector<1x8x8xbf16> to vector<8x8xbf16>
    %cst_180 = arith.constant dense<0.000000e+00> : vector<128x8xf32>
    %142 = tpu.matmul %139, %141, %cst_180 {dimension_numbers = #tpu.dot_dimension_numbers<[1], [0], [0], [1], [0, 0, 1, 1], [], []>} : vector<128x8xbf16>, vector<8x8xbf16>, vector<128x8xf32> -> vector<128x8xf32>
    %143 = arith.addf %137, %142 : vector<128x8xf32>
    %c0_181 = arith.constant 0 : index
    %c2_182 = arith.constant 2 : index
    %c1_183 = arith.constant 1 : index
    %c0_184 = arith.constant 0 : index
    %144 = vector.load %arg12[%c0_181, %c2_182, %c1_183, %c0_184] : memref<2x10x10x8xbf16, #tpu.memory_space<vmem>>, vector<2x8x8x8xbf16>
    %145 = vector.shape_cast %144 : vector<2x8x8x8xbf16> to vector<128x8xbf16>
    %c7_185 = arith.constant 7 : index
    %c0_186 = arith.constant 0 : index
    %c0_187 = arith.constant 0 : index
    %146 = vector.load %arg6[%c7_185, %c0_186, %c0_187] : memref<9x8x8xbf16, #tpu.memory_space<vmem>>, vector<1x8x8xbf16>
    %147 = vector.shape_cast %146 : vector<1x8x8xbf16> to vector<8x8xbf16>
    %cst_188 = arith.constant dense<0.000000e+00> : vector<128x8xf32>
    %148 = tpu.matmul %145, %147, %cst_188 {dimension_numbers = #tpu.dot_dimension_numbers<[1], [0], [0], [1], [0, 0, 1, 1], [], []>} : vector<128x8xbf16>, vector<8x8xbf16>, vector<128x8xf32> -> vector<128x8xf32>
    %149 = arith.addf %143, %148 : vector<128x8xf32>
    %c0_189 = arith.constant 0 : index
    %c2_190 = arith.constant 2 : index
    %c2_191 = arith.constant 2 : index
    %c0_192 = arith.constant 0 : index
    %150 = vector.load %arg12[%c0_189, %c2_190, %c2_191, %c0_192] : memref<2x10x10x8xbf16, #tpu.memory_space<vmem>>, vector<2x8x8x8xbf16>
    %151 = vector.shape_cast %150 : vector<2x8x8x8xbf16> to vector<128x8xbf16>
    %c8_193 = arith.constant 8 : index
    %c0_194 = arith.constant 0 : index
    %c0_195 = arith.constant 0 : index
    %152 = vector.load %arg6[%c8_193, %c0_194, %c0_195] : memref<9x8x8xbf16, #tpu.memory_space<vmem>>, vector<1x8x8xbf16>
    %153 = vector.shape_cast %152 : vector<1x8x8xbf16> to vector<8x8xbf16>
    %cst_196 = arith.constant dense<0.000000e+00> : vector<128x8xf32>
    %154 = tpu.matmul %151, %153, %cst_196 {dimension_numbers = #tpu.dot_dimension_numbers<[1], [0], [0], [1], [0, 0, 1, 1], [], []>} : vector<128x8xbf16>, vector<8x8xbf16>, vector<128x8xf32> -> vector<128x8xf32>
    %155 = arith.addf %149, %154 : vector<128x8xf32>
    %c0_197 = arith.constant 0 : index
    %c0_198 = arith.constant 0 : index
    %156 = vector.load %arg7[%c0_197, %c0_198] : memref<1x8xf32, #tpu.memory_space<vmem>>, vector<1x8xf32>
    %157 = vector.broadcast %156 : vector<1x8xf32> to vector<128x8xf32>
    %158 = arith.addf %155, %157 : vector<128x8xf32>
    %cst_199 = arith.constant dense<0.000000e+00> : vector<8xf32>
    %159 = vector.multi_reduction <add>, %158, %cst_199 [0] : vector<128x8xf32> to vector<8xf32>
    %160 = vector.shape_cast %159 : vector<8xf32> to vector<1x8xf32>
    %cst_200 = arith.constant 7.812500e-03 : f32
    %161 = vector.broadcast %cst_200 : f32 to vector<1x8xf32>
    %162 = arith.mulf %160, %161 : vector<1x8xf32>
    %163 = vector.broadcast %162 : vector<1x8xf32> to vector<128x8xf32>
    %164 = arith.subf %158, %163 : vector<128x8xf32>
    %165 = arith.mulf %164, %164 : vector<128x8xf32>
    %cst_201 = arith.constant dense<0.000000e+00> : vector<8xf32>
    %166 = vector.multi_reduction <add>, %165, %cst_201 [0] : vector<128x8xf32> to vector<8xf32>
    %167 = vector.shape_cast %166 : vector<8xf32> to vector<1x8xf32>
    %cst_202 = arith.constant 7.812500e-03 : f32
    %168 = vector.broadcast %cst_202 : f32 to vector<1x8xf32>
    %169 = arith.mulf %167, %168 : vector<1x8xf32>
    %c0_203 = arith.constant 0 : index
    %c0_204 = arith.constant 0 : index
    %170 = vector.load %arg8[%c0_203, %c0_204] : memref<1x8xf32, #tpu.memory_space<vmem>>, vector<1x8xf32>
    %cst_205 = arith.constant 9.99999974E-6 : f32
    %171 = vector.broadcast %cst_205 : f32 to vector<1x8xf32>
    %172 = arith.addf %169, %171 : vector<1x8xf32>
    %173 = math.rsqrt %172 : vector<1x8xf32>
    %174 = arith.mulf %170, %173 : vector<1x8xf32>
    %175 = vector.broadcast %174 : vector<1x8xf32> to vector<128x8xf32>
    %176 = arith.mulf %164, %175 : vector<128x8xf32>
    %c0_206 = arith.constant 0 : index
    %c0_207 = arith.constant 0 : index
    %177 = vector.load %arg9[%c0_206, %c0_207] : memref<1x8xf32, #tpu.memory_space<vmem>>, vector<1x8xf32>
    %178 = vector.broadcast %177 : vector<1x8xf32> to vector<128x8xf32>
    %179 = arith.addf %176, %178 : vector<128x8xf32>
    %cst_208 = arith.constant 0.000000e+00 : f32
    %180 = vector.broadcast %cst_208 : f32 to vector<128x8xf32>
    %181 = arith.maximumf %179, %180 : vector<128x8xf32>
    %c0_209 = arith.constant 0 : index
    %c0_210 = arith.constant 0 : index
    %182 = vector.load %arg10[%c0_209, %c0_210] : memref<128x8xf32, #tpu.memory_space<vmem>>, vector<128x8xf32>
    tpu.vector_store %arg10[%c0_209, %c0_210], %181 {strides = array<i32>} : memref<128x8xf32, #tpu.memory_space<vmem>>, vector<128x8xf32>,
    return
  }
  func.func @transform_0(%arg0: i32) -> (i32, i32, i32, i32) {
    %c0_i32 = arith.constant 0 : i32
    %c0_i32_0 = arith.constant 0 : i32
    %c0_i32_1 = arith.constant 0 : i32
    %c0_i32_2 = arith.constant 0 : i32
    %c0_i32_3 = arith.constant 0 : i32
    return %c0_i32, %c0_i32_0, %c0_i32_1, %c0_i32_2 : i32, i32, i32, i32
  }
  func.func @transform_1(%arg0: i32) -> (i32, i32, i32) {
    %c0_i32 = arith.constant 0 : i32
    %c0_i32_0 = arith.constant 0 : i32
    %c0_i32_1 = arith.constant 0 : i32
    %c0_i32_2 = arith.constant 0 : i32
    return %c0_i32, %c0_i32_0, %c0_i32_1 : i32, i32, i32
  }
  func.func @transform_2(%arg0: i32) -> (i32, i32) {
    %c0_i32 = arith.constant 0 : i32
    %c0_i32_0 = arith.constant 0 : i32
    %c0_i32_1 = arith.constant 0 : i32
    return %c0_i32, %c0_i32_0 : i32, i32
  }
  func.func @transform_3(%arg0: i32) -> (i32, i32) {
    %c0_i32 = arith.constant 0 : i32
    %c0_i32_0 = arith.constant 0 : i32
    %c0_i32_1 = arith.constant 0 : i32
    return %c0_i32, %c0_i32_0 : i32, i32
  }
  func.func @transform_4(%arg0: i32) -> (i32, i32) {
    %c0_i32 = arith.constant 0 : i32
    %c0_i32_0 = arith.constant 0 : i32
    %c0_i32_1 = arith.constant 0 : i32
    return %c0_i32, %c0_i32_0 : i32, i32
  }
  func.func @transform_5(%arg0: i32) -> (i32, i32, i32) {
    %c0_i32 = arith.constant 0 : i32
    %c0_i32_0 = arith.constant 0 : i32
    %c0_i32_1 = arith.constant 0 : i32
    %c0_i32_2 = arith.constant 0 : i32
    return %c0_i32, %c0_i32_0, %c0_i32_1 : i32, i32, i32
  }
  func.func @transform_6(%arg0: i32) -> (i32, i32) {
    %c0_i32 = arith.constant 0 : i32
    %c0_i32_0 = arith.constant 0 : i32
    %c0_i32_1 = arith.constant 0 : i32
    return %c0_i32, %c0_i32_0 : i32, i32
  }
  func.func @transform_7(%arg0: i32) -> (i32, i32) {
    %c0_i32 = arith.constant 0 : i32
    %c0_i32_0 = arith.constant 0 : i32
    %c0_i32_1 = arith.constant 0 : i32
    return %c0_i32, %c0_i32_0 : i32, i32
  }
  func.func @transform_8(%arg0: i32) -> (i32, i32) {
    %c0_i32 = arith.constant 0 : i32
    %c0_i32_0 = arith.constant 0 : i32
    %c0_i32_1 = arith.constant 0 : i32
    return %c0_i32, %c0_i32_0 : i32, i32
  }
  func.func @transform_9(%arg0: i32) -> (i32, i32) {
    %c0_i32 = arith.constant 0 : i32
    %c0_i32_0 = arith.constant 0 : i32
    %c0_i32_1 = arith.constant 0 : i32
    return %c0_i32, %c0_i32_0 : i32, i32
  }
}

</mosaic_0001>

<bundles_post_ra>
// kernel: tpu_custom_call.1
= control target key start
LH: loop header
LB: loop body
LE: loop exit
PB: predicated region body
PF: predicated region fallthrough
CT: control target
= control target key end

     0   :  { %vm162_vm0 = vcmask 27648   ;;  %s7849_s24 = smov 124   ;;  %vm164_vm1 = vcmask 24576   ;;  %vm3474_vm2 = vcmask 57344   ;;  %vm174_vm3 = vsmask.f32 256  ;;  %s11013_s0 = inlined_call_operand.vmem [shape: f32[16,2,8,8], index: 0, kind: input, shape index: {}]   ;;  %s11014_s1 = inlined_call_operand.vmem [shape: bf16[9,4,8], index: 1, kind: input, shape index: {}]   ;;  %s11015_s2 = inlined_call_operand.vmem [shape: f32[1,8], index: 2, kind: input, shape index: {}]   ;;  %s11016_s5 = inlined_call_operand.vmem [shape: bf16[9,8,8], index: 5, kind: input, shape index: {}]   ;;  %s11017_s3 = inlined_call_operand.vmem [shape: f32[1,8], index: 3, kind: input, shape index: {}]   ;;  %s11018_s4 = inlined_call_operand.vmem [shape: f32[1,8], index: 4, kind: input, shape index: {}]   ;;  %s11019_s6 = inlined_call_operand.vmem [shape: f32[1,8], index: 6, kind: input, shape index: {}]   ;;  %s11020_s7 = inlined_call_operand.vmem [shape: f32[1,8], index: 7, kind: input, shape index: {}]   ;;  %s11021_s8 = inlined_call_operand.vmem [shape: f32[1,8], index: 8, kind: input, shape index: {}]   ;;  %s11022_s9 = inlined_call_operand.vmem [shape: f32[128,8], index: 9, kind: output, shape index: {}]  }
   0x1   :  { %v36_v0 = vld [vmem:[%s11013_s0 + $0x30] sm:$0xff]  ;;  %v37_v1 = vld [vmem:[%s11013_s0 + $0x40] sm:$0xff]  ;;  %v6779_v2 = vld [vmem:[%s11013_s0 + $0x38] sm:$0xff]  ;;  %v11023_v37 = vmov 0   ;;  %vm236_vm4 = vsmask.f32 7938 }
   0x2   :  { %v6780_v3 = vld [vmem:[%s11013_s0 + $0x48] sm:$0xff]  ;;  %v7913_v4 = vmax.f32 %v36_v0, %v6779_v2  ;;  %v33_v5 = vld [vmem:[%s11013_s0] sm:$0xff]  ;;  %v34_v6 = vld [vmem:[%s11013_s0 + $0x10] sm:$0xff]  ;;  %163 = vst.msk [vmem:[#allocation2] sm:$0xf] %vm162_vm0, %v11023_v37  ;;  %vm932_vm7 = vcmask 1041408  }
   0x3   :  { %v7921_v7 = vmax.f32 %v37_v1, %v6780_v3  ;;  %v6776_v8 = vld [vmem:[%s11013_s0 + $0x8] sm:$0xff]  ;;  %v6777_v9 = vld [vmem:[%s11013_s0 + $0x18] sm:$0xff]  ;;  %v38_v10 = vld [vmem:[%s11013_s0 + $0x50] sm:$0xff]  ;;  %165 = vst.msk [vmem:[#allocation2 + $0x4] sm:$0x1] %vm164_vm1, %v11023_v37  ;;  %vm1245_vm8 = vcmask 1042432  }
   0x4   :  { %v7932_v11 = vmax.f32 %v33_v5, %v6776_v8  ;;  %v7934_v12 = vmax.f32 %v34_v6, %v6777_v9  ;;  %v39_v13 = vld [vmem:[%s11013_s0 + $0x60] sm:$0xff]  ;;  %v6781_v14 = vld [vmem:[%s11013_s0 + $0x58] sm:$0xff]  ;;  %v6782_v15 = vld [vmem:[%s11013_s0 + $0x68] sm:$0xff]  ;;  %166 = vst.msk [vmem:[#allocation2 + $0x50] sm:$0xf] %vm162_vm0, %v11023_v37  ;;  %vm1246_vm9 = vcmask 1046532  }
   0x5   :  { %v7771_v16 = vpack.i.bf16 %v7921_v7, %v7913_v4  ;;  %v7947_v17 = vmax.f32 %v38_v10, %v6781_v14  ;;  %v7949_v18 = vmax.f32 %v39_v13, %v6782_v15  ;;  %v35_v19 = vld [vmem:[%s11013_s0 + $0x20] sm:$0xff]  ;;  %v6778_v20 = vld [vmem:[%s11013_s0 + $0x28] sm:$0xff]  ;;  %v42_v23 = vld [vmem:[%s11013_s0 + $0x90] sm:$0xff]  ;;  %167 = vst.msk [vmem:[#allocation2 + $0x54] sm:$0x1] %vm164_vm1, %v11023_v37  ;;  %vm907_vm15 = vcmask 31744  }
   0x6   :  { %v41_v21 = vld [vmem:[%s11013_s0 + $0x80] sm:$0xff]  ;;  %v7766_v22 = vpack.i.bf16 %v7934_v12, %v7932_v11  ;;  %v6784_v24 = vld [vmem:[%s11013_s0 + $0x88] sm:$0xff]  ;;  %v6785_v25 = vld [vmem:[%s11013_s0 + $0x98] sm:$0xff]  ;;  %v7978_v28 = vmax.f32 %v35_v19, %v6778_v20  ;;  %169 = vst.msk [vmem:[#allocation2 + $0x48] sm:$0xf] %vm162_vm0, %v11023_v37 }
   0x7   :  { %7772 = vrot.lane.b32.xlu1 %v7771_v16, %s7849_s24  ;;  %v7776_v26 = vpack.i.bf16 %v7949_v18, %v7947_v17  ;;  %v44_v27 = vld [vmem:[%s11013_s0 + $0xb0] sm:$0xff]  ;;  %v7980_v29 = vmax.f32 %v41_v21, %v6784_v24  ;;  %v7982_v30 = vmax.f32 %v42_v23, %v6785_v25  ;;  %v45_v31 = vld [vmem:[%s11013_s0 + $0xc0] sm:$0xff]  ;;  %v6786_v33 = vld [vmem:[%s11013_s0 + $0xa8] sm:$0xff]  ;;  %170 = vst.msk [vmem:[#allocation2 + $0x4c] sm:$0x1] %vm164_vm1, %v11023_v37 }
   0x8   :  { %7767 = vrot.lane.b32.xlu0 %v7766_v22, %s7849_s24  ;;  %v43_v32 = vld [vmem:[%s11013_s0 + $0xa0] sm:$0xff]  ;;  %v6787_v34 = vld [vmem:[%s11013_s0 + $0xb8] sm:$0xff]  ;;  %v6788_v35 = vld [vmem:[%s11013_s0 + $0xc8] sm:$0xff]  ;;  %171 = vst.msk [vmem:[#allocation2 + $0x98] sm:$0xf] %vm162_vm0, %v11023_v37 }
   0x9   :  { %v46_v36 = vld [vmem:[%s11013_s0 + $0xd0] sm:$0xff]  ;;  %172 = vst.msk [vmem:[#allocation2 + $0x9c] sm:$0x1] %vm164_vm1, %v11023_v37  ;;  %v47_v38 = vld [vmem:[%s11013_s0 + $0xe0] sm:$0xff]  ;;  %v6789_v39 = vld [vmem:[%s11013_s0 + $0xd8] sm:$0xff]  ;;  %v8036_v41 = vmax.f32 %v43_v32, %v6786_v33  ;;  %v7781_v44 = vpack.i.bf16 %v7982_v30, %v7980_v29  ;;  %v8046_v45 = vmax.f32 %v44_v27, %v6787_v34  ;;  %v8048_v46 = vmax.f32 %v45_v31, %v6788_v35 }
   0xa   :  { %3475 = vst.msk [vmem:[#allocation3 + $0x4] sm:$0x1] %vm3474_vm2, %v11023_v37  ;;  %3477 = vst.msk [vmem:[#allocation3 + $0x54] sm:$0x1] %vm3474_vm2, %v11023_v37  ;;  %v6790_v40 = vld [vmem:[%s11013_s0 + $0xe8] sm:$0xff]  ;;  %v8038_v42 = vmax.f32 %v46_v36, %v6789_v39  ;;  %v48_v55 = vld [vmem:[%s11013_s0 + $0xf0] sm:$0xff] }
   0xb   :  { %3480 = vst.msk [vmem:[#allocation3 + $0x4c] sm:$0x1] %vm3474_vm2, %v11023_v37  ;;  %3482 = vst.msk [vmem:[#allocation3 + $0x9c] sm:$0x1] %vm3474_vm2, %v11023_v37  ;;  %7777 = vrot.lane.b32.xlu1 %v7776_v26, %s7849_s24  ;;  %v8040_v43 = vmax.f32 %v47_v38, %v6790_v40  ;;  %v188_v48 = vld [vmem:[#allocation2 + $0x20] sm:$0x1]  ;;  %v7786_v5 = vpack.i.bf16 %v8048_v46, %v8046_v45 }
   0xc   :  { %102 = vrot.lane.b32.xlu0 %v7978_v28, %s7849_s24  ;;  %vm8052_vm5 = vmand %vm164_vm1, %vm174_vm3  ;;  %v191_v49 = vld [vmem:[#allocation2 + $0x28] sm:$0x1]  ;;  %v250_v53 = vld [vmem:[#allocation2 + $0x24] sm:$0x1]  ;;  %vm654_vm10 = vsmask.f32 3328 }
   0xd   :  { %v189_v50 = vsel %vm8052_vm5, 0, %v188_v48  ;;  %v192_v51 = vsel %vm8052_vm5, 0, %v191_v49  ;;  %vm8062_vm6 = vmand %vm164_vm1, %vm236_vm4  ;;  %v253_v54 = vld [vmem:[#allocation2 + $0x2c] sm:$0x1]  ;;  %v6791_v56 = vld [vmem:[%s11013_s0 + $0xf8] sm:$0xff]  ;;  %v7791_v63 = vpack.i.bf16 %v8040_v43, %v8038_v42  ;;  %vm3472_vm1 = vcmask 60416  }
   0xe   :  { %190 = vst [vmem:[#allocation2 + $0x20] sm:$0x1] %v189_v50  ;;  %193 = vst [vmem:[#allocation2 + $0x28] sm:$0x1] %v192_v51  ;;  %v251_v57 = vsel %vm8062_vm6, 0, %v250_v53  ;;  %v254_v58 = vsel %vm8062_vm6, 0, %v253_v54  ;;  %v8106_v23 = vmax.f32 %v48_v55, %v6791_v56 }
   0xf   :  { %v179_v59 = vld [vmem:[#allocation2 + $0x8] sm:$0x1]  ;;  %v182_v60 = vld [vmem:[#allocation2 + $0x10] sm:$0x1]  ;;  %118 = vrot.lane.b32.xlu1 %v8036_v41, %s7849_s24  ;;  %v6783_v62 = vld [vmem:[%s11013_s0 + $0x78] sm:$0xff] }
  0x10   :  { %v40_v61 = vld [vmem:[%s11013_s0 + $0x70] sm:$0xff]  ;;  %252 = vst [vmem:[#allocation2 + $0x24] sm:$0x1] %v251_v57  ;;  %255 = vst [vmem:[#allocation2 + $0x2c] sm:$0x1] %v254_v58  ;;  %v180_v0 = vsel %vm8052_vm5, 0, %v179_v59  ;;  %7782 = vrot.lane.b32.xlu0 %v7781_v44, %s7849_s24 }
  0x11   :  { %v183_v1 = vsel %vm8052_vm5, 0, %v182_v60  ;;  %v241_v2 = vld [vmem:[#allocation2 + $0xc] sm:$0x1]  ;;  %v244_v3 = vld [vmem:[#allocation2 + $0x14] sm:$0x1]  ;;  %v8113_v31 = vmax.f32 %v40_v61, %v6783_v62  ;;  %vm8197_vm12 = vmor %vm1245_vm8, %vm1246_vm9 }
  0x12   :  { %181 = vst [vmem:[#allocation2 + $0x8] sm:$0x1] %v180_v0  ;;  %184 = vst [vmem:[#allocation2 + $0x10] sm:$0x1] %v183_v1  ;;  %v242_v6 = vsel %vm8062_vm6, 0, %v241_v2  ;;  %v245_v8 = vsel %vm8062_vm6, 0, %v244_v3 }
  0x13   :  { %v194_v9 = vld [vmem:[#allocation2 + $0x30] sm:$0x1]  ;;  %v197_v10 = vld [vmem:[#allocation2 + $0x38] sm:$0x1]  ;;  %243 = vst [vmem:[#allocation2 + $0xc] sm:$0x1] %v242_v6  ;;  %7792 = vrot.lane.b32.xlu1 %v7791_v63, %s7849_s24  ;;  %vm8260_vm14 = vmand %vm162_vm0, %vm236_vm4 }
  0x14   :  { %246 = vst [vmem:[#allocation2 + $0x14] sm:$0x1] %v245_v8  ;;  %v195_v13 = vsel %vm8052_vm5, 0, %v194_v9  ;;  %v198_v14 = vsel %vm8052_vm5, 0, %v197_v10  ;;  %v256_v15 = vld [vmem:[#allocation2 + $0x34] sm:$0x1]  ;;  %7787 = vrot.lane.b32.xlu0 %v7786_v5, %s7849_s24 }
  0x15   :  { %v259_v16 = vld [vmem:[#allocation2 + $0x3c] sm:$0x1]  ;;  %196 = vst [vmem:[#allocation2 + $0x30] sm:$0x1] %v195_v13  ;;  %199 = vst [vmem:[#allocation2 + $0x38] sm:$0x1] %v198_v14 }
  0x16   :  { %v257_v19 = vsel %vm8062_vm6, 0, %v256_v15  ;;  %v260_v20 = vsel %vm8062_vm6, 0, %v259_v16  ;;  %v185_v21 = vld [vmem:[#allocation2 + $0x18] sm:$0x1]  ;;  %v247_v22 = vld [vmem:[#allocation2 + $0x1c] sm:$0x1] }
  0x17   :  { %258 = vst [vmem:[#allocation2 + $0x34] sm:$0x1] %v257_v19  ;;  %261 = vst [vmem:[#allocation2 + $0x3c] sm:$0x1] %v260_v20  ;;  %v186_v24 = vsel %vm8052_vm5, 0, %v185_v21  ;;  %v248_v25 = vsel %vm8062_vm6, 0, %v247_v22  ;;  %128 = vrot.lane.b32.xlu1 %v8106_v23, %s7849_s24 }
  0x18   :  { %v209_v26 = vld [vmem:[#allocation2 + $0x58] sm:$0x1]  ;;  %v212_v27 = vld [vmem:[#allocation2 + $0x60] sm:$0x1]  ;;  %187 = vst [vmem:[#allocation2 + $0x18] sm:$0x1] %v186_v24  ;;  %112 = vrot.lane.b32.xlu0 %v8113_v31, %s7849_s24 }
  0x19   :  { %249 = vst [vmem:[#allocation2 + $0x1c] sm:$0x1] %v248_v25  ;;  %v210_v32 = vsel %vm8052_vm5, 0, %v209_v26  ;;  %v213_v33 = vsel %vm8052_vm5, 0, %v212_v27  ;;  %v271_v34 = vld [vmem:[#allocation2 + $0x5c] sm:$0x1] }
  0x1a   :  { %v274_v35 = vld [vmem:[#allocation2 + $0x64] sm:$0x1]  ;;  %211 = vst [vmem:[#allocation2 + $0x58] sm:$0x1] %v210_v32  ;;  %214 = vst [vmem:[#allocation2 + $0x60] sm:$0x1] %v213_v33 }
  0x1b   :  { %v272_v36 = vsel %vm8062_vm6, 0, %v271_v34  ;;  %v275_v38 = vsel %vm8062_vm6, 0, %v274_v35  ;;  %v218_v39 = vld [vmem:[#allocation2 + $0x70] sm:$0x1]  ;;  %v221_v44 = vld [vmem:[#allocation2 + $0x78] sm:$0x1] }
  0x1c   :  { %273 = vst [vmem:[#allocation2 + $0x5c] sm:$0x1] %v272_v36  ;;  %276 = vst [vmem:[#allocation2 + $0x64] sm:$0x1] %v275_v38  ;;  %v219_v40 = vsel %vm8052_vm5, 0, %v218_v39  ;;  %v222_v48 = vsel %vm8052_vm5, 0, %v221_v44 }
  0x1d   :  { %220 = vst [vmem:[#allocation2 + $0x70] sm:$0x1] %v219_v40  ;;  %223 = vst [vmem:[#allocation2 + $0x78] sm:$0x1] %v222_v48  ;;  %v280_v49 = vld [vmem:[#allocation2 + $0x74] sm:$0x1] }
  0x1e   :  { %v281_v50 = vsel %vm8062_vm6, 0, %v280_v49  ;;  %v283_v51 = vld [vmem:[#allocation2 + $0x7c] sm:$0x1]  ;;  %v215_v54 = vld [vmem:[#allocation2 + $0x68] sm:$0x1]  ;;  %vm3298_vm0 = vcmask 64512  }
  0x1f   :  { %282 = vst [vmem:[#allocation2 + $0x74] sm:$0x1] %v281_v50  ;;  %v284_v53 = vsel %vm8062_vm6, 0, %v283_v51  ;;  %v277_v55 = vld [vmem:[#allocation2 + $0x6c] sm:$0x1]  ;;  %v216_v57 = vsel %vm8052_vm5, 0, %v215_v54 }
  0x20   :  { %285 = vst [vmem:[#allocation2 + $0x7c] sm:$0x1] %v284_v53  ;;  %v200_v56 = vld [vmem:[#allocation2 + $0x40] sm:$0x1]  ;;  %v278_v58 = vsel %vm8062_vm6, 0, %v277_v55 }
  0x21   :  { %v201_v59 = vsel %vm8052_vm5, 0, %v200_v56  ;;  %217 = vst [vmem:[#allocation2 + $0x68] sm:$0x1] %v216_v57  ;;  %279 = vst [vmem:[#allocation2 + $0x6c] sm:$0x1] %v278_v58 }
  0x22   :  { %202 = vst [vmem:[#allocation2 + $0x40] sm:$0x1] %v201_v59  ;;  %v262_v60 = vld [vmem:[#allocation2 + $0x44] sm:$0x1]  ;;  %v224_v61 = vld [vmem:[#allocation2 + $0x80] sm:$0x1] }
  0x23   :  { %v227_v62 = vld [vmem:[#allocation2 + $0x88] sm:$0x1]  ;;  %v263_v63 = vsel %vm8062_vm6, 0, %v262_v60  ;;  %v225_v0 = vsel %vm8052_vm5, 0, %v224_v61  ;;  %v286_v2 = vld [vmem:[#allocation2 + $0x84] sm:$0x1] }
  0x24   :  { %v228_v1 = vsel %vm8052_vm5, 0, %v227_v62  ;;  %264 = vst [vmem:[#allocation2 + $0x44] sm:$0x1] %v263_v63  ;;  %226 = vst [vmem:[#allocation2 + $0x80] sm:$0x1] %v225_v0  ;;  %v287_v6 = vsel %vm8062_vm6, 0, %v286_v2 }
  0x25   :  { %229 = vst [vmem:[#allocation2 + $0x88] sm:$0x1] %v228_v1  ;;  %v289_v3 = vld [vmem:[#allocation2 + $0x8c] sm:$0x1]  ;;  %v637_v5 = vld [vmem:[%s11014_s1] sm:$0x3] }
  0x26   :  { %v290_v8 = vsel %vm8062_vm6, 0, %v289_v3  ;;  %7747 = vmatprep.subr.msk.bf16.mxu1 %vm932_vm7, %v637_v5  ;;  %v1098_v9 = vsel %vm932_vm7, %v637_v5, 0  ;;  %288 = vst [vmem:[#allocation2 + $0x84] sm:$0x1] %v287_v6  ;;  %v230_v10 = vld [vmem:[#allocation2 + $0x90] sm:$0x1] }
  0x27   :  { %291 = vst [vmem:[#allocation2 + $0x8c] sm:$0x1] %v290_v8  ;;  %7441 = vmatpush3.bf16.msra.mxu1 %v1098_v9  ;;  %v292_v13 = vld [vmem:[#allocation2 + $0x94] sm:$0x1]  ;;  %v176_v14 = vld [vmem:[#allocation2] sm:$0x1] }
  0x28   :  { %v231_v15 = vsel %vm8052_vm5, 0, %v230_v10  ;;  %v293_v16 = vsel %vm8062_vm6, 0, %v292_v13  ;;  %v177_v19 = vsel %vm8052_vm5, 0, %v176_v14  ;;  %v238_v20 = vld [vmem:[#allocation2 + $0x4] sm:$0x1]  ;;  %v11041_v3 = vmov 0 }
  0x29   :  { %232 = vst [vmem:[#allocation2 + $0x90] sm:$0x1] %v231_v15  ;;  %294 = vst [vmem:[#allocation2 + $0x94] sm:$0x1] %v293_v16  ;;  %v239_v21 = vsel %vm8062_vm6, 0, %v238_v20  ;;  %v11042_v3 = vsel %vm8197_vm12, 4294967295, %v11041_v3 }
  0x2a   :  { %178 = vst [vmem:[#allocation2] sm:$0x1] %v177_v19  ;;  %240 = vst [vmem:[#allocation2 + $0x4] sm:$0x1] %v239_v21  ;;  %v6808_v22 = vld [vmem:[%s11014_s1 + $0x2] sm:$0x3] }
  0x2b   :  { %7746 = vmatprep.subr.msk.bf16.mxu0 %vm932_vm7, %v6808_v22  ;;  %v934_v24 = vsel %vm932_vm7, %v6808_v22, 0  ;;  %v6857_v25 = vld [vmem:[%s11014_s1 + $0x4] sm:$0x3]  ;;  %v206_v26 = vld [vmem:[#allocation2 + $0x50] sm:$0x1]  ;;  %11043 = vst [vmem:[#allocation4_spill] sm:$0xff] %v11042_v3 }
  0x2c   :  { %7423 = vmatpush3.bf16.msra.mxu0 %v934_v24  ;;  %v207_v27 = vsel %vm8052_vm5, 0, %v206_v26  ;;  %v268_v32 = vld [vmem:[#allocation2 + $0x54] sm:$0x1]  ;;  %v6874_v34 = vld [vmem:[%s11014_s1 + $0x6] sm:$0x3]  ;;  %v11044_v5 = vmov 0 }
  0x2d   :  { %7748 = vmatprep.subr.msk.bf16.mxu0 %vm932_vm7, %v6857_v25  ;;  %208 = vst [vmem:[#allocation2 + $0x50] sm:$0x1] %v207_v27  ;;  %v269_v33 = vsel %vm8062_vm6, 0, %v268_v32  ;;  %7749 = vmatprep.subr.msk.bf16.mxu1 %vm932_vm7, %v6874_v34  ;;  %v1197_v59 = vld [vmem:[#allocation2] sm:$0xe]  ;;  %v8211_v16 = vsel %vm932_vm7, %v6857_v25, 0 }
  0x2e   :  { %270 = vst [vmem:[#allocation2 + $0x54] sm:$0x1] %v269_v33  ;;  %vm655_vm11 = vsmask.f32 7440  ;;  %v6841_v61 = vrot.slane %v1197_v59, 9  ;;  %v8233_v32 = vsel %vm932_vm7, %v6874_v34, 0 }
  0x2f   :  { %v1205_v62 = vld [vmem:[#allocation2 + $0x50] sm:$0xe]  ;;  %vm8201_vm13 = vmor %vm654_vm10, %vm655_vm11  ;;  %v8208_v8 = vld [vmem:[%s11014_s1 + $0x8] sm:$0x3] }
  0x30   :  { %v11045_v5 = vsel %vm8201_vm13, 4294967295, %v11044_v5  ;;  %v6849_v9 = vrot.slane %v1205_v62, 9  ;;  %v8220_v20 = vld [vmem:[%s11014_s1 + $0xa] sm:$0x3]  ;;  %v8237_v33 = vsel %vm932_vm7, %v8208_v8, 0 }
  0x31   :  { %v8181_v35 = vld [vmem:[#allocation2] sm:$0xf]  ;;  %v638_v53 = vld [vmem:[#allocation2 + $0x4] sm:$0x1]  ;;  %11046 = vst [vmem:[#allocation5_spill] sm:$0xff] %v11045_v5 }
  0x32   :  { %v658_v38 = vshrl.u32 %v8181_v35, 16  ;;  %v661_v39 = vshll.u32 %v8181_v35, 16  ;;  %v667_v56 = vshll.u32 %v638_v53, 16  ;;  %v1250_v60 = vrot.slane %v638_v53, 5  ;;  %v543_v59 = vld [vmem:[#allocation2 + $0x20] sm:$0xf] }
  0x34   :  { %v8183_v36 = vld [vmem:[#allocation2 + $0x50] sm:$0xf]  ;;  %v660_v48 = vrot.slane %v658_v38, 4  ;;  %v663_v49 = vrot.slane %v661_v39, 5  ;;  %v8191_v0 = vrot.slane %v667_v56, 5  ;;  %v8215_v19 = vsel %vm8197_vm12, %v6841_v61, %v1250_v60 }
  0x35   :  { %v770_v40 = vshrl.u32 %v8183_v36, 16  ;;  %v773_v44 = vshll.u32 %v8183_v36, 16  ;;  %v646_v54 = vld [vmem:[#allocation2 + $0x54] sm:$0x1]  ;;  %v6941_v38 = vld [vmem:[%s11014_s1 + $0xc] sm:$0x3] }
  0x36   :  { %v664_v55 = vor.u32 %v663_v49, %v660_v48  ;;  %v779_v58 = vshll.u32 %v646_v54, 16  ;;  %v1282_v10 = vrot.slane %v646_v54, 5  ;;  %v549_v60 = vld [vmem:[#allocation2 + $0x28] sm:$0xf] }
  0x37   :  { %v772_v50 = vrot.slane %v770_v40, 4  ;;  %v775_v51 = vrot.slane %v773_v44, 5 }
  0x38   :  { %v8189_v63 = vrot.slane %v664_v55, 4  ;;  %v8195_v2 = vrot.slane %v779_v58, 5 }
  0x39   :  { %v776_v57 = vor.u32 %v775_v51, %v772_v50 }
  0x3a   :  { %v670_v24 = vsel %vm8201_vm13, %v8189_v63, %v8191_v0 }
  0x3b   :  { %v8193_v1 = vrot.slane %v776_v57, 4 }
  0x3d   :  { %v782_v25 = vsel %vm8201_vm13, %v8193_v1, %v8195_v2 }
  0x79   :  { %v7773_v6 = vpop.permute.xlu1 %7772 }
  0x7a   :  { %v7775_v13 = vunpack.i.h.bf16 %v7773_v6  ;;  %v7774_v14 = vunpack.i.l.bf16 %v7773_v6  ;;  %v7768_v15 = vpop.permute.xlu0 %7767 }
  0x7b   :  { %v7770_v21 = vunpack.i.h.bf16 %v7768_v15  ;;  %v7769_v22 = vunpack.i.l.bf16 %v7768_v15 }
  0x7c   :  { %v150_v26 = vmax.f32 %v7921_v7, %v7775_v13  ;;  %v149_v27 = vmax.f32 %v7913_v4, %v7774_v14  ;;  %v8246_v7 = vsel %vm8197_vm12, %v6849_v9, %v1282_v10  ;;  %v8250_v4 = vsel %vm932_vm7, %v8220_v20, 0  ;;  %v546_v10 = vld [vmem:[#allocation2 + $0x24] sm:$0x1]  ;;  %v552_v13 = vld [vmem:[#allocation2 + $0x2c] sm:$0x1] }
  0x7d   :  { %v147_v39 = vmax.f32 %v7934_v12, %v7770_v21  ;;  %v146_v40 = vmax.f32 %v7932_v11, %v7769_v22  ;;  %v7778_v44 = vpop.permute.xlu1 %7777  ;;  %v8254_v11 = vsel %vm932_vm7, %v6941_v38, 0 }
  0x7e   :  { %v7232_v34 = vpack.c.bf16 %v150_v26, %v150_v26  ;;  %v7231_v48 = vpack.c.bf16 %v149_v27, %v149_v27  ;;  %v7780_v49 = vunpack.i.h.bf16 %v7778_v44  ;;  %v7779_v50 = vunpack.i.l.bf16 %v7778_v44  ;;  %v103_v51 = vpop.permute.xlu0 %102  ;;  %v525_v26 = vld [vmem:[#allocation2 + $0x8] sm:$0xf]  ;;  %v531_v27 = vld [vmem:[#allocation2 + $0x10] sm:$0xf] }
  0x7f   :  { %v7229_v53 = vpack.c.bf16 %v147_v39, %v147_v39  ;;  %v7228_v54 = vpack.c.bf16 %v146_v40, %v146_v40  ;;  %v148_v12 = vmax.f32 %v7978_v28, %v103_v51 }
  0x80   :  { %v395_v55 = vshrl.u32 %v7232_v34, 16  ;;  %v398_v56 = vshll.u32 %v7232_v34, 16  ;;  %v387_v57 = vshrl.u32 %v7231_v48, 16  ;;  %v390_v58 = vshll.u32 %v7231_v48, 16 }
  0x81   :  { %v371_v61 = vshrl.u32 %v7229_v53, 16  ;;  %v374_v62 = vshll.u32 %v7229_v53, 16  ;;  %v363_v6 = vshrl.u32 %v7228_v54, 16  ;;  %v366_v9 = vshll.u32 %v7228_v54, 16 }
  0x82   :  { %v397_v14 = vrot.slane %v395_v55, 7  ;;  %v389_v15 = vrot.slane %v387_v57, 7  ;;  %v152_v21 = vmax.f32 %v7949_v18, %v7780_v49  ;;  %v151_v28 = vmax.f32 %v7947_v17, %v7779_v50  ;;  %v7783_v22 = vpop.permute.xlu0 %7782  ;;  %v528_v18 = vld [vmem:[#allocation2 + $0xc] sm:$0x1]  ;;  %v534_v49 = vld [vmem:[#allocation2 + $0x14] sm:$0x1] }
  0x83   :  { %v373_v38 = vrot.slane %v371_v61, 7  ;;  %v365_v39 = vrot.slane %v363_v6, 7  ;;  %v7230_v40 = vpack.c.bf16 %v148_v12, %v148_v12  ;;  %v7785_v44 = vunpack.i.h.bf16 %v7783_v22 }
  0x84   :  { %v400_v48 = vor.u32 %v398_v56, %v397_v14  ;;  %v401_v51 = vrot.slane %v397_v14, 4  ;;  %v392_v53 = vor.u32 %v390_v58, %v389_v15  ;;  %v393_v54 = vrot.slane %v389_v15, 4 }
  0x85   :  { %v376_v17 = vor.u32 %v374_v62, %v373_v38  ;;  %v377_v50 = vrot.slane %v373_v38, 4  ;;  %v368_v55 = vor.u32 %v366_v9, %v365_v39  ;;  %v369_v57 = vrot.slane %v365_v39, 4 }
  0x86   :  { %v550_v12 = vsel %vm8260_vm14, %v400_v48, %v549_v60  ;;  %v553_v61 = vsel %vm8052_vm5, %v401_v51, %v552_v13  ;;  %v544_v6 = vsel %vm8260_vm14, %v392_v53, %v543_v59  ;;  %v547_v56 = vsel %vm8052_vm5, %v393_v54, %v546_v10  ;;  %v7788_v15 = vpop.permute.xlu0 %7787  ;;  %v119_v51 = vpop.permute.xlu1 %118 }
  0x87   :  { %551 = vst [vmem:[#allocation2 + $0x28] sm:$0xf] %v550_v12  ;;  %554 = vst [vmem:[#allocation2 + $0x2c] sm:$0x1] %v553_v61  ;;  %v532_v58 = vsel %vm8260_vm14, %v376_v17, %v531_v27  ;;  %v535_v62 = vsel %vm8052_vm5, %v377_v50, %v534_v49  ;;  %v526_v60 = vsel %vm8260_vm14, %v368_v55, %v525_v26  ;;  %v379_v13 = vshrl.u32 %v7230_v40, 16 }
  0x88   :  { %545 = vst [vmem:[#allocation2 + $0x20] sm:$0xf] %v544_v6  ;;  %548 = vst [vmem:[#allocation2 + $0x24] sm:$0x1] %v547_v56  ;;  %v529_v9 = vsel %vm8052_vm5, %v369_v57, %v528_v18  ;;  %v7234_v59 = vpack.c.bf16 %v152_v21, %v152_v21  ;;  %v7233_v10 = vpack.c.bf16 %v151_v28, %v151_v28  ;;  %v382_v14 = vshll.u32 %v7230_v40, 16 }
  0x89   :  { %533 = vst [vmem:[#allocation2 + $0x10] sm:$0xf] %v532_v58  ;;  %536 = vst [vmem:[#allocation2 + $0x14] sm:$0x1] %v535_v62  ;;  %v155_v27 = vmax.f32 %v7982_v30, %v7785_v44  ;;  %v7784_v38 = vunpack.i.l.bf16 %v7783_v22  ;;  %v7790_v39 = vunpack.i.h.bf16 %v7788_v15  ;;  %v7789_v48 = vunpack.i.l.bf16 %v7788_v15  ;;  %v555_v18 = vld [vmem:[#allocation2 + $0x30] sm:$0xf] }
  0x8a   :  { %527 = vst [vmem:[#allocation2 + $0x8] sm:$0xf] %v526_v60  ;;  %530 = vst [vmem:[#allocation2 + $0xc] sm:$0x1] %v529_v9  ;;  %v411_v53 = vshrl.u32 %v7234_v59, 16  ;;  %v414_v26 = vshll.u32 %v7234_v59, 16  ;;  %v156_v61 = vmax.f32 %v8036_v41, %v119_v51 }
  0x8b   :  { %v403_v54 = vshrl.u32 %v7233_v10, 16  ;;  %v406_v49 = vshll.u32 %v7233_v10, 16  ;;  %v558_v17 = vld [vmem:[#allocation2 + $0x34] sm:$0x1]  ;;  %v561_v50 = vld [vmem:[#allocation2 + $0x38] sm:$0xf]  ;;  %v7237_v57 = vpack.c.bf16 %v155_v27, %v155_v27  ;;  %v154_v21 = vmax.f32 %v7980_v29, %v7784_v38 }
  0x8c   :  { %v381_v55 = vrot.slane %v379_v13, 7  ;;  %v158_v28 = vmax.f32 %v8048_v46, %v7790_v39  ;;  %v413_v40 = vrot.slane %v411_v53, 7  ;;  %v537_v30 = vld [vmem:[#allocation2 + $0x18] sm:$0xf]  ;;  %v540_v22 = vld [vmem:[#allocation2 + $0x1c] sm:$0x1]  ;;  %v157_v44 = vmax.f32 %v8046_v45, %v7789_v48  ;;  %v113_v45 = vpop.permute.xlu0 %112 }
  0x8d   :  { %v405_v12 = vrot.slane %v403_v54, 7  ;;  %v564_v6 = vld [vmem:[#allocation2 + $0x3c] sm:$0x1]  ;;  %v435_v62 = vshrl.u32 %v7237_v57, 16  ;;  %v438_v60 = vshll.u32 %v7237_v57, 16  ;;  %v7236_v27 = vpack.c.bf16 %v154_v21, %v154_v21 }
  0x8e   :  { %v384_v56 = vor.u32 %v382_v14, %v381_v55  ;;  %v385_v58 = vrot.slane %v381_v55, 4  ;;  %v416_v9 = vor.u32 %v414_v26, %v413_v40  ;;  %v417_v59 = vrot.slane %v413_v40, 4  ;;  %v579_v48 = vld [vmem:[#allocation2 + $0x60] sm:$0xf]  ;;  %v582_v51 = vld [vmem:[#allocation2 + $0x64] sm:$0x1]  ;;  %v7793_v40 = vpop.permute.xlu1 %7792 }
  0x8f   :  { %v408_v10 = vor.u32 %v406_v49, %v405_v12  ;;  %v409_v13 = vrot.slane %v405_v12, 4  ;;  %v437_v15 = vrot.slane %v435_v62, 7  ;;  %v427_v54 = vshrl.u32 %v7236_v27, 16 }
  0x90   :  { %v538_v29 = vsel %vm8260_vm14, %v384_v56, %v537_v30  ;;  %v541_v46 = vsel %vm8052_vm5, %v385_v58, %v540_v22  ;;  %v562_v41 = vsel %vm8260_vm14, %v416_v9, %v561_v50  ;;  %v565_v14 = vsel %vm8052_vm5, %v417_v59, %v564_v6  ;;  %v573_v50 = vld [vmem:[#allocation2 + $0x58] sm:$0xf]  ;;  %v576_v6 = vld [vmem:[#allocation2 + $0x5c] sm:$0x1]  ;;  %v591_v9 = vld [vmem:[#allocation2 + $0x70] sm:$0xf] }
  0x91   :  { %v556_v38 = vsel %vm8260_vm14, %v408_v10, %v555_v18  ;;  %v559_v39 = vsel %vm8052_vm5, %v409_v13, %v558_v17  ;;  %539 = vst [vmem:[#allocation2 + $0x18] sm:$0xf] %v538_v29  ;;  %542 = vst [vmem:[#allocation2 + $0x1c] sm:$0x1] %v541_v46  ;;  %v440_v53 = vor.u32 %v438_v60, %v437_v15  ;;  %v441_v26 = vrot.slane %v437_v15, 4 }
  0x92   :  { %563 = vst [vmem:[#allocation2 + $0x38] sm:$0xf] %v562_v41  ;;  %566 = vst [vmem:[#allocation2 + $0x3c] sm:$0x1] %v565_v14  ;;  %v430_v49 = vshll.u32 %v7236_v27, 16  ;;  %v7240_v55 = vpack.c.bf16 %v158_v28, %v158_v28  ;;  %v7239_v57 = vpack.c.bf16 %v157_v44, %v157_v44  ;;  %v7238_v21 = vpack.c.bf16 %v156_v61, %v156_v61 }
  0x93   :  { %557 = vst [vmem:[#allocation2 + $0x30] sm:$0xf] %v556_v38  ;;  %560 = vst [vmem:[#allocation2 + $0x34] sm:$0x1] %v559_v39  ;;  %v153_v18 = vmax.f32 %v8113_v31, %v113_v45  ;;  %v580_v17 = vsel %vm8260_vm14, %v440_v53, %v579_v48  ;;  %v583_v12 = vsel %vm8052_vm5, %v441_v26, %v582_v51  ;;  %v429_v30 = vrot.slane %v427_v54, 7 }
  0x94   :  { %v7795_v22 = vunpack.i.h.bf16 %v7793_v40  ;;  %581 = vst [vmem:[#allocation2 + $0x60] sm:$0xf] %v580_v17  ;;  %584 = vst [vmem:[#allocation2 + $0x64] sm:$0x1] %v583_v12  ;;  %v459_v56 = vshrl.u32 %v7240_v55, 16  ;;  %v462_v58 = vshll.u32 %v7240_v55, 16  ;;  %v7794_v38 = vunpack.i.l.bf16 %v7793_v40 }
  0x95   :  { %v451_v62 = vshrl.u32 %v7239_v57, 16  ;;  %v454_v28 = vshll.u32 %v7239_v57, 16  ;;  %v432_v44 = vor.u32 %v430_v49, %v429_v30  ;;  %v433_v61 = vrot.slane %v429_v30, 4  ;;  %v597_v59 = vld [vmem:[#allocation2 + $0x78] sm:$0xf] }
  0x96   :  { %v443_v60 = vshrl.u32 %v7238_v21, 16  ;;  %v446_v31 = vshll.u32 %v7238_v21, 16  ;;  %v461_v10 = vrot.slane %v459_v56, 7  ;;  %v7235_v29 = vpack.c.bf16 %v153_v18, %v153_v18  ;;  %v594_v45 = vld [vmem:[#allocation2 + $0x74] sm:$0x1] }
  0x97   :  { %v453_v13 = vrot.slane %v451_v62, 7  ;;  %v160_v46 = vmax.f32 %v8040_v43, %v7795_v22  ;;  %v574_v15 = vsel %vm8260_vm14, %v432_v44, %v573_v50  ;;  %v577_v27 = vsel %vm8052_vm5, %v433_v61, %v576_v6  ;;  %v600_v41 = vld [vmem:[#allocation2 + $0x7c] sm:$0x1]  ;;  %v585_v26 = vld [vmem:[#allocation2 + $0x68] sm:$0xf]  ;;  %v129_v50 = vpop.permute.xlu1 %128 }
  0x98   :  { %v445_v14 = vrot.slane %v443_v60, 7  ;;  %575 = vst [vmem:[#allocation2 + $0x58] sm:$0xf] %v574_v15  ;;  %578 = vst [vmem:[#allocation2 + $0x5c] sm:$0x1] %v577_v27  ;;  %v464_v39 = vor.u32 %v462_v58, %v461_v10  ;;  %v465_v48 = vrot.slane %v461_v10, 4  ;;  %v161_v44 = vmax.f32 %v8106_v23, %v129_v50 }
  0x99   :  { %v456_v51 = vor.u32 %v454_v28, %v453_v13  ;;  %v457_v53 = vrot.slane %v453_v13, 4  ;;  %v588_v54 = vld [vmem:[#allocation2 + $0x6c] sm:$0x1]  ;;  %v419_v55 = vshrl.u32 %v7235_v29, 16  ;;  %v422_v57 = vshll.u32 %v7235_v29, 16 }
  0x9a   :  { %v448_v43 = vor.u32 %v446_v31, %v445_v14  ;;  %v449_v49 = vrot.slane %v445_v14, 4  ;;  %v622_v21 = vld [vmem:[#allocation2 + $0x8] sm:$0xf]  ;;  %v598_v18 = vsel %vm8260_vm14, %v464_v39, %v597_v59  ;;  %v601_v40 = vsel %vm8052_vm5, %v465_v48, %v600_v41  ;;  %v567_v6 = vld [vmem:[#allocation2 + $0x40] sm:$0xf] }
  0x9b   :  { %v592_v17 = vsel %vm8260_vm14, %v456_v51, %v591_v9  ;;  %v595_v12 = vsel %vm8052_vm5, %v457_v53, %v594_v45  ;;  %599 = vst [vmem:[#allocation2 + $0x78] sm:$0xf] %v598_v18  ;;  %602 = vst [vmem:[#allocation2 + $0x7c] sm:$0x1] %v601_v40  ;;  %v421_v56 = vrot.slane %v419_v55, 7  ;;  %v7242_v58 = vpack.c.bf16 %v160_v46, %v160_v46 }
  0x9c   :  { %593 = vst [vmem:[#allocation2 + $0x70] sm:$0xf] %v592_v17  ;;  %596 = vst [vmem:[#allocation2 + $0x74] sm:$0x1] %v595_v12  ;;  %v586_v30 = vsel %vm8260_vm14, %v448_v43, %v585_v26  ;;  %v589_v22 = vsel %vm8052_vm5, %v449_v49, %v588_v54  ;;  %v570_v62 = vld [vmem:[#allocation2 + $0x44] sm:$0x1]  ;;  %v159_v28 = vmax.f32 %v8038_v42, %v7794_v38 }
  0x9d   :  { %587 = vst [vmem:[#allocation2 + $0x68] sm:$0xf] %v586_v30  ;;  %590 = vst [vmem:[#allocation2 + $0x6c] sm:$0x1] %v589_v22  ;;  %v672_v61 = vshrl.u32 %v622_v21, 16  ;;  %v675_v60 = vshll.u32 %v622_v21, 16  ;;  %v424_v31 = vor.u32 %v422_v57, %v421_v56  ;;  %v7243_v15 = vpack.c.bf16 %v161_v44, %v161_v44 }
  0x9e   :  { %v425_v9 = vrot.slane %v421_v56, 4  ;;  %v475_v59 = vshrl.u32 %v7242_v58, 16  ;;  %v478_v10 = vshll.u32 %v7242_v58, 16  ;;  %v609_v13 = vld [vmem:[#allocation2 + $0x88] sm:$0xf]  ;;  %v7241_v29 = vpack.c.bf16 %v159_v28, %v159_v28 }
  0x9f   :  { %v8321_v27 = vrot.slane %v672_v61, 4  ;;  %v8323_v45 = vrot.slane %v675_v60, 5  ;;  %v623_v46 = vld [vmem:[#allocation2 + $0x10] sm:$0xf]  ;;  %v568_v41 = vsel %vm8260_vm14, %v424_v31, %v567_v6  ;;  %v612_v23 = vld [vmem:[#allocation2 + $0x8c] sm:$0x1]  ;;  %v6825_v38 = vcombine.low %v8181_v35, %v622_v21 }
  0xa0   :  { %v571_v42 = vsel %vm8052_vm5, %v425_v9, %v570_v62  ;;  %v477_v14 = vrot.slane %v475_v59, 7  ;;  %v624_v39 = vld [vmem:[#allocation2 + $0x18] sm:$0xf]  ;;  %569 = vst [vmem:[#allocation2 + $0x40] sm:$0xf] %v568_v41  ;;  %v467_v48 = vshrl.u32 %v7241_v29, 16 }
  0xa1   :  { %572 = vst [vmem:[#allocation2 + $0x44] sm:$0x1] %v571_v42  ;;  %v470_v51 = vshll.u32 %v7241_v29, 16  ;;  %v483_v53 = vshrl.u32 %v7243_v15, 16  ;;  %v486_v26 = vshll.u32 %v7243_v15, 16  ;;  %7442 = vmatprep.mubr.msk.bf16.mxu1 %vm907_vm15, %v6825_v38  ;;  %v686_v57 = vshrl.u32 %v623_v46, 16 }
  0xa2   :  { %v603_v54 = vld [vmem:[#allocation2 + $0x80] sm:$0xf]  ;;  %v606_v43 = vld [vmem:[#allocation2 + $0x84] sm:$0x1]  ;;  %v480_v49 = vor.u32 %v478_v10, %v477_v14  ;;  %v481_v55 = vrot.slane %v477_v14, 4  ;;  %v689_v50 = vshll.u32 %v623_v46, 16  ;;  %v6826_v10 = vcombine.low %v623_v46, %v624_v39 }
  0xa3   :  { %v469_v18 = vrot.slane %v467_v48, 7  ;;  %v485_v40 = vrot.slane %v483_v53, 7  ;;  %v700_v17 = vshrl.u32 %v624_v39, 16  ;;  %v703_v12 = vshll.u32 %v624_v39, 16  ;;  %v625_v35 = vld [vmem:[#allocation2 + $0x20] sm:$0xf] }
  0xa4   :  { %v610_v21 = vsel %vm8260_vm14, %v480_v49, %v609_v13  ;;  %v613_v30 = vsel %vm8052_vm5, %v481_v55, %v612_v23  ;;  %v615_v22 = vld [vmem:[#allocation2 + $0x90] sm:$0xf]  ;;  %v618_v6 = vld [vmem:[#allocation2 + $0x94] sm:$0x1]  ;;  %v688_v56 = vrot.slane %v686_v57, 4  ;;  %v691_v58 = vrot.slane %v689_v50, 5  ;;  %7443 = vmatmul.mubr.msk.bf16.vlgmr.msra.gmra.mxu1 %vm907_vm15, %v6826_v10 }
  0xa5   :  { %611 = vst [vmem:[#allocation2 + $0x88] sm:$0xf] %v610_v21  ;;  %614 = vst [vmem:[#allocation2 + $0x8c] sm:$0x1] %v613_v30  ;;  %v472_v62 = vor.u32 %v470_v51, %v469_v18  ;;  %v473_v28 = vrot.slane %v469_v18, 4  ;;  %v488_v44 = vor.u32 %v486_v26, %v485_v40  ;;  %v489_v61 = vrot.slane %v485_v40, 4  ;;  %7477 = vmatpush3.bf16.msra.mxu1 %v8233_v32 }
  0xa6   :  { %v626_v60 = vld [vmem:[#allocation2 + $0x28] sm:$0xf]  ;;  %v8335_v31 = vld [vmem:[#allocation2 + $0xc] sm:$0x1]  ;;  %v702_v9 = vrot.slane %v700_v17, 4  ;;  %v705_v59 = vrot.slane %v703_v12, 5  ;;  %v678_v53 = vor.u32 %v8323_v45, %v8321_v27  ;;  %7751 = vmatprep.subr.msk.bf16.mxu1 %vm932_vm7, %v8220_v20 }
  0xa7   :  { %v714_v13 = vshrl.u32 %v625_v35, 16  ;;  %v627_v29 = vld [vmem:[#allocation2 + $0x30] sm:$0xf]  ;;  %v604_v15 = vsel %vm8260_vm14, %v472_v62, %v603_v54  ;;  %v607_v41 = vsel %vm8052_vm5, %v473_v28, %v606_v43  ;;  %v616_v42 = vsel %vm8260_vm14, %v488_v44, %v615_v22  ;;  %v628_v14 = vld [vmem:[#allocation2 + $0x38] sm:$0xf] }
  0xa8   :  { %v619_v23 = vsel %vm8052_vm5, %v489_v61, %v618_v6  ;;  %605 = vst [vmem:[#allocation2 + $0x80] sm:$0xf] %v604_v15  ;;  %608 = vst [vmem:[#allocation2 + $0x84] sm:$0x1] %v607_v41  ;;  %v717_v38 = vshll.u32 %v625_v35, 16  ;;  %v728_v39 = vshrl.u32 %v626_v60, 16  ;;  %v6827_v51 = vcombine.low %v625_v35, %v626_v60 }
  0xa9   :  { %617 = vst [vmem:[#allocation2 + $0x90] sm:$0xf] %v616_v42  ;;  %620 = vst [vmem:[#allocation2 + $0x94] sm:$0x1] %v619_v23  ;;  %v716_v46 = vrot.slane %v714_v13, 4  ;;  %v731_v48 = vshll.u32 %v626_v60, 16  ;;  %v6828_v12 = vcombine.low %v627_v29, %v628_v14  ;;  %v692_v35 = vor.u32 %v691_v58, %v688_v56 }
  0xaa   :  { %v681_v34 = vshll.u32 %v8335_v31, 16  ;;  %v1254_v26 = vrot.slane %v8335_v31, 5  ;;  %v719_v54 = vrot.slane %v717_v38, 5  ;;  %v730_v43 = vrot.slane %v728_v39, 4  ;;  %v8351_v57 = vld [vmem:[#allocation2 + $0x14] sm:$0x1]  ;;  %7446 = vmatprep.mubr.msk.bf16.mxu1 %vm907_vm15, %v6827_v51 }
  0xab   :  { %v733_v49 = vrot.slane %v731_v48, 5  ;;  %v742_v55 = vshrl.u32 %v627_v29, 16  ;;  %v679_v50 = vrot.slane %v678_v53, 4  ;;  %v745_v27 = vshll.u32 %v627_v29, 16  ;;  %v8358_v32 = vld [vmem:[#allocation2 + $0x1c] sm:$0x1] }
  0xac   :  { %v683_v18 = vrot.slane %v681_v34, 5  ;;  %v756_v45 = vshrl.u32 %v628_v14, 16  ;;  %v759_v17 = vshll.u32 %v628_v14, 16  ;;  %v695_v20 = vshll.u32 %v8351_v57, 16  ;;  %v8365_v6 = vld [vmem:[#allocation2 + $0x24] sm:$0x1]  ;;  %7447 = vmatmul.mubr.msk.bf16.gmra.mxu1 %vm907_vm15, %v6828_v12 }
  0xad   :  { %v8356_v40 = vrot.slane %v742_v55, 4  ;;  %v747_v30 = vrot.slane %v745_v27, 5  ;;  %v693_v44 = vrot.slane %v692_v35, 4  ;;  %v706_v56 = vor.u32 %v705_v59, %v702_v9  ;;  %v630_v58 = vld [vmem:[#allocation2 + $0x58] sm:$0xf] }
  0xae   :  { %v684_v21 = vsel %vm8201_vm13, %v679_v50, %v683_v18  ;;  %v8362_v22 = vrot.slane %v756_v45, 4  ;;  %v8372_v28 = vrot.slane %v759_v17, 5  ;;  %v697_v61 = vrot.slane %v695_v20, 5  ;;  %v8377_v29 = vld [vmem:[#allocation2 + $0x2c] sm:$0x1] }
  0xaf   :  { %v6809_v62 = vcombine.low %v670_v24, %v684_v21  ;;  %v709_v60 = vshll.u32 %v8358_v32, 16  ;;  %v1258_v10 = vrot.slane %v8351_v57, 5  ;;  %v1262_v13 = vrot.slane %v8358_v32, 5  ;;  %v631_v9 = vld [vmem:[#allocation2 + $0x60] sm:$0xf] }
  0xb0   :  { %v707_v63 = vrot.slane %v706_v56, 4  ;;  %v720_v0 = vor.u32 %v719_v54, %v716_v46  ;;  %v723_v24 = vshll.u32 %v8365_v6, 16  ;;  %v734_v15 = vor.u32 %v733_v49, %v730_v43  ;;  %v632_v14 = vld [vmem:[#allocation2 + $0x68] sm:$0xf]  ;;  %v8393_v12 = vld [vmem:[#allocation2 + $0x34] sm:$0x1] }
  0xb1   :  { %7424 = vmatprep.mubr.msk.bf16.mxu0 %vm907_vm15, %v6809_v62  ;;  %v698_v59 = vsel %vm8201_vm13, %v693_v44, %v697_v61  ;;  %v711_v41 = vrot.slane %v709_v60, 5  ;;  %v737_v42 = vshll.u32 %v8377_v29, 16  ;;  %v784_v23 = vshrl.u32 %v630_v58, 16  ;;  %v8396_v20 = vld [vmem:[#allocation2 + $0x3c] sm:$0x1] }
  0xb2   :  { %v721_v38 = vrot.slane %v720_v0, 4  ;;  %v725_v39 = vrot.slane %v723_v24, 5  ;;  %v735_v48 = vrot.slane %v734_v15, 4  ;;  %v787_v51 = vshll.u32 %v630_v58, 16  ;;  %v633_v44 = vld [vmem:[#allocation2 + $0x70] sm:$0xf] }
  0xb3   :  { %v712_v53 = vsel %vm8201_vm13, %v707_v63, %v711_v41  ;;  %v739_v46 = vrot.slane %v737_v42, 5  ;;  %v786_v34 = vrot.slane %v784_v23, 4  ;;  %v6829_v54 = vcombine.low %v8183_v36, %v630_v58  ;;  %v634_v63 = vld [vmem:[#allocation2 + $0x78] sm:$0xf]  ;;  %v1208_v32 = vld [vmem:[#allocation2 + $0x68] sm:$0xe] }
  0xb4   :  { %v6810_v43 = vcombine.low %v698_v59, %v712_v53  ;;  %v726_v49 = vsel %vm8201_vm13, %v721_v38, %v725_v39  ;;  %v789_v55 = vrot.slane %v787_v51, 5  ;;  %v798_v50 = vshrl.u32 %v631_v9, 16  ;;  %v635_v39 = vld [vmem:[#allocation2 + $0x80] sm:$0xf]  ;;  %v636_v53 = vld [vmem:[#allocation2 + $0x88] sm:$0xf] }
  0xb5   :  { %v740_v18 = vsel %vm8201_vm13, %v735_v48, %v739_v46  ;;  %7450 = vmatprep.mubr.msk.bf16.mxu1 %vm907_vm15, %v6829_v54  ;;  %v801_v27 = vshll.u32 %v631_v9, 16  ;;  %v812_v45 = vshrl.u32 %v632_v14, 16  ;;  %v815_v17 = vshll.u32 %v632_v14, 16 }
  0xb6   :  { %7425 = vmatmul.mubr.msk.bf16.vlgmr.msra.gmra.mxu0 %vm907_vm15, %v6810_v43  ;;  %v6811_v35 = vcombine.low %v726_v49, %v740_v18  ;;  %v800_v36 = vrot.slane %v798_v50, 4  ;;  %v6830_v21 = vcombine.low %v631_v9, %v632_v14  ;;  %v748_v62 = vor.u32 %v747_v30, %v8356_v40  ;;  %v8406_v40 = vld [vmem:[#allocation2 + $0x5c] sm:$0x1] }
  0xb7   :  { %7459 = vmatpush3.bf16.msra.mxu0 %v8211_v16  ;;  %v803_v56 = vrot.slane %v801_v27, 5  ;;  %v814_v58 = vrot.slane %v812_v45, 4  ;;  %v817_v61 = vrot.slane %v815_v17, 5  ;;  %v751_v60 = vshll.u32 %v8393_v12, 16 }
  0xb8   :  { %7428 = vmatprep.mubr.msk.bf16.mxu0 %vm907_vm15, %v6811_v35  ;;  %7451 = vmatmul.mubr.msk.bf16.gmra.mxu1 %vm907_vm15, %v6830_v21  ;;  %v749_v0 = vrot.slane %v748_v62, 4  ;;  %v762_v24 = vor.u32 %v8372_v28, %v8362_v22  ;;  %v765_v15 = vshll.u32 %v8396_v20, 16  ;;  %v790_v30 = vor.u32 %v789_v55, %v786_v34  ;;  %v7804_v35 = vld [vmem:[#allocation2 + $0x8] ss:$8 sps:$4 sm:$0xff]  }
  0xb9   :  { %v753_v16 = vrot.slane %v751_v60, 5  ;;  %v793_v9 = vshll.u32 %v8406_v40, 16  ;;  %v826_v59 = vshrl.u32 %v633_v44, 16  ;;  %v829_v41 = vshll.u32 %v633_v44, 16  ;;  %7750 = vmatprep.subr.msk.bf16.mxu0 %vm932_vm7, %v8208_v8  ;;  %v8424_v60 = vld [vmem:[#allocation2 + $0x64] sm:$0x1] }
  0xba   :  { %v763_v42 = vrot.slane %v762_v24, 4  ;;  %v767_v23 = vrot.slane %v765_v15, 5  ;;  %v791_v14 = vrot.slane %v790_v30, 4  ;;  %v840_v38 = vshrl.u32 %v634_v63, 16  ;;  %v8430_v15 = vld [vmem:[#allocation2 + $0x74] sm:$0x1] }
  0xbb   :  { %v754_v22 = vsel %vm8201_vm13, %v749_v0, %v753_v16  ;;  %v795_v28 = vrot.slane %v793_v9, 5  ;;  %v828_v48 = vrot.slane %v826_v59, 4  ;;  %v831_v51 = vrot.slane %v829_v41, 5  ;;  %v8434_v9 = vld [vmem:[#allocation2 + $0x7c] sm:$0x1] }
  0xbc   :  { %v768_v46 = vsel %vm8201_vm13, %v763_v42, %v767_v23  ;;  %v842_v34 = vrot.slane %v840_v38, 4  ;;  %v843_v54 = vshll.u32 %v634_v63, 16  ;;  %v6831_v43 = vcombine.low %v633_v44, %v634_v63  ;;  %v8426_v63 = vld [vmem:[#allocation2 + $0x6c] sm:$0x1] }
  0xbd   :  { %v6812_v49 = vcombine.low %v754_v22, %v768_v46  ;;  %v796_v8 = vsel %vm8201_vm13, %v791_v14, %v795_v28  ;;  %v854_v55 = vshrl.u32 %v635_v39, 16  ;;  %v857_v50 = vshll.u32 %v635_v39, 16  ;;  %v8439_v22 = vld [vmem:[#allocation2 + $0x84] sm:$0x1] }
  0xbe   :  { %v6813_v18 = vcombine.low %v782_v25, %v796_v8  ;;  %v845_v27 = vrot.slane %v843_v54, 5  ;;  %7454 = vmatprep.mubr.msk.bf16.mxu1 %vm907_vm15, %v6831_v43  ;;  %v868_v45 = vshrl.u32 %v636_v53, 16  ;;  %v871_v17 = vshll.u32 %v636_v53, 16  ;;  %v1201_v54 = vld [vmem:[#allocation2 + $0x20] sm:$0xe] }
  0xbf   :  { %7429 = vmatmul.mubr.msk.bf16.gmra.mxu0 %vm907_vm15, %v6812_v49  ;;  %v856_v21 = vrot.slane %v854_v55, 4  ;;  %v859_v62 = vrot.slane %v857_v50, 5  ;;  %v6832_v44 = vcombine.low %v635_v39, %v636_v53  ;;  %v804_v0 = vor.u32 %v803_v56, %v800_v36  ;;  %v8448_v49 = vld [vmem:[#allocation2 + $0x8c] sm:$0x1]  ;;  %v1200_v50 = vld [vmem:[#allocation2 + $0x18] sm:$0xe] }
  0xc0   :  { %7432 = vmatprep.mubr.msk.bf16.mxu0 %vm907_vm15, %v6813_v18  ;;  %v870_v1 = vrot.slane %v868_v45, 4  ;;  %v873_v2 = vrot.slane %v871_v17, 5  ;;  %v807_v25 = vshll.u32 %v8424_v60, 16  ;;  %v818_v24 = vor.u32 %v817_v61, %v814_v58  ;;  %v1198_v58 = vld [vmem:[#allocation2 + $0x8] sm:$0xe] }
  0xc1   :  { %7455 = vmatmul.mubr.msk.bf16.gmra.mxu1 %vm907_vm15, %v6832_v44  ;;  %v805_v30 = vrot.slane %v804_v0, 4  ;;  %v821_v16 = vshll.u32 %v8426_v63, 16  ;;  %v832_v59 = vor.u32 %v831_v51, %v828_v48  ;;  %v835_v41 = vshll.u32 %v8430_v15, 16  ;;  %v1199_v61 = vld [vmem:[#allocation2 + $0x10] sm:$0xe] }
  0xc2   :  { %v809_v36 = vrot.slane %v807_v25, 5  ;;  %v819_v56 = vrot.slane %v818_v24, 4  ;;  %7478 = vmatprep.mubr.msk.bf16.mxu1 %vm907_vm15, %v7804_v35  ;;  %v846_v42 = vor.u32 %v845_v27, %v842_v34  ;;  %v849_v23 = vshll.u32 %v8434_v9, 16  ;;  %v7805_v45 = vld [vmem:[#allocation2 + $0x18] ss:$8 sps:$4 sm:$0xff]  }
  0xc3   :  { %v823_v14 = vrot.slane %v821_v16, 5  ;;  %v833_v38 = vrot.slane %v832_v59, 4  ;;  %v837_v39 = vrot.slane %v835_v41, 5  ;;  %v860_v28 = vor.u32 %v859_v62, %v856_v21  ;;  %v1202_v21 = vld [vmem:[#allocation2 + $0x28] sm:$0xe] }
  0xc4   :  { %v810_v48 = vsel %vm8201_vm13, %v805_v30, %v809_v36  ;;  %v847_v51 = vrot.slane %v846_v42, 4  ;;  %v851_v53 = vrot.slane %v849_v23, 5  ;;  %v863_v46 = vshll.u32 %v8439_v22, 16  ;;  %v7806_v0 = vld [vmem:[#allocation2 + $0x28] ss:$8 sps:$4 sm:$0xff]  }
  0xc5   :  { %v824_v34 = vsel %vm8201_vm13, %v819_v56, %v823_v14  ;;  %v838_v43 = vsel %vm8201_vm13, %v833_v38, %v837_v39  ;;  %v861_v8 = vrot.slane %v860_v28, 4  ;;  %v874_v55 = vor.u32 %v873_v2, %v870_v1  ;;  %v1203_v59 = vld [vmem:[#allocation2 + $0x30] sm:$0xe]  ;;  %v1204_v23 = vld [vmem:[#allocation2 + $0x38] sm:$0xe] }
  0xc6   :  { %v6814_v18 = vcombine.low %v810_v48, %v824_v34  ;;  %v852_v27 = vsel %vm8201_vm13, %v847_v51, %v851_v53  ;;  %v865_v17 = vrot.slane %v863_v46, 5  ;;  %v877_v35 = vshll.u32 %v8448_v49, 16  ;;  %v8487_v39 = vld [vmem:[#allocation2 + $0xc] sm:$0x1]  ;;  %v2098_v48 = vld [vmem:[#allocation2 + $0x8] sm:$0xe] }
  0xc7   :  { %v6815_v62 = vcombine.low %v838_v43, %v852_v27  ;;  %v875_v44 = vrot.slane %v874_v55, 4  ;;  %v6842_v25 = vrot.slane %v1198_v58, 9  ;;  %v6843_v24 = vrot.slane %v1199_v61, 9  ;;  %v1207_v61 = vld [vmem:[#allocation2 + $0x60] sm:$0xe] }
  0xc8   :  { %7433 = vmatmul.mubr.msk.bf16.gmra.mxu0 %vm907_vm15, %v6814_v18  ;;  %v866_v1 = vsel %vm8201_vm13, %v861_v8, %v865_v17  ;;  %v879_v2 = vrot.slane %v877_v35, 5  ;;  %v6844_v30 = vrot.slane %v1200_v50, 9  ;;  %v6845_v16 = vrot.slane %v1201_v54, 9  ;;  %v7807_v51 = vld [vmem:[#allocation2 + $0x38] ss:$8 sps:$4 sm:$0xff]  }
  0xc9   :  { %7436 = vmatprep.mubr.msk.bf16.mxu0 %vm907_vm15, %v6815_v62  ;;  %7479 = vmatmul.mubr.msk.bf16.vlgmr.msra.gmra.mxu1 %vm907_vm15, %v7805_v45  ;;  %v1255_v41 = vsel %vm8197_vm12, %v6842_v25, %v1254_v26  ;;  %v8466_v36 = vsel %vm8197_vm12, %v6843_v24, %v1258_v10  ;;  %v1266_v56 = vrot.slane %v8365_v6, 5  ;;  %v6846_v42 = vrot.slane %v1202_v21, 9  ;;  %v1206_v10 = vld [vmem:[#allocation2 + $0x58] sm:$0xe]  ;;  %v2099_v43 = vld [vmem:[#allocation2 + $0x10] sm:$0xe] }
  0xca   :  { %v880_v58 = vsel %vm8201_vm13, %v875_v44, %v879_v2  ;;  %7482 = vmatprep.mubr.msk.bf16.mxu1 %vm907_vm15, %v7806_v0  ;;  %v6858_v31 = vcombine.low %v8215_v19, %v1255_v41  ;;  %v8477_v26 = vsel %vm8197_vm12, %v6844_v30, %v1262_v13  ;;  %v1270_v57 = vrot.slane %v8377_v29, 5  ;;  %7513 = vmatpush3.bf16.msra.mxu1 %v8250_v4  ;;  %v7808_v8 = vld [vmem:[#allocation2 + $0x58] ss:$8 sps:$4 sm:$0xff]   ;;  %v8507_v18 = vld [vmem:[#allocation2 + $0x14] sm:$0x1] }
  0xcb   :  { %v6816_v6 = vcombine.low %v866_v1, %v880_v58  ;;  %v6859_v14 = vcombine.low %v8466_v36, %v8477_v26  ;;  %v8485_v38 = vsel %vm8197_vm12, %v6845_v16, %v1266_v56  ;;  %v6847_v19 = vrot.slane %v1203_v59, 9  ;;  %v1209_v27 = vld [vmem:[#allocation2 + $0x70] sm:$0xe]  ;;  %v1210_v21 = vld [vmem:[#allocation2 + $0x78] sm:$0xe] }
  0xcc   :  { %v8491_v13 = vsel %vm8197_vm12, %v6846_v42, %v1270_v57  ;;  %v1274_v29 = vrot.slane %v8393_v12, 5  ;;  %v6848_v28 = vrot.slane %v1204_v23, 9  ;;  %v1278_v4 = vrot.slane %v8396_v20, 5  ;;  %v8516_v62 = vld [vmem:[#allocation2 + $0x1c] sm:$0x1] }
  0xcd   :  { %v6860_v53 = vcombine.low %v8485_v38, %v8491_v13  ;;  %v6850_v46 = vrot.slane %v1206_v10, 9  ;;  %v1286_v54 = vrot.slane %v8406_v40, 5  ;;  %v6851_v34 = vrot.slane %v1207_v61, 9  ;;  %v8526_v24 = vld [vmem:[#allocation2 + $0x24] sm:$0x1] }
  0xce   :  { %v8500_v55 = vsel %vm8197_vm12, %v6847_v19, %v1274_v29  ;;  %v8504_v12 = vsel %vm8197_vm12, %v6848_v28, %v1278_v4  ;;  %v1290_v20 = vrot.slane %v8424_v60, 5  ;;  %v6852_v50 = vrot.slane %v1208_v32, 9  ;;  %v2100_v1 = vld [vmem:[#allocation2 + $0x18] sm:$0xe]  ;;  %v2101_v59 = vld [vmem:[#allocation2 + $0x20] sm:$0xe] }
  0xcf   :  { %v6861_v40 = vcombine.low %v8500_v55, %v8504_v12  ;;  %v8513_v45 = vsel %vm8197_vm12, %v6850_v46, %v1286_v54  ;;  %v1294_v17 = vrot.slane %v8426_v63, 5  ;;  %v6908_v35 = vrot.slane %v2098_v48, 9  ;;  %v1211_v58 = vld [vmem:[#allocation2 + $0x80] sm:$0xe]  ;;  %v1212_v61 = vld [vmem:[#allocation2 + $0x88] sm:$0xe] }
  0xd0   :  { %7437 = vmatmul.mubr.msk.bf16.gmra.mxu0 %vm907_vm15, %v6816_v6  ;;  %v6862_v60 = vcombine.low %v8246_v7, %v8513_v45  ;;  %v8523_v44 = vsel %vm8197_vm12, %v6851_v34, %v1290_v20  ;;  %v2148_v0 = vrot.slane %v8487_v39, 5  ;;  %v6909_v25 = vrot.slane %v2099_v43, 9  ;;  %v2102_v6 = vld [vmem:[#allocation2 + $0x28] sm:$0xe]  ;;  %v8560_v28 = vld [vmem:[#allocation2 + $0x2c] sm:$0x1] }
  0xd1   :  { %7460 = vmatprep.mubr.msk.bf16.mxu0 %vm907_vm15, %v6858_v31  ;;  %7483 = vmatmul.mubr.msk.bf16.gmra.mxu1 %vm907_vm15, %v7807_v51  ;;  %v8532_v63 = vsel %vm8197_vm12, %v6852_v50, %v1294_v17  ;;  %v2152_v2 = vrot.slane %v8507_v18, 5  ;;  %v6853_v30 = vrot.slane %v1209_v27, 9  ;;  %v1298_v16 = vrot.slane %v8430_v15, 5  ;;  %v2103_v4 = vld [vmem:[#allocation2 + $0x30] sm:$0xe] }
  0xd2   :  { %7486 = vmatprep.mubr.msk.bf16.mxu1 %vm907_vm15, %v7808_v8  ;;  %v6863_v41 = vcombine.low %v8523_v44, %v8532_v63  ;;  %v8541_v56 = vsel %vm8197_vm12, %v6908_v35, %v2148_v0  ;;  %v6854_v42 = vrot.slane %v1210_v21, 9  ;;  %v1302_v23 = vrot.slane %v8434_v9, 5  ;;  %v8569_v34 = vld [vmem:[#allocation2 + $0x34] sm:$0x1]  ;;  %v1676_v43 = vld [vmem:[#allocation2 + $0x8] sm:$0xf] }
  0xd3   :  { %v8546_v31 = vsel %vm8197_vm12, %v6909_v25, %v2152_v2  ;;  %v8550_v15 = vsel %vm8197_vm12, %v6853_v30, %v1298_v16  ;;  %v6910_v57 = vrot.slane %v2100_v1, 9  ;;  %v2156_v10 = vrot.slane %v8516_v62, 5  ;;  %v7809_v8 = vld [vmem:[#allocation2 + $0x68] ss:$8 sps:$4 sm:$0xff]   ;;  %v7810_v21 = vld [vmem:[#allocation2 + $0x78] ss:$8 sps:$4 sm:$0xff]  }
  0xd4   :  { %v6925_v19 = vcombine.low %v8541_v56, %v8546_v31  ;;  %v8557_v9 = vsel %vm8197_vm12, %v6854_v42, %v1302_v23  ;;  %v6911_v32 = vrot.slane %v2101_v59, 9  ;;  %v2160_v29 = vrot.slane %v8526_v24, 5  ;;  %v1678_v35 = vld [vmem:[#allocation2 + $0x10] sm:$0xf]  ;;  %v8583_v2 = vld [vmem:[#allocation2 + $0x3c] sm:$0x1] }
  0xd5   :  { %v6864_v48 = vcombine.low %v8550_v15, %v8557_v9  ;;  %v8566_v51 = vsel %vm8197_vm12, %v6910_v57, %v2156_v10  ;;  %v6855_v46 = vrot.slane %v1211_v58, 9  ;;  %v1306_v54 = vrot.slane %v8439_v22, 5  ;;  %v8588_v30 = vld [vmem:[%s11014_s1 + $0xe] sm:$0x3]  ;;  %v8599_v23 = vld [vmem:[#allocation2 + $0x44] sm:$0x1] }
  0xd6   :  { %v8573_v20 = vsel %vm8197_vm12, %v6911_v32, %v2160_v29  ;;  %v6856_v50 = vrot.slane %v1212_v61, 9  ;;  %v1310_v27 = vrot.slane %v8448_v49, 5  ;;  %v6912_v17 = vrot.slane %v2102_v6, 9  ;;  %7753 = vmatprep.subr.msk.bf16.mxu1 %vm932_vm7, %v8588_v30  ;;  %v2104_v57 = vld [vmem:[#allocation2 + $0x38] sm:$0xe] }
  0xd7   :  { %v6926_v0 = vcombine.low %v8566_v51, %v8573_v20  ;;  %v8580_v22 = vsel %vm8197_vm12, %v6855_v46, %v1306_v54  ;;  %v2164_v25 = vrot.slane %v8560_v28, 5  ;;  %v6913_v1 = vrot.slane %v2103_v4, 9  ;;  %v2105_v10 = vld [vmem:[#allocation2 + $0x40] sm:$0xe]  ;;  %v7848_v61 = vld [vmem:[%s11014_s1 + $0xc] sm:$0x3] }
  0xd8   :  { %7461 = vmatmul.mubr.msk.bf16.vlgmr.msra.gmra.mxu0 %vm907_vm15, %v6859_v14  ;;  %v8596_v49 = vsel %vm8197_vm12, %v6856_v50, %v1310_v27  ;;  %v2168_v16 = vrot.slane %v8569_v34, 5  ;;  %v1709_v59 = vshrl.u32 %v1676_v43, 16  ;;  %v1712_v42 = vshll.u32 %v1676_v43, 16  ;;  %v1680_v6 = vld [vmem:[#allocation2 + $0x18] sm:$0xf] }
  0xd9   :  { %7495 = vmatpush3.bf16.msra.mxu0 %v8237_v33  ;;  %7464 = vmatprep.mubr.msk.bf16.mxu0 %vm907_vm15, %v6860_v53  ;;  %v6865_v36 = vcombine.low %v8580_v22, %v8596_v49  ;;  %v8612_v26 = vsel %vm8197_vm12, %v6912_v17, %v2164_v25  ;;  %v1718_v14 = vshll.u32 %v8487_v39, 16  ;;  %v1723_v58 = vshrl.u32 %v1678_v35, 16  ;;  %v1682_v50 = vld [vmem:[#allocation2 + $0x20] sm:$0xf]  ;;  %v1684_v12 = vld [vmem:[#allocation2 + $0x28] sm:$0xf] }
  0xda   :  { %7487 = vmatmul.mubr.msk.bf16.gmra.mxu1 %vm907_vm15, %v7809_v8  ;;  %v8618_v33 = vsel %vm8197_vm12, %v6913_v1, %v2168_v16  ;;  %v1711_v38 = vrot.slane %v1709_v59, 4  ;;  %v1714_v13 = vrot.slane %v1712_v42, 5  ;;  %v1726_v53 = vshll.u32 %v1678_v35, 16  ;;  %7752 = vmatprep.subr.msk.bf16.mxu0 %vm932_vm7, %v7848_v61  ;;  %v7811_v1 = vld [vmem:[#allocation2 + $0x88] ss:$8 sps:$4 sm:$0xff]  }
  0xdb   :  { %7490 = vmatprep.mubr.msk.bf16.mxu1 %vm907_vm15, %v7810_v21  ;;  %v6927_v39 = vcombine.low %v8612_v26, %v8618_v33  ;;  %v1720_v32 = vrot.slane %v1718_v14, 5  ;;  %v1725_v29 = vrot.slane %v1723_v58, 4  ;;  %v1732_v4 = vshll.u32 %v8507_v18, 16  ;;  %v8634_v18 = vld [vmem:[#allocation2 + $0x5c] sm:$0x1] }
  0xdc   :  { %v1715_v46 = vor.u32 %v1714_v13, %v1711_v38  ;;  %v1728_v54 = vrot.slane %v1726_v53, 5  ;;  %v6914_v43 = vrot.slane %v2104_v57, 9  ;;  %v2172_v8 = vrot.slane %v8583_v2, 5  ;;  %v2106_v14 = vld [vmem:[#allocation2 + $0x58] sm:$0xe] }
  0xdd   :  { %v1734_v27 = vrot.slane %v1732_v4, 5  ;;  %v6915_v17 = vrot.slane %v2105_v10, 9  ;;  %v2176_v35 = vrot.slane %v8599_v23, 5  ;;  %v1737_v25 = vshrl.u32 %v1680_v6, 16  ;;  %v8641_v13 = vld [vmem:[#allocation2 + $0x64] sm:$0x1] }
  0xde   :  { %v1716_v21 = vrot.slane %v1715_v46, 4  ;;  %v1729_v16 = vor.u32 %v1728_v54, %v1725_v29  ;;  %v8632_v59 = vsel %vm8197_vm12, %v6914_v43, %v2172_v8  ;;  %v1740_v42 = vshll.u32 %v1680_v6, 16  ;;  %v2107_v53 = vld [vmem:[#allocation2 + $0x60] sm:$0xe]  ;;  %v8711_v20 = vld [vmem:[#allocation2 + $0x7c] sm:$0x1] }
  0xdf   :  { %v8638_v58 = vsel %vm8197_vm12, %v6915_v17, %v2176_v35  ;;  %v1739_v57 = vrot.slane %v1737_v25, 4  ;;  %v1746_v10 = vshll.u32 %v8516_v62, 16  ;;  %v1751_v38 = vshrl.u32 %v1682_v50, 16  ;;  %v1686_v17 = vld [vmem:[#allocation2 + $0x30] sm:$0xf] }
  0xe0   :  { %7465 = vmatmul.mubr.msk.bf16.gmra.mxu0 %vm907_vm15, %v6861_v40  ;;  %v1721_v61 = vsel %vm8201_vm13, %v1716_v21, %v1720_v32  ;;  %v1730_v6 = vrot.slane %v1729_v16, 4  ;;  %v6928_v29 = vcombine.low %v8632_v59, %v8638_v58  ;;  %v1742_v4 = vrot.slane %v1740_v42, 5  ;;  %v2108_v21 = vld [vmem:[#allocation2 + $0x68] sm:$0xe]  ;;  %v2109_v42 = vld [vmem:[#allocation2 + $0x70] sm:$0xe] }
  0xe1   :  { %7468 = vmatprep.mubr.msk.bf16.mxu0 %vm907_vm15, %v6862_v60  ;;  %v1748_v62 = vrot.slane %v1746_v10, 5  ;;  %v1753_v46 = vrot.slane %v1751_v38, 4  ;;  %v1754_v54 = vshll.u32 %v1682_v50, 16  ;;  %v1760_v55 = vshll.u32 %v8526_v24, 16  ;;  %v1690_v63 = vld [vmem:[#allocation2 + $0x40] sm:$0xf] }
  0xe2   :  { %7491 = vmatmul.mubr.msk.bf16.gmra.mxu1 %vm907_vm15, %v7811_v1  ;;  %v1735_v40 = vsel %vm8201_vm13, %v1730_v6, %v1734_v27  ;;  %v1743_v32 = vor.u32 %v1742_v4, %v1739_v57  ;;  %v6916_v43 = vrot.slane %v2106_v14, 9  ;;  %v2180_v8 = vrot.slane %v8634_v18, 5  ;;  %v8671_v1 = vld [vmem:[#allocation2 + $0x6c] sm:$0x1]  ;;  %v2110_v26 = vld [vmem:[#allocation2 + $0x78] sm:$0xe] }
  0xe3   :  { %7514 = vmatprep.mubr.msk.bf16.mxu1 %vm907_vm15, %v6925_v19  ;;  %v8664_v7 = vcombine.low %v1721_v61, %v1735_v40  ;;  %v1756_v45 = vrot.slane %v1754_v54, 5  ;;  %v1762_v60 = vrot.slane %v1760_v55, 5  ;;  %v6917_v24 = vrot.slane %v2107_v53, 9 }
  0xe4   :  { %v1744_v50 = vrot.slane %v1743_v32, 4  ;;  %v8668_v35 = vsel %vm8197_vm12, %v6916_v43, %v2180_v8  ;;  %v2184_v27 = vrot.slane %v8641_v13, 5  ;;  %v1765_v25 = vshrl.u32 %v1684_v12, 16 }
  0xe5   :  { %v1757_v16 = vor.u32 %v1756_v45, %v1753_v46  ;;  %v1768_v56 = vshll.u32 %v1684_v12, 16  ;;  %v1774_v31 = vshll.u32 %v8560_v28, 16  ;;  %v1779_v19 = vshrl.u32 %v1686_v17, 16  ;;  %v8682_v46 = vld [vmem:[#allocation2 + $0x74] sm:$0x1] }
  0xe6   :  { %v1749_v14 = vsel %vm8201_vm13, %v1744_v50, %v1748_v62  ;;  %v8678_v57 = vsel %vm8197_vm12, %v6917_v24, %v2184_v27  ;;  %v1767_v10 = vrot.slane %v1765_v25, 4  ;;  %v1782_v38 = vshll.u32 %v1686_v17, 16  ;;  %v1688_v12 = vld [vmem:[#allocation2 + $0x38] sm:$0xf]  ;;  %v8722_v25 = vld [vmem:[#allocation2 + $0x84] sm:$0x1] }
  0xe7   :  { %v1758_v53 = vrot.slane %v1757_v16, 4  ;;  %v6929_v61 = vcombine.low %v8668_v35, %v8678_v57  ;;  %v1770_v6 = vrot.slane %v1768_v56, 5  ;;  %v1776_v4 = vrot.slane %v1774_v31, 5  ;;  %v1696_v57 = vld [vmem:[#allocation2 + $0x68] sm:$0xf] }
  0xe8   :  { %7469 = vmatmul.mubr.msk.bf16.gmra.mxu0 %vm907_vm15, %v6863_v41  ;;  %v1781_v28 = vrot.slane %v1779_v19, 4  ;;  %v1784_v62 = vrot.slane %v1782_v38, 5  ;;  %v1788_v54 = vshll.u32 %v8569_v34, 16  ;;  %v6918_v55 = vrot.slane %v2108_v21, 9  ;;  %v2111_v21 = vld [vmem:[#allocation2 + $0x80] sm:$0xe] }
  0xe9   :  { %7472 = vmatprep.mubr.msk.bf16.mxu0 %vm907_vm15, %v6864_v48  ;;  %v1763_v40 = vsel %vm8201_vm13, %v1758_v53, %v1762_v60  ;;  %v1771_v32 = vor.u32 %v1770_v6, %v1767_v10  ;;  %v2188_v43 = vrot.slane %v8671_v1, 5  ;;  %v6919_v44 = vrot.slane %v2109_v42, 9 }
  0xea   :  { %7515 = vmatmul.mubr.msk.bf16.vlgmr.msra.gmra.mxu1 %vm907_vm15, %v6926_v0  ;;  %v8700_v41 = vcombine.low %v1749_v14, %v1763_v40  ;;  %v1785_v34 = vor.u32 %v1784_v62, %v1781_v28  ;;  %v1790_v8 = vrot.slane %v1788_v54, 5  ;;  %v2192_v15 = vrot.slane %v8682_v46, 5  ;;  %v1694_v62 = vld [vmem:[#allocation2 + $0x60] sm:$0xf]  ;;  %v8735_v40 = vld [vmem:[#allocation2 + $0x8c] sm:$0x1] }
  0xeb   :  { %7518 = vmatprep.mubr.msk.bf16.mxu1 %vm907_vm15, %v6927_v39  ;;  %v1772_v9 = vrot.slane %v1771_v32, 4  ;;  %v8709_v48 = vsel %vm8197_vm12, %v6918_v55, %v2188_v43  ;;  %v1793_v17 = vshrl.u32 %v1688_v12, 16  ;;  %v1796_v51 = vshll.u32 %v1688_v12, 16  ;;  %v2112_v32 = vld [vmem:[#allocation2 + $0x88] sm:$0xe] }
  0xec   :  { %v1786_v0 = vrot.slane %v1785_v34, 4  ;;  %v8715_v45 = vsel %vm8197_vm12, %v6919_v44, %v2192_v15  ;;  %v1802_v60 = vshll.u32 %v8583_v2, 16  ;;  %v1807_v24 = vshrl.u32 %v1690_v63, 16  ;;  %v1692_v2 = vld [vmem:[#allocation2 + $0x58] sm:$0xf] }
  0xed   :  { %v1777_v33 = vsel %vm8201_vm13, %v1772_v9, %v1776_v4  ;;  %v6930_v39 = vcombine.low %v8709_v48, %v8715_v45  ;;  %v1795_v50 = vrot.slane %v1793_v17, 4  ;;  %v1798_v27 = vrot.slane %v1796_v51, 5  ;;  %v2113_v43 = vld [vmem:[#allocation2 + $0x90] sm:$0xe]  ;;  %v8752_v9 = vld [vmem:[#allocation2 + $0x94] sm:$0x1] }
  0xee   :  { %v1791_v16 = vsel %vm8201_vm13, %v1786_v0, %v1790_v8  ;;  %v1804_v56 = vrot.slane %v1802_v60, 5  ;;  %v1809_v31 = vrot.slane %v1807_v24, 4  ;;  %v1810_v19 = vshll.u32 %v1690_v63, 16 }
  0xef   :  { %v6894_v42 = vcombine.low %v1777_v33, %v1791_v16  ;;  %v1799_v14 = vor.u32 %v1798_v27, %v1795_v50  ;;  %v1816_v10 = vshll.u32 %v8599_v23, 16  ;;  %v6920_v38 = vrot.slane %v2110_v26, 9  ;;  %v1698_v26 = vld [vmem:[#allocation2 + $0x70] sm:$0xf] }
  0xf0   :  { %7473 = vmatmul.mubr.msk.bf16.gmra.mxu0 %vm907_vm15, %v6865_v36  ;;  %v1812_v53 = vrot.slane %v1810_v19, 5  ;;  %v2196_v6 = vrot.slane %v8711_v20, 5  ;;  %v6921_v4 = vrot.slane %v2111_v21, 9  ;;  %v2200_v28 = vrot.slane %v8722_v25, 5  ;;  %v2575_v16 = vld [vmem:[#allocation2 + $0x10] sm:$0xf] }
  0xf1   :  { %7496 = vmatprep.mubr.msk.bf16.mxu0 %vm907_vm15, %v8664_v7  ;;  %v1800_v54 = vrot.slane %v1799_v14, 4  ;;  %v1818_v55 = vrot.slane %v1816_v10, 5  ;;  %v1821_v12 = vshrl.u32 %v1692_v2, 16  ;;  %v1824_v23 = vshll.u32 %v1692_v2, 16  ;;  %v8768_v14 = vld [vmem:[#allocation2 + $0x14] sm:$0x1] }
  0xf2   :  { %7519 = vmatmul.mubr.msk.bf16.gmra.mxu1 %vm907_vm15, %v6928_v29  ;;  %v1813_v22 = vor.u32 %v1812_v53, %v1809_v31  ;;  %v2197_v49 = vsel %vm8197_vm12, %v6920_v38, %v2196_v6  ;;  %v2201_v36 = vsel %vm8197_vm12, %v6921_v4, %v2200_v28  ;;  %v1830_v7 = vshll.u32 %v8634_v18, 16 }
  0xf3   :  { %7522 = vmatprep.mubr.msk.bf16.mxu1 %vm907_vm15, %v6929_v61  ;;  %v1805_v59 = vsel %vm8201_vm13, %v1800_v54, %v1804_v56  ;;  %v6931_v58 = vcombine.low %v2197_v49, %v2201_v36  ;;  %v1823_v29 = vrot.slane %v1821_v12, 4  ;;  %v1826_v44 = vrot.slane %v1824_v23, 5  ;;  %v8787_v12 = vld [vmem:[#allocation2 + $0x1c] sm:$0x1] }
  0xf4   :  { %v1814_v63 = vrot.slane %v1813_v22, 4  ;;  %v1832_v34 = vrot.slane %v1830_v7, 5  ;;  %v1835_v8 = vshrl.u32 %v1694_v62, 16  ;;  %v1838_v15 = vshll.u32 %v1694_v62, 16  ;;  %v2577_v62 = vld [vmem:[#allocation2 + $0x18] sm:$0xf] }
  0xf5   :  { %v1827_v18 = vor.u32 %v1826_v44, %v1823_v29  ;;  %v1844_v17 = vshll.u32 %v8641_v13, 16  ;;  %v6922_v51 = vrot.slane %v2112_v32, 9  ;;  %v2204_v35 = vrot.slane %v8735_v40, 5  ;;  %v8763_v13 = vld [vmem:[%s11014_s1 + $0x10] sm:$0x3] }
  0xf6   :  { %v1819_v61 = vsel %vm8201_vm13, %v1814_v63, %v1818_v55  ;;  %v1837_v0 = vrot.slane %v1835_v8, 4  ;;  %v1840_v60 = vrot.slane %v1838_v15, 5  ;;  %v6923_v24 = vrot.slane %v2113_v43, 9  ;;  %v1700_v32 = vld [vmem:[#allocation2 + $0x78] sm:$0xf] }
  0xf7   :  { %v6895_v33 = vcombine.low %v1805_v59, %v1819_v61  ;;  %v1828_v50 = vrot.slane %v1827_v18, 4  ;;  %v1846_v27 = vrot.slane %v1844_v17, 5  ;;  %v2205_v21 = vsel %vm8197_vm12, %v6922_v51, %v2204_v35  ;;  %v1702_v17 = vld [vmem:[#allocation2 + $0x80] sm:$0xf] }
  0xf8   :  { %7497 = vmatmul.mubr.msk.bf16.vlgmr.msra.gmra.mxu0 %vm907_vm15, %v8700_v41  ;;  %v1841_v56 = vor.u32 %v1840_v60, %v1837_v0  ;;  %v2208_v31 = vrot.slane %v8752_v9, 5  ;;  %v1849_v19 = vshrl.u32 %v1696_v57, 16  ;;  %v1852_v2 = vshll.u32 %v1696_v57, 16 }
  0xf9   :  { %7531 = vmatpush3.bf16.msra.mxu0 %v8254_v11  ;;  %7500 = vmatprep.mubr.msk.bf16.mxu0 %vm907_vm15, %v6894_v42  ;;  %v1833_v10 = vsel %vm8201_vm13, %v1828_v50, %v1832_v34  ;;  %v1858_v38 = vshll.u32 %v8671_v1, 16  ;;  %v1863_v53 = vshrl.u32 %v1698_v26, 16  ;;  %v1866_v6 = vshll.u32 %v1698_v26, 16 }
  0xfa   :  { %7523 = vmatmul.mubr.msk.bf16.gmra.mxu1 %vm907_vm15, %v6930_v39  ;;  %v1842_v41 = vrot.slane %v1841_v56, 4  ;;  %v2209_v4 = vsel %vm8197_vm12, %v6923_v24, %v2208_v31  ;;  %v1851_v28 = vrot.slane %v1849_v19, 4  ;;  %v1854_v11 = vrot.slane %v1852_v2, 5  ;;  %7754 = vmatprep.subr.msk.bf16.mxu0 %vm932_vm7, %v8763_v13  ;;  %v2579_v56 = vld [vmem:[#allocation2 + $0x20] sm:$0xf] }
  0xfb   :  { %7526 = vmatprep.mubr.msk.bf16.mxu1 %vm907_vm15, %v6931_v58  ;;  %v6932_v1 = vcombine.low %v2205_v21, %v2209_v4  ;;  %v1860_v42 = vrot.slane %v1858_v38, 5  ;;  %v1865_v54 = vrot.slane %v1863_v53, 4  ;;  %v1868_v55 = vrot.slane %v1866_v6, 5  ;;  %v2581_v38 = vld [vmem:[#allocation2 + $0x28] sm:$0xf] }
  0xfc   :  { %v1847_v48 = vsel %vm8201_vm13, %v1842_v41, %v1846_v27  ;;  %v1855_v45 = vor.u32 %v1854_v11, %v1851_v28  ;;  %v1872_v39 = vshll.u32 %v8682_v46, 16  ;;  %v2608_v23 = vshrl.u32 %v2575_v16, 16  ;;  %v8804_v11 = vld [vmem:[#allocation2 + $0x24] sm:$0x1] }
  0xfd   :  { %v6896_v22 = vcombine.low %v1833_v10, %v1847_v48  ;;  %v1869_v49 = vor.u32 %v1868_v55, %v1865_v54  ;;  %v2611_v36 = vshll.u32 %v2575_v16, 16  ;;  %v2617_v7 = vshll.u32 %v8768_v14, 16  ;;  %v1704_v55 = vld [vmem:[#allocation2 + $0x88] sm:$0xf] }
  0xfe   :  { %v1856_v43 = vrot.slane %v1855_v45, 4  ;;  %v1874_v59 = vrot.slane %v1872_v39, 5  ;;  %v2610_v58 = vrot.slane %v2608_v23, 4  ;;  %v2622_v29 = vshrl.u32 %v2577_v62, 16 }
  0xff   :  { %v1870_v44 = vrot.slane %v1869_v49, 4  ;;  %v2613_v63 = vrot.slane %v2611_v36, 5  ;;  %v2619_v34 = vrot.slane %v2617_v7, 5  ;;  %v2625_v8 = vshll.u32 %v2577_v62, 16  ;;  %v8812_v36 = vld [vmem:[#allocation2 + $0x2c] sm:$0x1] }
 0x100   :  { %7501 = vmatmul.mubr.msk.bf16.gmra.mxu0 %vm907_vm15, %v6895_v33  ;;  %v1861_v46 = vsel %vm8201_vm13, %v1856_v43, %v1860_v42  ;;  %v2624_v15 = vrot.slane %v2622_v29, 4  ;;  %v2631_v18 = vshll.u32 %v8787_v12, 16  ;;  %v1877_v51 = vshrl.u32 %v1700_v32, 16 }
 0x101   :  { %7504 = vmatprep.mubr.msk.bf16.mxu0 %vm907_vm15, %v6896_v22  ;;  %v1875_v35 = vsel %vm8201_vm13, %v1870_v44, %v1874_v59  ;;  %v2614_v57 = vor.u32 %v2613_v63, %v2610_v58  ;;  %v2627_v61 = vrot.slane %v2625_v8, 5  ;;  %v1880_v0 = vshll.u32 %v1700_v32, 16  ;;  %v1706_v22 = vld [vmem:[#allocation2 + $0x90] sm:$0xf] }
 0x102   :  { %7527 = vmatmul.mubr.msk.bf16.gmra.mxu1 %vm907_vm15, %v6932_v1  ;;  %v6897_v60 = vcombine.low %v1861_v46, %v1875_v35  ;;  %v2633_v24 = vrot.slane %v2631_v18, 5  ;;  %v1879_v26 = vrot.slane %v1877_v51, 4  ;;  %v1886_v33 = vshll.u32 %v8711_v20, 16  ;;  %v2583_v35 = vld [vmem:[#allocation2 + $0x30] sm:$0xf] }
 0x103   :  { %v2615_v50 = vrot.slane %v2614_v57, 4  ;;  %v2628_v27 = vor.u32 %v2627_v61, %v2624_v15  ;;  %v1882_v21 = vrot.slane %v1880_v0, 5  ;;  %v1891_v16 = vshrl.u32 %v1702_v17, 16 }
 0x104   :  { %v1888_v31 = vrot.slane %v1886_v33, 5  ;;  %v1894_v19 = vshll.u32 %v1702_v17, 16  ;;  %v1900_v2 = vshll.u32 %v8722_v25, 16  ;;  %v2882_v10 = vsel %vm932_vm7, %v8588_v30, 0 }
 0x105   :  { %v2620_v53 = vsel %vm8201_vm13, %v2615_v50, %v2619_v34  ;;  %v2629_v6 = vrot.slane %v2628_v27, 4  ;;  %v1883_v41 = vor.u32 %v1882_v21, %v1879_v26  ;;  %v1893_v4 = vrot.slane %v1891_v16, 4  ;;  %7549 = vmatpush3.bf16.msra.mxu1 %v2882_v10  ;;  %v8822_v27 = vld [vmem:[#allocation2 + $0x34] sm:$0x1] }
 0x106   :  { %v1896_v20 = vrot.slane %v1894_v19, 5  ;;  %v1902_v28 = vrot.slane %v1900_v2, 5  ;;  %v2636_v62 = vshrl.u32 %v2579_v56, 16  ;;  %v2639_v1 = vshll.u32 %v2579_v56, 16  ;;  %v203_v19 = vld [vmem:[#allocation2 + $0x48] sm:$0x1] }
 0x107   :  { %v2634_v25 = vsel %vm8201_vm13, %v2629_v6, %v2633_v24  ;;  %v1884_v42 = vrot.slane %v1883_v41, 4  ;;  %v2645_v30 = vshll.u32 %v8804_v11, 16  ;;  %v2650_v54 = vshrl.u32 %v2581_v38, 16  ;;  %v2585_v24 = vld [vmem:[#allocation2 + $0x38] sm:$0xf] }
 0x108   :  { %7505 = vmatmul.mubr.msk.bf16.gmra.mxu0 %vm907_vm15, %v6897_v60  ;;  %v6959_v48 = vcombine.low %v2620_v53, %v2634_v25  ;;  %v1897_v45 = vor.u32 %v1896_v20, %v1893_v4  ;;  %v2638_v39 = vrot.slane %v2636_v62, 4  ;;  %v2641_v23 = vrot.slane %v2639_v1, 5  ;;  %v265_v6 = vld [vmem:[#allocation2 + $0x4c] sm:$0x1]  ;;  %v8828_v25 = vld [vmem:[#allocation2 + $0x3c] sm:$0x1] }
 0x109   :  { %v1889_v49 = vsel %vm8201_vm13, %v1884_v42, %v1888_v31  ;;  %v2647_v7 = vrot.slane %v2645_v30, 5  ;;  %v2652_v32 = vrot.slane %v2650_v54, 4  ;;  %v2653_v43 = vshll.u32 %v2581_v38, 16 }
 0x10a   :  { %7550 = vmatprep.mubr.msk.bf16.mxu1 %vm907_vm15, %v6959_v48  ;;  %v1898_v59 = vrot.slane %v1897_v45, 4  ;;  %v2642_v58 = vor.u32 %v2641_v23, %v2638_v39  ;;  %v2659_v29 = vshll.u32 %v8812_v36, 16  ;;  %v1905_v44 = vshrl.u32 %v1704_v55, 16  ;;  %v2591_v39 = vld [vmem:[#allocation2 + $0x60] sm:$0xf] }
 0x10b   :  { %v2655_v63 = vrot.slane %v2653_v43, 5  ;;  %v1908_v34 = vshll.u32 %v1704_v55, 16  ;;  %v1914_v8 = vshll.u32 %v8735_v40, 16  ;;  %v1919_v46 = vshrl.u32 %v1706_v22, 16 }
 0x10c   :  { %v1903_v15 = vsel %vm8201_vm13, %v1898_v59, %v1902_v28  ;;  %v2643_v18 = vrot.slane %v2642_v58, 4  ;;  %v2661_v17 = vrot.slane %v2659_v29, 5  ;;  %v1907_v51 = vrot.slane %v1905_v44, 4  ;;  %v2587_v28 = vld [vmem:[#allocation2 + $0x40] sm:$0xf] }
 0x10d   :  { %v6898_v57 = vcombine.low %v1889_v49, %v1903_v15  ;;  %v2656_v61 = vor.u32 %v2655_v63, %v2652_v32  ;;  %v1910_v0 = vrot.slane %v1908_v34, 5  ;;  %v1916_v60 = vrot.slane %v1914_v8, 5  ;;  %v8838_v59 = vld [vmem:[#allocation2 + $0x44] sm:$0x1]  ;;  %v2593_v34 = vld [vmem:[#allocation2 + $0x68] sm:$0xf] }
 0x10e   :  { %v2648_v26 = vsel %vm8201_vm13, %v2643_v18, %v2647_v7  ;;  %v1921_v33 = vrot.slane %v1919_v46, 4  ;;  %v1922_v50 = vshll.u32 %v1706_v22, 16  ;;  %v1928_v40 = vshll.u32 %v8752_v9, 16 }
 0x10f   :  { %7508 = vmatprep.mubr.msk.bf16.mxu0 %vm907_vm15, %v6898_v57  ;;  %v2657_v21 = vrot.slane %v2656_v61, 4  ;;  %v1911_v16 = vor.u32 %v1910_v0, %v1907_v51  ;;  %v2664_v56 = vshrl.u32 %v2583_v35, 16  ;;  %v2667_v31 = vshll.u32 %v2583_v35, 16  ;;  %v8843_v35 = vld [vmem:[#allocation2 + $0x64] sm:$0x1] }
 0x110   :  { %v1924_v2 = vrot.slane %v1922_v50, 5  ;;  %v1930_v10 = vrot.slane %v1928_v40, 5  ;;  %v2673_v38 = vshll.u32 %v8822_v27, 16  ;;  %v2678_v53 = vshrl.u32 %v2585_v24, 16  ;;  %v8847_v61 = vld [vmem:[#allocation2 + $0x6c] sm:$0x1] }
 0x111   :  { %v2662_v41 = vsel %vm8201_vm13, %v2657_v21, %v2661_v17  ;;  %v1912_v4 = vrot.slane %v1911_v16, 4  ;;  %v2666_v9 = vrot.slane %v2664_v56, 4  ;;  %v2669_v20 = vrot.slane %v2667_v31, 5  ;;  %v7812_v17 = vld [vmem:[#allocation2 + $0x10] ss:$8 sps:$4 sm:$0xff]  }
 0x112   :  { %v6960_v62 = vcombine.low %v2648_v26, %v2662_v41  ;;  %v1925_v1 = vor.u32 %v1924_v2, %v1921_v33  ;;  %v2675_v42 = vrot.slane %v2673_v38, 5  ;;  %v2680_v30 = vrot.slane %v2678_v53, 4  ;;  %v2595_v21 = vld [vmem:[#allocation2 + $0x70] sm:$0xf] }
 0x113   :  { %v1917_v54 = vsel %vm8201_vm13, %v1912_v4, %v1916_v60  ;;  %v2670_v55 = vor.u32 %v2669_v20, %v2666_v9  ;;  %v2681_v48 = vshll.u32 %v2585_v24, 16  ;;  %v2687_v45 = vshll.u32 %v8828_v25, 16 }
 0x114   :  { %7551 = vmatmul.mubr.msk.bf16.vlgmr.msra.gmra.mxu1 %vm907_vm15, %v6960_v62  ;;  %v1926_v23 = vrot.slane %v1925_v1, 4  ;;  %v204_v22 = vsel %vm8052_vm5, 0, %v203_v19  ;;  %v266_v49 = vsel %vm8062_vm6, 0, %v265_v6  ;;  %v2692_v7 = vshrl.u32 %v2587_v28, 16  ;;  %v2597_v6 = vld [vmem:[#allocation2 + $0x78] sm:$0xf] }
 0x115   :  { %v2671_v32 = vrot.slane %v2670_v55, 4  ;;  %v2683_v43 = vrot.slane %v2681_v48, 5  ;;  %205 = vst [vmem:[#allocation2 + $0x48] sm:$0x1] %v204_v22  ;;  %267 = vst [vmem:[#allocation2 + $0x4c] sm:$0x1] %v266_v49 }
 0x116   :  { %v2695_v58 = vshll.u32 %v2587_v28, 16  ;;  %v1931_v29 = vsel %vm8201_vm13, %v1926_v23, %v1930_v10  ;;  %v2694_v44 = vrot.slane %v2692_v7, 4  ;;  %v2701_v63 = vshll.u32 %v8838_v59, 16  ;;  %v8863_v23 = vld [vmem:[#allocation2 + $0x74] sm:$0x1] }
 0x117   :  { %v2720_v8 = vshrl.u32 %v2591_v39, 16  ;;  %v6899_v46 = vcombine.low %v1917_v54, %v1931_v29  ;;  %v2684_v15 = vor.u32 %v2683_v43, %v2680_v30  ;;  %v2689_v18 = vrot.slane %v2687_v45, 5  ;;  %v7813_v54 = vld [vmem:[#allocation2 + $0x20] ss:$8 sps:$4 sm:$0xff]  }
 0x118   :  { %v2697_v51 = vrot.slane %v2695_v58, 5  ;;  %v2676_v57 = vsel %vm8201_vm13, %v2671_v32, %v2675_v42  ;;  %v2723_v60 = vshll.u32 %v2591_v39, 16  ;;  %v2729_v24 = vshll.u32 %v8843_v35, 16  ;;  %v7814_v39 = vld [vmem:[#allocation2 + $0x30] ss:$8 sps:$4 sm:$0xff]  }
 0x119   :  { %v2722_v0 = vrot.slane %v2720_v8, 4  ;;  %7509 = vmatmul.mubr.msk.bf16.gmra.mxu0 %vm907_vm15, %v6899_v46  ;;  %v2685_v26 = vrot.slane %v2684_v15, 4  ;;  %v2734_v50 = vshrl.u32 %v2593_v34, 16  ;;  %v2737_v40 = vshll.u32 %v2593_v34, 16  ;;  %v2599_v58 = vld [vmem:[#allocation2 + $0x80] sm:$0xf] }
 0x11a   :  { %v2698_v33 = vor.u32 %v2697_v51, %v2694_v44  ;;  %7532 = vmatprep.mubr.msk.bf16.mxu0 %vm907_vm15, %v7812_v17  ;;  %v8852_v16 = vrot.slane %v2701_v63, 5  ;;  %v2725_v56 = vrot.slane %v2723_v60, 5  ;;  %v2731_v31 = vrot.slane %v2729_v24, 5  ;;  %v8871_v63 = vld [vmem:[#allocation2 + $0x7c] sm:$0x1] }
 0x11b   :  { %v2743_v19 = vshll.u32 %v8847_v61, 16  ;;  %v2690_v2 = vsel %vm8201_vm13, %v2685_v26, %v2689_v18  ;;  %v2736_v38 = vrot.slane %v2734_v50, 4  ;;  %v2739_v53 = vrot.slane %v2737_v40, 5  ;;  %v2601_v60 = vld [vmem:[#allocation2 + $0x88] sm:$0xf] }
 0x11c   :  { %v2699_v10 = vrot.slane %v2698_v33, 4  ;;  %v6961_v41 = vcombine.low %v2676_v57, %v2690_v2  ;;  %v2589_v4 = vld [vmem:[#allocation2 + $0x48] sm:$0xf]  ;;  %v8857_v9 = vld [vmem:[#allocation2 + $0x4c] sm:$0x1]  ;;  %v2726_v20 = vor.u32 %v2725_v56, %v2722_v0  ;;  %v3160_v28 = vsel %vm932_vm7, %v8763_v13, 0 }
 0x11d   :  { %v2748_v62 = vshrl.u32 %v2595_v21, 16  ;;  %v2706_v1 = vshrl.u32 %v2589_v4, 16  ;;  %v2709_v42 = vshll.u32 %v2589_v4, 16  ;;  %v2715_v30 = vshll.u32 %v8857_v9, 16  ;;  %v233_v2 = vld [vmem:[#allocation2 + $0x98] sm:$0x1] }
 0x11e   :  { %v2745_v55 = vrot.slane %v2743_v19, 5  ;;  %7554 = vmatprep.mubr.msk.bf16.mxu1 %vm907_vm15, %v6961_v41  ;;  %v2727_v48 = vrot.slane %v2726_v20, 4  ;;  %v2740_v45 = vor.u32 %v2739_v53, %v2736_v38  ;;  %v2751_v49 = vshll.u32 %v2595_v21, 16  ;;  %v8878_v21 = vld [vmem:[#allocation2 + $0x84] sm:$0x1] }
 0x11f   :  { %v2750_v22 = vrot.slane %v2748_v62, 4  ;;  %v2704_v13 = vsel %vm8201_vm13, %v2699_v10, %v8852_v16  ;;  %v2708_v7 = vrot.slane %v2706_v1, 4  ;;  %v2711_v32 = vrot.slane %v2709_v42, 5  ;;  %v295_v41 = vld [vmem:[#allocation2 + $0x9c] sm:$0x1] }
 0x120   :  { %v2757_v43 = vshll.u32 %v8863_v23, 16  ;;  %v2732_v29 = vsel %vm8201_vm13, %v2727_v48, %v2731_v31  ;;  %v2741_v44 = vrot.slane %v2740_v45, 4  ;;  %v2753_v34 = vrot.slane %v2751_v49, 5  ;;  %v2603_v4 = vld [vmem:[#allocation2 + $0x90] sm:$0xf] }
 0x121   :  { %v2762_v8 = vshrl.u32 %v2597_v6, 16  ;;  %v2712_v46 = vor.u32 %v2711_v32, %v2708_v7  ;;  %v2717_v15 = vrot.slane %v2715_v30, 5  ;;  %7533 = vmatmul.mubr.msk.bf16.vlgmr.msra.gmra.mxu0 %vm907_vm15, %v7813_v54  ;;  %v2765_v18 = vshll.u32 %v2597_v6, 16  ;;  %v8883_v62 = vld [vmem:[#allocation2 + $0x8c] sm:$0x1] }
 0x122   :  { %v2771_v17 = vshll.u32 %v8871_v63, 16  ;;  %v2746_v51 = vsel %vm8201_vm13, %v2741_v44, %v2745_v55  ;;  %7567 = vmatpush3.bf16.msra.mxu0 %v3160_v28  ;;  %7536 = vmatprep.mubr.msk.bf16.mxu0 %vm907_vm15, %v7814_v39  ;;  %v2754_v57 = vor.u32 %v2753_v34, %v2750_v22  ;;  %v2776_v24 = vshrl.u32 %v2599_v58, 16  ;;  %v7815_v54 = vld [vmem:[#allocation2 + $0x40] ss:$8 sps:$4 sm:$0xff]  }
 0x123   :  { %v2764_v0 = vrot.slane %v2762_v8, 4  ;;  %v2713_v26 = vrot.slane %v2712_v46, 4  ;;  %v6963_v33 = vcombine.low %v2732_v29, %v2746_v51  ;;  %v2759_v50 = vrot.slane %v2757_v43, 5  ;;  %v7816_v22 = vld [vmem:[#allocation2 + $0x60] ss:$8 sps:$4 sm:$0xff]  }
 0x124   :  { %v2767_v40 = vrot.slane %v2765_v18, 5  ;;  %v2773_v16 = vrot.slane %v2771_v17, 5  ;;  %v2778_v56 = vrot.slane %v2776_v24, 4  ;;  %v2779_v31 = vshll.u32 %v2599_v58, 16  ;;  %v8902_v51 = vld [vmem:[#allocation2 + $0x94] sm:$0x1] }
 0x125   :  { %v2785_v19 = vshll.u32 %v8878_v21, 16  ;;  %v2718_v10 = vsel %vm8201_vm13, %v2713_v26, %v2717_v15  ;;  %v2790_v53 = vshrl.u32 %v2601_v60, 16  ;;  %v2793_v6 = vshll.u32 %v2601_v60, 16  ;;  %v2998_v15 = vld [vmem:[#allocation2 + $0x18] sm:$0xe] }
 0x126   :  { %v2768_v38 = vor.u32 %v2767_v40, %v2764_v0  ;;  %v6962_v20 = vcombine.low %v2704_v13, %v2718_v10  ;;  %v2755_v28 = vrot.slane %v2754_v57, 4  ;;  %v2781_v1 = vrot.slane %v2779_v31, 5  ;;  %v7817_v57 = vld [vmem:[#allocation2 + $0x70] ss:$8 sps:$4 sm:$0xff]   ;;  %v7818_v26 = vld [vmem:[#allocation2 + $0x80] ss:$8 sps:$4 sm:$0xff]  }
 0x127   :  { %v2787_v42 = vrot.slane %v2785_v19, 5  ;;  %v2792_v55 = vrot.slane %v2790_v53, 4  ;;  %v2795_v48 = vrot.slane %v2793_v6, 5  ;;  %v2799_v45 = vshll.u32 %v8883_v62, 16 }
 0x128   :  { %v2769_v30 = vrot.slane %v2768_v38, 4  ;;  %7555 = vmatmul.mubr.msk.bf16.gmra.mxu1 %vm907_vm15, %v6962_v20  ;;  %v2782_v39 = vor.u32 %v2781_v1, %v2778_v56  ;;  %v234_v49 = vsel %vm8052_vm5, 0, %v233_v2  ;;  %v296_v13 = vsel %vm8062_vm6, 0, %v295_v41  ;;  %v2999_v20 = vld [vmem:[#allocation2 + $0x20] sm:$0xe]  ;;  %vm9240_vm5 = vmand %vm3474_vm2, %vm174_vm3 }
 0x129   :  { %v2804_v7 = vshrl.u32 %v2603_v4, 16  ;;  %7558 = vmatprep.mubr.msk.bf16.mxu1 %vm907_vm15, %v6963_v33  ;;  %7537 = vmatmul.mubr.msk.bf16.gmra.mxu0 %vm907_vm15, %v7815_v54  ;;  %v2796_v32 = vor.u32 %v2795_v48, %v2792_v55  ;;  %v2801_v43 = vrot.slane %v2799_v45, 5  ;;  %235 = vst [vmem:[#allocation2 + $0x98] sm:$0x1] %v234_v49  ;;  %297 = vst [vmem:[#allocation2 + $0x9c] sm:$0x1] %v296_v13 }
 0x12a   :  { %v2807_v58 = vshll.u32 %v2603_v4, 16  ;;  %v2760_v29 = vsel %vm8201_vm13, %v2755_v28, %v2759_v50  ;;  %v2783_v44 = vrot.slane %v2782_v39, 4  ;;  %7540 = vmatprep.mubr.msk.bf16.mxu0 %vm907_vm15, %v7816_v22  ;;  %v2774_v47 = vsel %vm8201_vm13, %v2769_v30, %v2773_v16  ;;  %v2997_v33 = vld [vmem:[#allocation2 + $0x10] sm:$0xe]  ;;  %v3000_v30 = vld [vmem:[#allocation2 + $0x28] sm:$0xe]  ;;  %vm9278_vm3 = vmand %vm3474_vm2, %vm236_vm4 }
 0x12b   :  { %v2797_v52 = vrot.slane %v2796_v32, 4  ;;  %v2806_v34 = vrot.slane %v2804_v7, 4  ;;  %v6964_v17 = vcombine.low %v2760_v29, %v2774_v47  ;;  %v2813_v24 = vshll.u32 %v8902_v51, 16  ;;  %v3001_v54 = vld [vmem:[#allocation2 + $0x30] sm:$0xe]  ;;  %vm9707_vm6 = vmand %vm3472_vm1, %vm236_vm4 }
 0x12c   :  { %v2809_v8 = vrot.slane %v2807_v58, 5  ;;  %v2788_v46 = vsel %vm8201_vm13, %v2783_v44, %v2787_v42  ;;  %v6976_v50 = vrot.slane %v2998_v15, 9  ;;  %v3051_v2 = vrot.slane %v8787_v12, 5  ;;  %v3002_v55 = vld [vmem:[#allocation2 + $0x38] sm:$0xe] }
 0x12d   :  { %v2802_v18 = vsel %vm8201_vm13, %v2797_v52, %v2801_v43  ;;  %v6975_v10 = vrot.slane %v2997_v33, 9  ;;  %v3047_v38 = vrot.slane %v8768_v14, 5  ;;  %v2815_v6 = vrot.slane %v2813_v24, 5  ;;  %v3003_v52 = vld [vmem:[#allocation2 + $0x40] sm:$0xe] }
 0x12e   :  { %v6965_v0 = vcombine.low %v2788_v46, %v2802_v18  ;;  %v2810_v60 = vor.u32 %v2809_v8, %v2806_v34  ;;  %v3052_v42 = vsel %vm8197_vm12, %v6976_v50, %v3051_v2  ;;  %v6977_v39 = vrot.slane %v2999_v20, 9  ;;  %v3004_v8 = vld [vmem:[#allocation2 + $0x48] sm:$0xe] }
 0x12f   :  { %v3048_v12 = vsel %vm8197_vm12, %v6975_v10, %v3047_v38  ;;  %v3055_v22 = vrot.slane %v8804_v11, 5  ;;  %v6978_v13 = vrot.slane %v3000_v30, 9  ;;  %v3059_v7 = vrot.slane %v8812_v36, 5  ;;  %v3006_v46 = vld [vmem:[#allocation2 + $0x68] sm:$0xe] }
 0x130   :  { %7559 = vmatmul.mubr.msk.bf16.gmra.mxu1 %vm907_vm15, %v6964_v17  ;;  %v2605_v40 = vld [vmem:[#allocation2 + $0x98] sm:$0xf]  ;;  %v8906_v16 = vld [vmem:[#allocation2 + $0x9c] sm:$0x1]  ;;  %v2811_v53 = vrot.slane %v2810_v60, 4  ;;  %v6992_v49 = vcombine.low %v3048_v12, %v3052_v42  ;;  %v6979_v32 = vrot.slane %v3001_v54, 9 }
 0x131   :  { %7562 = vmatprep.mubr.msk.bf16.mxu1 %vm907_vm15, %v6965_v0  ;;  %v2818_v56 = vshrl.u32 %v2605_v40, 16  ;;  %v2821_v31 = vshll.u32 %v2605_v40, 16  ;;  %v2827_v19 = vshll.u32 %v8906_v16, 16  ;;  %7541 = vmatmul.mubr.msk.bf16.gmra.mxu0 %vm907_vm15, %v7817_v57  ;;  %v7819_v45 = vld [vmem:[#allocation2 + $0x90] ss:$8 sps:$4 sm:$0xff]   ;;  %v3063_v58 = vrot.slane %v8822_v27, 5 }
 0x132   :  { %7544 = vmatprep.mubr.msk.bf16.mxu0 %vm907_vm15, %v7818_v26  ;;  %v2816_v48 = vsel %vm8201_vm13, %v2811_v53, %v2815_v6  ;;  %v6980_v29 = vrot.slane %v3002_v55, 9  ;;  %v3067_v44 = vrot.slane %v8828_v25, 5  ;;  %v3056_v11 = vsel %vm8197_vm12, %v6977_v39, %v3055_v22  ;;  %v3005_v25 = vld [vmem:[#allocation2 + $0x60] sm:$0xe]  ;;  %v3010_v2 = vld [vmem:[#allocation2 + $0x88] sm:$0xe] }
 0x133   :  { %v2820_v41 = vrot.slane %v2818_v56, 4  ;;  %v2823_v4 = vrot.slane %v2821_v31, 5  ;;  %v2829_v1 = vrot.slane %v2827_v19, 5  ;;  %v3060_v36 = vsel %vm8197_vm12, %v6978_v13, %v3059_v7  ;;  %v3008_v19 = vld [vmem:[#allocation2 + $0x78] sm:$0xe] }
 0x134   :  { %v3064_v34 = vsel %vm8197_vm12, %v6979_v32, %v3063_v58  ;;  %v3068_v27 = vsel %vm8197_vm12, %v6980_v29, %v3067_v44  ;;  %v6993_v15 = vcombine.low %v3056_v11, %v3060_v36  ;;  %v6981_v18 = vrot.slane %v3003_v52, 9  ;;  %v3012_v12 = vld [vmem:[#allocation2 + $0x98] sm:$0xe] }
 0x135   :  { %v2824_v28 = vor.u32 %v2823_v4, %v2820_v41  ;;  %v6994_v17 = vcombine.low %v3064_v34, %v3068_v27  ;;  %v3071_v57 = vrot.slane %v8838_v59, 5  ;;  %v6982_v0 = vrot.slane %v3004_v8, 9  ;;  %v3007_v59 = vld [vmem:[#allocation2 + $0x70] sm:$0xe] }
 0x136   :  { %v3075_v60 = vrot.slane %v8857_v9, 5  ;;  %v6983_v24 = vrot.slane %v3005_v25, 9  ;;  %v3079_v26 = vrot.slane %v8843_v35, 5  ;;  %v6984_v33 = vrot.slane %v3006_v46, 9  ;;  %v3009_v35 = vld [vmem:[#allocation2 + $0x80] sm:$0xe] }
 0x137   :  { %v2825_v14 = vrot.slane %v2824_v28, 4  ;;  %v3083_v50 = vrot.slane %v8847_v61, 5  ;;  %v3072_v40 = vsel %vm8197_vm12, %v6981_v18, %v3071_v57  ;;  %v6985_v61 = vrot.slane %v3007_v59, 9 }
 0x138   :  { %v3076_v56 = vsel %vm8197_vm12, %v6982_v0, %v3075_v60  ;;  %v3080_v9 = vsel %vm8197_vm12, %v6983_v24, %v3079_v26  ;;  %v3087_v53 = vrot.slane %v8863_v23, 5  ;;  %v6986_v6 = vrot.slane %v3008_v19, 9  ;;  %v3011_v23 = vld [vmem:[#allocation2 + $0x90] sm:$0xe] }
 0x139   :  { %v2830_v43 = vsel %vm8201_vm13, %v2825_v14, %v2829_v1  ;;  %7545 = vmatmul.mubr.msk.bf16.gmra.mxu0 %vm907_vm15, %v7819_v45  ;;  %v3084_v31 = vsel %vm8197_vm12, %v6984_v33, %v3083_v50  ;;  %v6995_v10 = vcombine.low %v3072_v40, %v3076_v56  ;;  %v3091_v41 = vrot.slane %v8871_v63, 5 }
 0x13a   :  { %v6966_v47 = vcombine.low %v2816_v48, %v2830_v43  ;;  %7568 = vmatprep.mubr.msk.bf16.mxu0 %vm907_vm15, %v6992_v49  ;;  %v6996_v38 = vcombine.low %v3080_v9, %v3084_v31  ;;  %v6987_v4 = vrot.slane %v3009_v35, 9  ;;  %v3095_v20 = vrot.slane %v8878_v21, 5 }
 0x13b   :  { %v6988_v28 = vrot.slane %v3010_v2, 9  ;;  %v3099_v1 = vrot.slane %v8883_v62, 5  ;;  %v3088_v42 = vsel %vm8197_vm12, %v6985_v61, %v3087_v53  ;;  %v3092_v30 = vsel %vm8197_vm12, %v6986_v6, %v3091_v41 }
 0x13c   :  { %7563 = vmatmul.mubr.msk.bf16.gmra.mxu1 %vm907_vm15, %v6966_v47  ;;  %v3096_v63 = vsel %vm8197_vm12, %v6987_v4, %v3095_v20  ;;  %v6997_v21 = vcombine.low %v3088_v42, %v3092_v30  ;;  %v6989_v55 = vrot.slane %v3011_v23, 9  ;;  %v3103_v62 = vrot.slane %v8902_v51, 5 }
 0x13d   :  { %v3100_v54 = vsel %vm8197_vm12, %v6988_v28, %v3099_v1  ;;  %v6990_v14 = vrot.slane %v3012_v12, 9  ;;  %v3107_v45 = vrot.slane %v8906_v16, 5  ;;  %vm4220_vm2 = vcmask 1043456  }
 0x13e   :  { %v6998_v48 = vcombine.low %v3096_v63, %v3100_v54  ;;  %v3104_v39 = vsel %vm8197_vm12, %v6989_v55, %v3103_v62 }
 0x13f   :  { %v3108_v22 = vsel %vm8197_vm12, %v6990_v14, %v3107_v45 }
 0x140   :  { %v6999_v49 = vcombine.low %v3104_v39, %v3108_v22 }
 0x141   :  { %7569 = vmatmul.mubr.msk.bf16.vlgmr.msra.gmra.mxu0 %vm907_vm15, %v6993_v15 }
 0x142   :  { %7572 = vmatprep.mubr.msk.bf16.mxu0 %vm907_vm15, %v6994_v17 }
 0x149   :  { %7573 = vmatmul.mubr.msk.bf16.gmra.mxu0 %vm907_vm15, %v6995_v10 }
 0x14a   :  { %7576 = vmatprep.mubr.msk.bf16.mxu0 %vm907_vm15, %v6996_v38 }
 0x151   :  { %7577 = vmatmul.mubr.msk.bf16.gmra.mxu0 %vm907_vm15, %v6997_v21 }
 0x152   :  { %7580 = vmatprep.mubr.msk.bf16.mxu0 %vm907_vm15, %v6998_v48 }
 0x159   :  { %7581 = vmatmul.mubr.msk.bf16.gmra.mxu0 %vm907_vm15, %v6999_v49 }
 0x164   :  { %v7444_v13 = vpop.f32.mrf.mxu1 }
 0x166   :  { %v1134_v7 = vpop.f32.mrf.mxu1 }
 0x168   :  { %v7445_v32 = vpop.f32.mrf.mxu1 }
 0x16a   :  { %v8974_v51 = vpop.f32.mrf.mxu1 }
 0x16c   :  { %v7448_v43 = vpop.f32.mrf.mxu1 }
 0x16e   :  { %v1150_v16 = vpop.f32.mrf.mxu1 }
 0x170   :  { %v7449_v58 = vpop.f32.mrf.mxu1 }
 0x172   :  { %v8976_v44 = vpop.f32.mrf.mxu1 }
 0x176   :  { %v7426_v29 = vpop.f32.mrf.mxu0 }
 0x177   :  { %v1143_v47 = vadd.f32 %v7444_v13, %v7426_v29 }
 0x178   :  { %v970_v11 = vpop.f32.mrf.mxu0  ;;  %v7452_v36 = vpop.f32.mrf.mxu1 }
 0x179   :  { %v1135_v52 = vadd.f32 %v1134_v7, %v970_v11 }
 0x17a   :  { %v7427_v34 = vpop.f32.mrf.mxu0  ;;  %v1166_v27 = vpop.f32.mrf.mxu1 }
 0x17b   :  { %v1146_v8 = vadd.f32 %v7445_v32, %v7427_v34 }
 0x17c   :  { %v8978_v25 = vpop.f32.mrf.mxu0  ;;  %v7453_v46 = vpop.f32.mrf.mxu1 }
 0x17e   :  { %v8980_v15 = vpop.f32.mrf.mxu1 }
 0x17f   :  { %v7430_v18 = vpop.f32.mrf.mxu0 }
 0x180   :  { %v1159_v17 = vadd.f32 %v7448_v43, %v7430_v18 }
 0x181   :  { %v986_v57 = vpop.f32.mrf.mxu0  ;;  %v7456_v0 = vpop.f32.mrf.mxu1 }
 0x182   :  { %v1151_v60 = vadd.f32 %v1150_v16, %v986_v57 }
 0x183   :  { %v7431_v24 = vpop.f32.mrf.mxu0  ;;  %v1182_v26 = vpop.f32.mrf.mxu1 }
 0x184   :  { %v1162_v33 = vadd.f32 %v7449_v58, %v7431_v24 }
 0x185   :  { %v8982_v50 = vpop.f32.mrf.mxu0  ;;  %v7457_v40 = vpop.f32.mrf.mxu1 }
 0x187   :  { %v8984_v56 = vpop.f32.mrf.mxu1 }
 0x188   :  { %v7434_v59 = vpop.f32.mrf.mxu0 }
 0x189   :  { %v1175_v9 = vadd.f32 %v7452_v36, %v7434_v59  ;;  %v7480_v31 = vpop.f32.mrf.mxu1 }
 0x18a   :  { %v1002_v19 = vpop.f32.mrf.mxu0 }
 0x18b   :  { %v1167_v35 = vadd.f32 %v1166_v27, %v1002_v19  ;;  %v8986_v2 = vpop.f32.mrf.mxu1 }
 0x18c   :  { %v7435_v10 = vpop.f32.mrf.mxu0 }
 0x18d   :  { %v1178_v61 = vadd.f32 %v7453_v46, %v7435_v10  ;;  %v8988_v38 = vpop.f32.mrf.mxu1 }
 0x18e   :  { %v8990_v53 = vpop.f32.mrf.mxu0 }
 0x18f   :  { %v8992_v6 = vpop.f32.mrf.mxu1 }
 0x190   :  { %v7438_v41 = vpop.f32.mrf.mxu0 }
 0x191   :  { %v1191_v4 = vadd.f32 %v7456_v0, %v7438_v41  ;;  %v7484_v20 = vpop.f32.mrf.mxu1 }
 0x192   :  { %v1018_v28 = vpop.f32.mrf.mxu0 }
 0x193   :  { %v1183_v1 = vadd.f32 %v1182_v26, %v1018_v28  ;;  %v8994_v42 = vpop.f32.mrf.mxu1 }
 0x194   :  { %v7439_v30 = vpop.f32.mrf.mxu0 }
 0x195   :  { %v1194_v23 = vadd.f32 %v7457_v40, %v7439_v30  ;;  %v8996_v63 = vpop.f32.mrf.mxu1 }
 0x196   :  { %v8998_v54 = vpop.f32.mrf.mxu0 }
 0x197   :  { %v9000_v12 = vpop.f32.mrf.mxu1 }
 0x198   :  { %v7462_v21 = vpop.f32.mrf.mxu0 }
 0x199   :  { %v1464_v55 = vadd.f32 %v7462_v21, %v1143_v47 }
 0x19a   :  { %v1399_v48 = vpop.f32.mrf.mxu0  ;;  %v7488_v62 = vpop.f32.mrf.mxu1 }
 0x19b   :  { %v9002_v14 = vadd.f32 %v1399_v48, %v1135_v52  ;;  %v1662_v45 = vadd.f32 %v7480_v31, %v1464_v55 }
 0x19c   :  { %v7463_v39 = vpop.f32.mrf.mxu0  ;;  %v9004_v22 = vpop.f32.mrf.mxu1 }
 0x19d   :  { %v9006_v49 = vadd.f32 %v7463_v39, %v1146_v8 }
 0x19e   :  { %v9008_v13 = vpop.f32.mrf.mxu0  ;;  %v9010_v7 = vpop.f32.mrf.mxu1 }
 0x1a0   :  { %v7466_v32 = vpop.f32.mrf.mxu0  ;;  %v9012_v43 = vpop.f32.mrf.mxu1 }
 0x1a1   :  { %v1468_v16 = vadd.f32 %v7466_v32, %v1159_v17 }
 0x1a2   :  { %v1415_v58 = vpop.f32.mrf.mxu0  ;;  %v7492_v29 = vpop.f32.mrf.mxu1 }
 0x1a3   :  { %v9014_v47 = vadd.f32 %v1415_v58, %v1151_v60  ;;  %v1666_v11 = vadd.f32 %v7484_v20, %v1468_v16 }
 0x1a4   :  { %v7467_v36 = vpop.f32.mrf.mxu0  ;;  %v9016_v52 = vpop.f32.mrf.mxu1 }
 0x1a5   :  { %v9018_v34 = vadd.f32 %v7467_v36, %v1162_v33 }
 0x1a6   :  { %v9020_v27 = vpop.f32.mrf.mxu0  ;;  %v9022_v8 = vpop.f32.mrf.mxu1 }
 0x1a8   :  { %v7470_v46 = vpop.f32.mrf.mxu0  ;;  %v9024_v18 = vpop.f32.mrf.mxu1 }
 0x1a9   :  { %v1472_v57 = vadd.f32 %v7470_v46, %v1175_v9 }
 0x1aa   :  { %v1431_v0 = vpop.f32.mrf.mxu0  ;;  %v9026_v17 = vpop.f32.mrf.mxu1 }
 0x1ab   :  { %v9028_v24 = vadd.f32 %v1431_v0, %v1167_v35  ;;  %v1670_v60 = vadd.f32 %v7488_v62, %v1472_v57 }
 0x1ac   :  { %v7471_v26 = vpop.f32.mrf.mxu0  ;;  %v9030_v40 = vpop.f32.mrf.mxu1 }
 0x1ad   :  { %v9032_v59 = vadd.f32 %v7471_v26, %v1178_v61 }
 0x1ae   :  { %v9034_v33 = vpop.f32.mrf.mxu0  ;;  %v9036_v31 = vpop.f32.mrf.mxu1 }
 0x1b0   :  { %v7474_v19 = vpop.f32.mrf.mxu0  ;;  %v9038_v10 = vpop.f32.mrf.mxu1 }
 0x1b1   :  { %v1476_v41 = vadd.f32 %v7474_v19, %v1191_v4 }
 0x1b2   :  { %v1447_v9 = vpop.f32.mrf.mxu0  ;;  %v9040_v20 = vpop.f32.mrf.mxu1 }
 0x1b3   :  { %v9042_v28 = vadd.f32 %v1447_v9, %v1183_v1  ;;  %v1674_v35 = vadd.f32 %v7492_v29, %v1476_v41 }
 0x1b4   :  { %v7475_v30 = vpop.f32.mrf.mxu0  ;;  %v9044_v21 = vpop.f32.mrf.mxu1 }
 0x1b5   :  { %v9046_v55 = vadd.f32 %v7475_v30, %v1194_v23 }
 0x1b6   :  { %v9048_v61 = vpop.f32.mrf.mxu0  ;;  %v9050_v48 = vpop.f32.mrf.mxu1 }
 0x1b7   :  { %11049 = vst [vmem:[#allocation6_spill] sm:$0xff] %v9050_v48 }
 0x1b8   :  { %v7498_v62 = vpop.f32.mrf.mxu0  ;;  %v9052_v39 = vpop.f32.mrf.mxu1 }
 0x1b9   :  { %11050 = vst [vmem:[#allocation7_spill] sm:$0xff] %v9052_v39  ;;  %v9054_v32 = vadd.f32 %v7498_v62, %v1662_v45 }
 0x1ba   :  { %v2019_v4 = vpop.f32.mrf.mxu0  ;;  %v9056_v58 = vpop.f32.mrf.mxu1 }
 0x1bb   :  { %11051 = vst [vmem:[#allocation8_spill] sm:$0xff] %v9056_v58 }
 0x1bc   :  { %v7499_v16 = vpop.f32.mrf.mxu0  ;;  %v9058_v36 = vpop.f32.mrf.mxu1 }
 0x1bd   :  { %11052 = vst [vmem:[#allocation9_spill] sm:$0xff] %v9058_v36 }
 0x1be   :  { %v2022_v1 = vpop.f32.mrf.mxu0  ;;  %v9062_v57 = vpop.f32.mrf.mxu1 }
 0x1bf   :  { %11053 = vst [vmem:[#allocation10_spill] sm:$0xff] %v9062_v57 }
 0x1c0   :  { %v7502_v29 = vpop.f32.mrf.mxu0  ;;  %v9066_v19 = vpop.f32.mrf.mxu1 }
 0x1c1   :  { %v9060_v46 = vadd.f32 %v7502_v29, %v1666_v11  ;;  %11054 = vst [vmem:[#allocation11_spill] sm:$0xff] %v9066_v19 }
 0x1c2   :  { %v2035_v23 = vpop.f32.mrf.mxu0  ;;  %v9070_v9 = vpop.f32.mrf.mxu1 }
 0x1c3   :  { %11056 = vst [vmem:[#allocation13_spill] sm:$0xff] %v9070_v9 }
 0x1c4   :  { %v7503_v0 = vpop.f32.mrf.mxu0  ;;  %v9074_v62 = vpop.f32.mrf.mxu1 }
 0x1c5   :  { %11057 = vst [vmem:[#allocation14_spill] sm:$0xff] %v9074_v62 }
 0x1c6   :  { %v9064_v26 = vpop.f32.mrf.mxu0  ;;  %v9076_v11 = vpop.f32.mrf.mxu1 }
 0x1c7   :  { %11058 = vst [vmem:[#allocation15_spill] sm:$0xff] %v9076_v11 }
 0x1c8   :  { %v7506_v45 = vpop.f32.mrf.mxu0  ;;  %v9078_v3 = vpop.f32.mrf.mxu1 }
 0x1c9   :  { %v9068_v41 = vadd.f32 %v7506_v45, %v1670_v60  ;;  %11059 = vst [vmem:[#allocation16_spill] sm:$0xff] %v9078_v3 }
 0x1ca   :  { %v9072_v30 = vpop.f32.mrf.mxu0 }
 0x1cb   :  { %11055 = vst [vmem:[#allocation12_spill] sm:$0xff] %v9068_v41 }
 0x1cc   :  { %v7507_v37 = vpop.f32.mrf.mxu0 }
 0x1ce   :  { %v2054_v29 = vpop.f32.mrf.mxu0 }
 0x1d4   :  { %v9082_v19 = vpop.f32.mrf.mxu1 }
 0x1d5   :  { %11061 = vst [vmem:[#allocation18_spill] sm:$0xff] %v9082_v19 }
 0x1d6   :  { %v9088_v9 = vpop.f32.mrf.mxu1 }
 0x1d7   :  { %11064 = vst [vmem:[#allocation21_spill] sm:$0xff] %v9088_v9 }
 0x1d8   :  { %v9090_v41 = vpop.f32.mrf.mxu1 }
 0x1d9   :  { %v7510_v5 = vpop.f32.mrf.mxu0  ;;  %11065 = vst [vmem:[#allocation22_spill] sm:$0xff] %v9090_v41  ;;  %v1138_v41 = vadd.f32 %v8974_v51, %v8978_v25 }
 0x1da   :  { %v9080_v57 = vadd.f32 %v7510_v5, %v1674_v35  ;;  %v9092_v48 = vpop.f32.mrf.mxu1 }
 0x1db   :  { %v2067_v36 = vpop.f32.mrf.mxu0  ;;  %11066 = vst [vmem:[#allocation23_spill] sm:$0xff] %v9092_v48 }
 0x1dc   :  { %11060 = vst [vmem:[#allocation17_spill] sm:$0xff] %v9080_v57 }
 0x1dd   :  { %v9084_v60 = vpop.f32.mrf.mxu0 }
 0x1de   :  { %11062 = vst [vmem:[#allocation19_spill] sm:$0xff] %v9084_v60 }
 0x1df   :  { %v9086_v45 = vpop.f32.mrf.mxu0 }
 0x1e0   :  { %11063 = vst [vmem:[#allocation20_spill] sm:$0xff] %v9086_v45 }
 0x1e1   :  { %v7534_v58 = vpop.f32.mrf.mxu0 }
 0x1e3   :  { %v2496_v62 = vpop.f32.mrf.mxu0 }
 0x1e5   :  { %v7535_v11 = vpop.f32.mrf.mxu0 }
 0x1e7   :  { %v2499_v39 = vpop.f32.mrf.mxu0 }
 0x1e8   :  { %v9098_v35 = vpop.f32.mrf.mxu1 }
 0x1e9   :  { %v9094_v3 = vpop.f32.mrf.mxu0  ;;  %11069 = vst [vmem:[#allocation26_spill] sm:$0xff] %v9098_v35  ;;  %v1463_v35 = vadd.f32 %v9008_v13, %v1138_v41  ;;  %v1667_v13 = vadd.f32 %v8996_v63, %v9018_v34 }
 0x1ea   :  { %11067 = vst [vmem:[#allocation24_spill] sm:$0xff] %v9094_v3  ;;  %v9104_v45 = vpop.f32.mrf.mxu1 }
 0x1eb   :  { %v9096_v5 = vpop.f32.mrf.mxu0  ;;  %11071 = vst [vmem:[#allocation28_spill] sm:$0xff] %v9104_v45  ;;  %v1170_v45 = vadd.f32 %v8980_v15, %v8990_v53  ;;  %v1664_v15 = vadd.f32 %v8994_v42, %v9014_v47  ;;  %v2089_v47 = vadd.f32 %v7503_v0, %v1667_v13 }
 0x1ec   :  { %11068 = vst [vmem:[#allocation25_spill] sm:$0xff] %v9096_v5  ;;  %v9112_v48 = vpop.f32.mrf.mxu1  ;;  %v1154_v5 = vadd.f32 %v8976_v44, %v8982_v50  ;;  %v1663_v44 = vadd.f32 %v8988_v38, %v9006_v49 }
 0x1ed   :  { %v9100_v19 = vpop.f32.mrf.mxu0  ;;  %11074 = vst [vmem:[#allocation31_spill] sm:$0xff] %v9112_v48  ;;  %v1471_v48 = vadd.f32 %v9034_v33, %v1170_v45  ;;  %v1668_v33 = vadd.f32 %v9004_v22, %v9028_v24  ;;  %v1675_v24 = vadd.f32 %v9022_v8, %v9046_v55  ;;  %v11082_v45 = vld [vmem:[#allocation11_spill] sm:$0xff] }
 0x1ee   :  { %v9126_v25 = vpop.f32.mrf.mxu1  ;;  %v2085_v53 = vadd.f32 %v7499_v16, %v1663_v44 }
 0x1ef   :  { %v9102_v60 = vpop.f32.mrf.mxu0  ;;  %v1669_v63 = vadd.f32 %v9012_v43, %v1471_v48 }
 0x1f0   :  { %11070 = vst [vmem:[#allocation27_spill] sm:$0xff] %v9102_v60  ;;  %v1660_v60 = vadd.f32 %v8986_v2, %v9002_v14  ;;  %v1186_v2 = vadd.f32 %v8984_v56, %v8998_v54  ;;  %v1661_v14 = vadd.f32 %v8992_v6, %v1463_v35  ;;  %v1671_v56 = vadd.f32 %v9010_v7, %v9032_v59  ;;  %v9149_v42 = vpop.f32.mrf.mxu1 }
 0x1f1   :  { %v9106_v57 = vpop.f32.mrf.mxu0  ;;  %v2086_v54 = vadd.f32 %v2035_v23, %v1664_v15  ;;  %v2362_v7 = vadd.f32 %v9026_v17, %v9054_v32  ;;  %v2090_v59 = vadd.f32 %v9072_v30, %v1668_v33  ;;  %v2091_v16 = vadd.f32 %v2054_v29, %v1669_v63  ;;  %v11075_v32 = vld [vmem:[#allocation6_spill] sm:$0xff]  ;;  %v11077_v30 = vld [vmem:[#allocation12_spill] sm:$0xff]  ;;  %v11080_v29 = vld [vmem:[#allocation9_spill] sm:$0xff] }
 0x1f2   :  { %11072 = vst [vmem:[#allocation29_spill] sm:$0xff] %v9106_v57  ;;  %v2082_v51 = vadd.f32 %v2019_v4, %v1660_v60  ;;  %v1475_v49 = vadd.f32 %v9048_v61, %v1186_v2  ;;  %v2083_v4 = vadd.f32 %v2022_v1, %v1661_v14  ;;  %v2093_v61 = vadd.f32 %v7507_v37, %v1671_v56  ;;  %v2950_v0 = vpop.f32.mrf.mxu1  ;;  %v11081_v60 = vld [vmem:[#allocation10_spill] sm:$0xff] }
 0x1f3   :  { %v9108_v9 = vpop.f32.mrf.mxu0  ;;  %v2363_v43 = vadd.f32 %v9036_v31, %v2085_v53  ;;  %v2561_v1 = vadd.f32 %v7534_v58, %v2362_v7  ;;  %v2366_v17 = vadd.f32 %v9040_v20, %v9060_v46  ;;  %v2364_v55 = vadd.f32 %v9044_v21, %v2086_v54  ;;  %v11076_v31 = vld [vmem:[#allocation7_spill] sm:$0xff]  ;;  %v11083_v20 = vld [vmem:[#allocation17_spill] sm:$0xff]  ;;  %v11086_v2 = vld [vmem:[#allocation14_spill] sm:$0xff] }
 0x1f4   :  { %11073 = vst [vmem:[#allocation30_spill] sm:$0xff] %v9108_v9  ;;  %v1467_v9 = vadd.f32 %v9020_v27, %v1154_v5  ;;  %v2360_v6 = vadd.f32 %v9030_v40, %v2082_v51  ;;  %v2361_v23 = vadd.f32 %v9038_v10, %v2083_v4  ;;  %v2367_v37 = vadd.f32 %v11075_v32, %v2089_v47  ;;  %v11084_v46 = vld [vmem:[#allocation13_spill] sm:$0xff]  ;;  %v11085_v51 = vld [vmem:[#allocation19_spill] sm:$0xff]  ;;  %v7561_v44 = vpop.f32.mrf.mxu1  ;;  %v11087_v15 = vld [vmem:[#allocation18_spill] sm:$0xff] }
 0x1f5   :  { %v9116_v3 = vpop.f32.mrf.mxu0  ;;  %v2562_v8 = vadd.f32 %v7535_v11, %v2363_v43  ;;  %v2368_v10 = vadd.f32 %v11080_v29, %v2090_v59  ;;  %v2371_v11 = vadd.f32 %v11081_v60, %v2093_v61  ;;  %v2369_v5 = vadd.f32 %v11082_v45, %v2091_v16  ;;  %v11090_v56 = vld [vmem:[#allocation25_spill] sm:$0xff]  ;;  %v11091_v54 = vld [vmem:[#allocation22_spill] sm:$0xff]  ;;  %v11100_v29 = vld [vmem:[#allocation31_spill] sm:$0xff] }
 0x1f6   :  { %v1665_v27 = vadd.f32 %v9000_v12, %v1467_v9  ;;  %v1672_v12 = vadd.f32 %v9016_v52, %v9042_v28  ;;  %v2559_v40 = vadd.f32 %v2496_v62, %v2360_v6  ;;  %v1673_v28 = vadd.f32 %v9024_v18, %v1475_v49  ;;  %v11079_v18 = vld [vmem:[#allocation21_spill] sm:$0xff]  ;;  %v11089_v49 = vld [vmem:[#allocation24_spill] sm:$0xff] }
 0x1f7   :  { %v9124_v57 = vpop.f32.mrf.mxu0  ;;  %v2560_v41 = vadd.f32 %v2499_v39, %v2361_v23  ;;  %v2374_v21 = vadd.f32 %v11084_v46, %v11083_v20  ;;  %v2097_v39 = vadd.f32 %v11085_v51, %v1675_v24  ;;  %v2983_v53 = vadd.f32 %v11087_v15, %v2561_v1  ;;  %v9197_v23 = vld [vmem:[%s11015_s2] ss:$0 sm:$0xff]  ;;  %v3491_v15 = vld [vmem:[#allocation3 + $0x10] sm:$0x1] }
 0x1f8   :  { %v2087_v34 = vadd.f32 %v9064_v26, %v1665_v27  ;;  %v2094_v52 = vadd.f32 %v2067_v36, %v1672_v12  ;;  %v11078_v36 = vld [vmem:[#allocation8_spill] sm:$0xff]  ;;  %v2981_v58 = vadd.f32 %v11079_v18, %v2559_v40  ;;  %v2565_v4 = vadd.f32 %v11089_v49, %v2366_v17  ;;  %v11093_v40 = vld [vmem:[#allocation23_spill] sm:$0xff] }
 0x1f9   :  { %v9131_v50 = vpop.f32.mrf.mxu0  ;;  %v2370_v62 = vadd.f32 %v11078_v36, %v11077_v30  ;;  %v11088_v27 = vld [vmem:[#allocation20_spill] sm:$0xff]  ;;  %v2563_v6 = vadd.f32 %v11090_v56, %v2364_v55  ;;  %v2984_v47 = vadd.f32 %v11091_v54, %v2562_v8  ;;  %v2566_v12 = vadd.f32 %v9100_v19, %v2367_v37  ;;  %v11094_v61 = vld [vmem:[#allocation29_spill] sm:$0xff]  ;;  %v2953_v19 = vpop.f32.mrf.mxu1  ;;  %v11096_v17 = vld [vmem:[#allocation15_spill] sm:$0xff] }
 0x1fa   :  { %v2365_v9 = vadd.f32 %v11076_v31, %v2087_v34  ;;  %v2372_v14 = vadd.f32 %v11086_v2, %v2094_v52  ;;  %v2095_v33 = vadd.f32 %v11088_v27, %v1673_v28  ;;  %v11092_v34 = vld [vmem:[#allocation27_spill] sm:$0xff]  ;;  %v2982_v59 = vadd.f32 %v11093_v40, %v2560_v41  ;;  %v11097_v31 = vld [vmem:[#allocation16_spill] sm:$0xff] }
 0x1fb   :  { %v9143_v38 = vpop.f32.mrf.mxu0  ;;  %v2569_v16 = vadd.f32 %v11094_v61, %v2370_v62  ;;  %v11095_v43 = vld [vmem:[#allocation30_spill] sm:$0xff]  ;;  %v2570_v28 = vadd.f32 %v9116_v3, %v2371_v11  ;;  %v2568_v1 = vadd.f32 %v9124_v57, %v2369_v5  ;;  %v2375_v55 = vadd.f32 %v11096_v17, %v2097_v39  ;;  %v11099_v36 = vld [vmem:[#allocation28_spill] sm:$0xff]  ;;  %v3506_v49 = vld [vmem:[#allocation3 + $0x38] sm:$0x1] }
 0x1fc   :  { %v2564_v7 = vadd.f32 %v11092_v34, %v2365_v9  ;;  %v2567_v52 = vadd.f32 %v11095_v43, %v2368_v10  ;;  %v2573_v41 = vadd.f32 %v9131_v50, %v2374_v21  ;;  %v9205_v3 = vadd.f32 %v11097_v31, %v2095_v33  ;;  %v11098_v57 = vld [vmem:[#allocation26_spill] sm:$0xff]  ;;  %v7564_v46 = vpop.f32.mrf.mxu1  ;;  %v3521_v61 = vld [vmem:[#allocation3 + $0x60] sm:$0x1] }
 0x1fd   :  { %v9154_v22 = vpop.f32.mrf.mxu0  ;;  %v2987_v9 = vadd.f32 %v11098_v57, %v2565_v4  ;;  %v2985_v62 = vadd.f32 %v11099_v36, %v2563_v6  ;;  %v2988_v10 = vadd.f32 %v11100_v29, %v2566_v12  ;;  %v9218_v50 = vadd.f32 %v9149_v42, %v2569_v16  ;;  %v3503_v33 = vld [vmem:[#allocation3 + $0x30] sm:$0x1]  ;;  %v3509_v12 = vld [vmem:[#allocation3 + $0x40] sm:$0x1]  ;;  %v3536_v29 = vld [vmem:[#allocation3 + $0x88] sm:$0x1] }
 0x1fe   :  { %v2986_v60 = vadd.f32 %v9126_v25, %v2564_v7  ;;  %v9220_v45 = vadd.f32 %v2950_v0, %v2567_v52  ;;  %v9222_v5 = vadd.f32 %v7561_v44, %v2570_v28  ;;  %v9224_v20 = vadd.f32 %v2953_v19, %v2568_v1  ;;  %v3527_v19 = vld [vmem:[#allocation3 + $0x70] sm:$0x1]  ;;  %v3533_v31 = vld [vmem:[#allocation3 + $0x80] sm:$0x1] }
 0x1ff   :  { %v9163_v48 = vpop.f32.mrf.mxu0  ;;  %v9234_v42 = vadd.f32 %v9143_v38, %v2372_v14  ;;  %v9236_v44 = vadd.f32 %v7564_v46, %v2573_v41  ;;  %v3492_v14 = vsel %vm9240_vm5, 0, %v3491_v15  ;;  %v11103_v4 = vmov 0   ;;  %v3530_v41 = vld [vmem:[#allocation3 + $0x78] sm:$0x1] }
 0x200   :  { %3473 = vst.msk [vmem:[#allocation3] sm:$0xf] %vm3472_vm1, %v11103_v4  ;;  %3476 = vst.msk [vmem:[#allocation3 + $0x50] sm:$0xf] %vm3472_vm1, %v11103_v4  ;;  %v3510_v40 = vsel %vm9240_vm5, 0, %v3509_v12  ;;  %v9270_v16 = vadd.f32 %v9154_v22, %v2375_v55  ;;  %v3522_v1 = vsel %vm9240_vm5, 0, %v3521_v61 }
 0x201   :  { %v7570_v26 = vpop.f32.mrf.mxu0  ;;  %3479 = vst.msk [vmem:[#allocation3 + $0x48] sm:$0xf] %vm3472_vm1, %v11103_v4  ;;  %3481 = vst.msk [vmem:[#allocation3 + $0x98] sm:$0xf] %vm3472_vm1, %v11103_v4  ;;  %v11104_v17 = vmov 0  ;;  %v3531_v36 = vsel %vm9240_vm5, 0, %v3530_v41 }
 0x202   :  { %v3261_v24 = vadd.f32 %v7570_v26, %v2983_v53  ;;  %v3494_v53 = vld [vmem:[#allocation3 + $0x18] sm:$0x1]  ;;  %3493 = vst [vmem:[#allocation3 + $0x10] sm:$0x1] %v3492_v14  ;;  %3511 = vst [vmem:[#allocation3 + $0x40] sm:$0x1] %v3510_v40 }
 0x203   :  { %v3196_v35 = vpop.f32.mrf.mxu0  ;;  %v3495_v54 = vsel %vm9240_vm5, 0, %v3494_v53  ;;  %v11105_v17 = vsel %vm9278_vm3, 4294967295, %v11104_v17  ;;  %3523 = vst [vmem:[#allocation3 + $0x60] sm:$0x1] %v3522_v1  ;;  %3532 = vst [vmem:[#allocation3 + $0x78] sm:$0x1] %v3531_v36 }
 0x204   :  { %v3259_v13 = vadd.f32 %v3196_v35, %v2981_v58  ;;  %v9210_v18 = vadd.f32 %v9197_v23, %v3261_v24  ;;  %3496 = vst [vmem:[#allocation3 + $0x18] sm:$0x1] %v3495_v54  ;;  %11106 = vst [vmem:[#allocation6_spill] sm:$0xff] %v11105_v17  ;;  %v3561_v4 = vld [vmem:[#allocation3 + $0x2c] sm:$0x1] }
 0x205   :  { %v7571_v63 = vpop.f32.mrf.mxu0  ;;  %v3567_v12 = vld [vmem:[#allocation3 + $0x3c] sm:$0x1] }
 0x206   :  { %v9201_v32 = vadd.f32 %v9197_v23, %v3259_v13  ;;  %v3262_v37 = vadd.f32 %v7571_v63, %v2984_v47  ;;  %v3302_v13 = vsel %vm3298_vm0, %v9210_v18, 0.0  ;;  %v3504_v47 = vsel %vm9240_vm5, 0, %v3503_v33  ;;  %v3579_v61 = vld [vmem:[#allocation3 + $0x5c] sm:$0x1] }
 0x207   :  { %v3199_v8 = vpop.f32.mrf.mxu0  ;;  %v3507_v63 = vsel %vm9240_vm5, 0, %v3506_v49  ;;  %3505 = vst [vmem:[#allocation3 + $0x30] sm:$0x1] %v3504_v47  ;;  %v3568_v40 = vsel %vm9278_vm3, 0, %v3567_v12 }
 0x208   :  { %v3260_v26 = vadd.f32 %v3199_v8, %v2982_v59  ;;  %v3299_v21 = vsel %vm3298_vm0, %v9201_v32, 0.0  ;;  %v9229_v35 = vadd.f32 %v9197_v23, %v3262_v37  ;;  %3508 = vst [vmem:[#allocation3 + $0x38] sm:$0x1] %v3507_v63  ;;  %v3518_v59 = vld [vmem:[#allocation3 + $0x58] sm:$0x1]  ;;  %v3562_v63 = vsel %vm9278_vm3, 0, %v3561_v4 }
 0x209   :  { %v7574_v30 = vpop.f32.mrf.mxu0  ;;  %v3519_v28 = vsel %vm9240_vm5, 0, %v3518_v59  ;;  %v3524_v8 = vld [vmem:[#allocation3 + $0x68] sm:$0x1]  ;;  %3563 = vst [vmem:[#allocation3 + $0x2c] sm:$0x1] %v3562_v63 }
 0x20a   :  { %v9213_v58 = vadd.f32 %v9197_v23, %v3260_v26  ;;  %v3265_v27 = vadd.f32 %v7574_v30, %v2987_v9  ;;  %v3304_v34 = vsel %vm3298_vm0, %v9229_v35, 0.0  ;;  %3520 = vst [vmem:[#allocation3 + $0x58] sm:$0x1] %v3519_v28  ;;  %v3525_v26 = vsel %vm9240_vm5, 0, %v3524_v8  ;;  %v3570_v59 = vld [vmem:[#allocation3 + $0x44] sm:$0x1] }
 0x20b   :  { %v3212_v11 = vpop.f32.mrf.mxu0  ;;  %3526 = vst [vmem:[#allocation3 + $0x68] sm:$0x1] %v3525_v26  ;;  %v3528_v30 = vsel %vm9240_vm5, 0, %v3527_v19  ;;  %3569 = vst [vmem:[#allocation3 + $0x3c] sm:$0x1] %v3568_v40 }
 0x20c   :  { %v3300_v25 = vsel %vm3298_vm0, %v9213_v58, 0.0  ;;  %v3263_v51 = vadd.f32 %v3212_v11, %v2985_v62  ;;  %v9283_v22 = vadd.f32 %v9197_v23, %v3265_v27  ;;  %v3534_v62 = vsel %vm9240_vm5, 0, %v3533_v31  ;;  %3529 = vst [vmem:[#allocation3 + $0x70] sm:$0x1] %v3528_v30  ;;  %v3558_v27 = vld [vmem:[#allocation3 + $0x24] sm:$0x1] }
 0x20d   :  { %v3301_v0 = vadd.f32 %v3300_v25, %v3299_v21  ;;  %v7575_v39 = vpop.f32.mrf.mxu0  ;;  %3535 = vst [vmem:[#allocation3 + $0x80] sm:$0x1] %v3534_v62  ;;  %v3537_v21 = vsel %vm9240_vm5, 0, %v3536_v29  ;;  %v3539_v25 = vld [vmem:[#allocation3 + $0x90] sm:$0x1]  ;;  %v3559_v47 = vsel %vm9278_vm3, 0, %v3558_v27 }
 0x20e   :  { %v9247_v38 = vadd.f32 %v9197_v23, %v3263_v51  ;;  %v3266_v7 = vadd.f32 %v7575_v39, %v2988_v10  ;;  %v2966_v10 = vpop.f32.mrf.mxu1  ;;  %v3552_v51 = vld [vmem:[#allocation3 + $0x14] sm:$0x1]  ;;  %3538 = vst [vmem:[#allocation3 + $0x88] sm:$0x1] %v3537_v21  ;;  %v3540_v53 = vsel %vm9240_vm5, 0, %v3539_v25  ;;  %v3310_v14 = vsel %vm3298_vm0, %v9283_v22, 0.0 }
 0x20f   :  { %v3303_v56 = vadd.f32 %v3302_v13, %v3301_v0  ;;  %v3215_v6 = vpop.f32.mrf.mxu0  ;;  %v2993_v15 = vadd.f32 %v2966_v10, %v9234_v42  ;;  %v3553_v13 = vsel %vm9278_vm3, 0, %v3552_v51  ;;  %3541 = vst [vmem:[#allocation3 + $0x90] sm:$0x1] %v3540_v53  ;;  %3560 = vst [vmem:[#allocation3 + $0x24] sm:$0x1] %v3559_v47 }
 0x210   :  { %v3264_v24 = vadd.f32 %v3215_v6, %v2986_v60  ;;  %v3306_v55 = vsel %vm3298_vm0, %v9247_v38, 0.0  ;;  %v9299_v60 = vadd.f32 %v9197_v23, %v3266_v7  ;;  %3554 = vst [vmem:[#allocation3 + $0x14] sm:$0x1] %v3553_v13  ;;  %v3582_v8 = vld [vmem:[#allocation3 + $0x64] sm:$0x1] }
 0x211   :  { %v3305_v43 = vadd.f32 %v3304_v34, %v3303_v56  ;;  %v7578_v52 = vpop.f32.mrf.mxu0  ;;  %v3564_v56 = vld [vmem:[#allocation3 + $0x34] sm:$0x1]  ;;  %v3585_v19 = vld [vmem:[#allocation3 + $0x6c] sm:$0x1]  ;;  %v3591_v31 = vld [vmem:[#allocation3 + $0x7c] sm:$0x1] }
 0x212   :  { %v9288_v37 = vadd.f32 %v9197_v23, %v3264_v24  ;;  %v3269_v33 = vadd.f32 %v7578_v52, %v9218_v50  ;;  %v3565_v50 = vsel %vm9278_vm3, 0, %v3564_v56  ;;  %v3312_v34 = vsel %vm3298_vm0, %v9299_v60, 0.0  ;;  %v3594_v29 = vld [vmem:[#allocation3 + $0x84] sm:$0x1]  ;;  %v3597_v25 = vld [vmem:[#allocation3 + $0x8c] sm:$0x1] }
 0x213   :  { %v3307_v57 = vadd.f32 %v3306_v55, %v3305_v43  ;;  %v3228_v9 = vpop.f32.mrf.mxu0  ;;  %3566 = vst [vmem:[#allocation3 + $0x34] sm:$0x1] %v3565_v50  ;;  %v7565_v43 = vpop.f32.mrf.mxu1  ;;  %v2572_v52 = vadd.f32 %v9163_v48, %v9205_v3  ;;  %v3583_v48 = vsel %vm9278_vm3, 0, %v3582_v8  ;;  %v3588_v3 = vld [vmem:[#allocation3 + $0x74] sm:$0x1]  ;;  %v3586_v30 = vsel %vm9278_vm3, 0, %v3585_v19 }
 0x214   :  { %v3308_v11 = vsel %vm3298_vm0, %v9288_v37, 0.0  ;;  %v3267_v46 = vadd.f32 %v3228_v9, %v9220_v45  ;;  %v3555_v45 = vld [vmem:[#allocation3 + $0x1c] sm:$0x1]  ;;  %v9338_v55 = vadd.f32 %v9197_v23, %v3269_v33  ;;  %3584 = vst [vmem:[#allocation3 + $0x64] sm:$0x1] %v3583_v48  ;;  %v3589_v36 = vsel %vm9278_vm3, 0, %v3588_v3 }
 0x215   :  { %v3309_v0 = vadd.f32 %v3308_v11, %v3307_v57  ;;  %v7579_v39 = vpop.f32.mrf.mxu0  ;;  %v3556_v42 = vsel %vm9278_vm3, 0, %v3555_v45  ;;  %v3592_v62 = vsel %vm9278_vm3, 0, %v3591_v31  ;;  %3587 = vst [vmem:[#allocation3 + $0x6c] sm:$0x1] %v3586_v30  ;;  %3590 = vst [vmem:[#allocation3 + $0x74] sm:$0x1] %v3589_v36  ;;  %v2996_v53 = vadd.f32 %v7565_v43, %v9270_v16 }
 0x216   :  { %v9315_v49 = vadd.f32 %v9197_v23, %v3267_v46  ;;  %3557 = vst [vmem:[#allocation3 + $0x1c] sm:$0x1] %v3556_v42  ;;  %v3270_v7 = vadd.f32 %v7579_v39, %v9222_v5  ;;  %v3571_v5 = vsel %vm9278_vm3, 0, %v3570_v59  ;;  %3593 = vst [vmem:[#allocation3 + $0x7c] sm:$0x1] %v3592_v62  ;;  %v3595_v21 = vsel %vm9278_vm3, 0, %v3594_v29 }
 0x217   :  { %v3311_v6 = vadd.f32 %v3310_v14, %v3309_v0  ;;  %v3231_v54 = vpop.f32.mrf.mxu0  ;;  %3572 = vst [vmem:[#allocation3 + $0x44] sm:$0x1] %v3571_v5  ;;  %v3600_v51 = vld [vmem:[#allocation3 + $0x94] sm:$0x1]  ;;  %v2969_v0 = vpop.f32.mrf.mxu1  ;;  %3596 = vst [vmem:[#allocation3 + $0x84] sm:$0x1] %v3595_v21 }
 0x218   :  { %v3268_v24 = vadd.f32 %v3231_v54, %v9224_v20  ;;  %v3580_v20 = vsel %vm9278_vm3, 0, %v3579_v61  ;;  %v3314_v26 = vsel %vm3298_vm0, %v9315_v49, 0.0  ;;  %v9354_v10 = vadd.f32 %v9197_v23, %v3270_v7  ;;  %v7026_v5 = vld [vmem:[%s11016_s5 + $0x4] sm:$0xf]  ;;  %v3488_v48 = vld [vmem:[#allocation3 + $0x8] sm:$0x1] }
 0x219   :  { %v3313_v28 = vadd.f32 %v3312_v34, %v3311_v6  ;;  %v7582_v1 = vpop.f32.mrf.mxu0  ;;  %3581 = vst [vmem:[#allocation3 + $0x5c] sm:$0x1] %v3580_v20  ;;  %v3598_v45 = vsel %vm9278_vm3, 0, %v3597_v25  ;;  %v3318_v27 = vsel %vm3298_vm0, %v9338_v55, 0.0  ;;  %v2994_v42 = vadd.f32 %v2969_v0, %v2572_v52  ;;  %7755 = vmatprep.subr.msk.bf16.mxu1 %vm4220_vm2, %v7026_v5  ;;  %v3859_v17 = vld [vmem:[#allocation3 + $0x40] sm:$0xf] }
 0x21a   :  { %v9343_v41 = vadd.f32 %v9197_v23, %v3268_v24  ;;  %v3273_v14 = vadd.f32 %v7582_v1, %v9236_v44  ;;  %3599 = vst [vmem:[#allocation3 + $0x8c] sm:$0x1] %v3598_v45  ;;  %v3320_v56 = vsel %vm3298_vm0, %v9354_v10, 0.0  ;;  %v4222_v8 = vsel %vm4220_vm2, %v7026_v5, 0  ;;  %v3497_v45 = vld [vmem:[#allocation3 + $0x20] sm:$0x1] }
 0x21b   :  { %v3315_v57 = vadd.f32 %v3314_v26, %v3313_v28  ;;  %v3244_v9 = vpop.f32.mrf.mxu0  ;;  %v3485_v26 = vld [vmem:[#allocation3] sm:$0x1]  ;;  %7585 = vmatpush3.bf16.msra.mxu1 %v4222_v8  ;;  %v3489_v31 = vsel %vm9240_vm5, 0, %v3488_v48 }
 0x21c   :  { %v3316_v11 = vsel %vm3298_vm0, %v9343_v41, 0.0  ;;  %v3271_v46 = vadd.f32 %v3244_v9, %v2993_v15  ;;  %v3601_v15 = vsel %vm9278_vm3, 0, %v3600_v51  ;;  %v3296_v63 = vadd.f32 %v9197_v23, %v3273_v14  ;;  %3490 = vst [vmem:[#allocation3 + $0x8] sm:$0x1] %v3489_v31  ;;  %v3546_v14 = vld [vmem:[#allocation3 + $0x4] sm:$0x1] }
 0x21d   :  { %v3317_v39 = vadd.f32 %v3316_v11, %v3315_v57  ;;  %v7583_v13 = vpop.f32.mrf.mxu0  ;;  %3602 = vst [vmem:[#allocation3 + $0x94] sm:$0x1] %v3601_v15  ;;  %v3486_v3 = vsel %vm9240_vm5, 0, %v3485_v26 }
 0x21e   :  { %v3294_v33 = vadd.f32 %v9197_v23, %v3271_v46  ;;  %v3274_v6 = vadd.f32 %v7583_v13, %v2996_v53  ;;  %v3326_v40 = vsel %vm3298_vm0, %v3296_v63, 0.0  ;;  %3487 = vst [vmem:[#allocation3] sm:$0x1] %v3486_v3  ;;  %v9463_v53 = vld [vmem:[%s11016_s5 + $0x8] sm:$0xf] }
 0x21f   :  { %v3319_v4 = vadd.f32 %v3318_v27, %v3317_v39  ;;  %v3247_v16 = vpop.f32.mrf.mxu0  ;;  %7757 = vmatprep.subr.msk.bf16.mxu1 %vm4220_vm2, %v9463_v53  ;;  %v3500_v27 = vld [vmem:[#allocation3 + $0x28] sm:$0x1] }
 0x220   :  { %v3272_v54 = vadd.f32 %v3247_v16, %v2994_v42  ;;  %v3322_v50 = vsel %vm3298_vm0, %v3294_v33, 0.0  ;;  %v3297_v34 = vadd.f32 %v9197_v23, %v3274_v6  ;;  %v3549_v42 = vld [vmem:[#allocation3 + $0xc] sm:$0x1] }
 0x221   :  { %v3321_v47 = vadd.f32 %v3320_v56, %v3319_v4  ;;  %v3515_v4 = vld [vmem:[#allocation3 + $0x50] sm:$0x1] }
 0x222   :  { %v9374_v12 = vadd.f32 %v9197_v23, %v3272_v54  ;;  %v3328_v61 = vsel %vm3298_vm0, %v3297_v34, 0.0  ;;  %v3929_v23 = vld [vmem:[%s11016_s5] sm:$0xf]  ;;  %v3498_v54 = vsel %vm9240_vm5, 0, %v3497_v45 }
 0x223   :  { %v3323_v44 = vadd.f32 %v3322_v50, %v3321_v47  ;;  %7756 = vmatprep.subr.msk.bf16.mxu0 %vm4220_vm2, %v3929_v23  ;;  %v4386_v19 = vsel %vm4220_vm2, %v3929_v23, 0  ;;  %v3501_v47 = vsel %vm9240_vm5, 0, %v3500_v27  ;;  %3499 = vst [vmem:[#allocation3 + $0x20] sm:$0x1] %v3498_v54 }
 0x224   :  { %v3324_v7 = vsel %vm3298_vm0, %v9374_v12, 0.0  ;;  %7603 = vmatpush3.bf16.msra.mxu0 %v4386_v19  ;;  %3502 = vst [vmem:[#allocation3 + $0x28] sm:$0x1] %v3501_v47 }
 0x225   :  { %v3325_v24 = vadd.f32 %v3324_v7, %v3323_v44  ;;  %v3516_v7 = vsel %vm9240_vm5, 0, %v3515_v4 }
 0x226   :  { %3517 = vst [vmem:[#allocation3 + $0x50] sm:$0x1] %v3516_v7 }
 0x227   :  { %v3327_v59 = vadd.f32 %v3326_v40, %v3325_v24 }
 0x229   :  { %v3329_v43 = vadd.f32 %v3328_v61, %v3327_v59 }
 0x22b   :  { %v3330_v52 = vrot.slane %v3329_v43, 4 }
 0x22d   :  { %v3331_v28 = vadd.f32 %v3330_v52, %v3329_v43  ;;  %v3576_v52 = vld [vmem:[#allocation3 + $0x54] sm:$0x1] }
 0x22e   :  { %v3577_v5 = vsel %vm9278_vm3, 0, %v3576_v52  ;;  %v3412_v52 = vlaneseq }
 0x22f   :  { %v3332_v1 = vrot.slane %v3331_v28, 2  ;;  %3578 = vst [vmem:[#allocation3 + $0x54] sm:$0x1] %v3577_v5 }
 0x231   :  { %v3333_v20 = vadd.f32 %v3332_v1, %v3331_v28 }
 0x233   :  { %v3334_v57 = vrot.slane %v3333_v20, 1 }
 0x235   :  { %v3335_v9 = vadd.f32 %v3334_v57, %v3333_v20 }
 0x237   :  { %v9395_v30 = vmul.f32 0.0078125, %v3335_v9 }
 0x239   :  { %v9399_v36 = vsub.f32 %v9201_v32, %v9395_v30  ;;  %v9403_v62 = vsub.f32 %v9213_v58, %v9395_v30  ;;  %v9407_v29 = vsub.f32 %v9210_v18, %v9395_v30  ;;  %v9411_v11 = vsub.f32 %v9229_v35, %v9395_v30 }
 0x23a   :  { %v9415_v46 = vsub.f32 %v9247_v38, %v9395_v30  ;;  %v9419_v32 = vsub.f32 %v9283_v22, %v9395_v30  ;;  %v9423_v58 = vsub.f32 %v9299_v60, %v9395_v30  ;;  %v9427_v18 = vsub.f32 %v9315_v49, %v9395_v30 }
 0x23b   :  { %v9431_v35 = vsub.f32 %v9338_v55, %v9395_v30  ;;  %v9435_v38 = vsub.f32 %v9354_v10, %v9395_v30  ;;  %v9438_v21 = vsub.f32 %v3294_v33, %v9395_v30  ;;  %v9441_v22 = vsub.f32 %v3296_v63, %v9395_v30 }
 0x23c   :  { %v9444_v60 = vsub.f32 %v3297_v34, %v9395_v30  ;;  %v3353_v49 = vmul.f32 %v9399_v36, %v9399_v36  ;;  %v3354_v55 = vmul.f32 %v9403_v62, %v9403_v62  ;;  %v3355_v25 = vmul.f32 %v9407_v29, %v9407_v29 }
 0x23d   :  { %v9454_v10 = vsub.f32 %v9288_v37, %v9395_v30  ;;  %v3356_v51 = vmul.f32 %v9411_v11, %v9411_v11  ;;  %v3357_v37 = vmul.f32 %v9415_v46, %v9415_v46  ;;  %v3547_v63 = vsel %vm9278_vm3, 0, %v3546_v14 }
 0x23e   :  { %v3369_v0 = vsel %vm3298_vm0, %v3353_v49, 0.0  ;;  %v3370_v39 = vsel %vm3298_vm0, %v3354_v55, 0.0  ;;  %v3372_v15 = vsel %vm3298_vm0, %v3355_v25, 0.0  ;;  %v3359_v50 = vmul.f32 %v9419_v32, %v9419_v32  ;;  %3548 = vst [vmem:[#allocation3 + $0x4] sm:$0x1] %v3547_v63 }
 0x23f   :  { %v3371_v13 = vadd.f32 %v3370_v39, %v3369_v0  ;;  %v3358_v16 = vmul.f32 %v9454_v10, %v9454_v10  ;;  %v3374_v56 = vsel %vm3298_vm0, %v3356_v51, 0.0  ;;  %v3376_v44 = vsel %vm3298_vm0, %v3357_v37, 0.0  ;;  %v9517_v25 = vld [vmem:[%s11016_s5 + $0xc] sm:$0xf] }
 0x240   :  { %v3550_v34 = vsel %vm9278_vm3, 0, %v3549_v42  ;;  %v9488_v40 = vsub.f32 %v9343_v41, %v9395_v30  ;;  %v3360_v59 = vmul.f32 %v9423_v58, %v9423_v58  ;;  %v3361_v28 = vmul.f32 %v9427_v18, %v9427_v18  ;;  %7758 = vmatprep.subr.msk.bf16.mxu0 %vm4220_vm2, %v9517_v25 }
 0x241   :  { %v3373_v33 = vadd.f32 %v3372_v15, %v3371_v13  ;;  %3551 = vst [vmem:[#allocation3 + $0xc] sm:$0x1] %v3550_v34  ;;  %v3378_v61 = vsel %vm3298_vm0, %v3358_v16, 0.0  ;;  %v3380_v1 = vsel %vm3298_vm0, %v3359_v50, 0.0  ;;  %v3363_v19 = vmul.f32 %v9431_v35, %v9431_v35  ;;  %v9534_v34 = vld [vmem:[#allocation3 + $0x50] sm:$0xf] }
 0x242   :  { %v3362_v41 = vmul.f32 %v9488_v40, %v9488_v40  ;;  %v3382_v20 = vsel %vm3298_vm0, %v3360_v59, 0.0  ;;  %v3384_v26 = vsel %vm3298_vm0, %v3361_v28, 0.0  ;;  %v9506_v3 = vsub.f32 %v9374_v12, %v9395_v30 }
 0x243   :  { %v3375_v6 = vadd.f32 %v3374_v56, %v3373_v33  ;;  %v3364_v31 = vmul.f32 %v9435_v38, %v9435_v38  ;;  %v3365_v49 = vmul.f32 %v9438_v21, %v9438_v21  ;;  %v3388_v55 = vsel %vm3298_vm0, %v3363_v19, 0.0 }
 0x244   :  { %v3386_v57 = vsel %vm3298_vm0, %v3362_v41, 0.0  ;;  %v3366_v12 = vmul.f32 %v9506_v3, %v9506_v3  ;;  %v3367_v39 = vmul.f32 %v9441_v22, %v9441_v22  ;;  %v3368_v37 = vmul.f32 %v9444_v60, %v9444_v60 }
 0x245   :  { %v3377_v24 = vadd.f32 %v3376_v44, %v3375_v6  ;;  %v3390_v30 = vsel %vm3298_vm0, %v3364_v31, 0.0  ;;  %v3392_v13 = vsel %vm3298_vm0, %v3365_v49, 0.0  ;;  %v9532_v44 = vld [vmem:[#allocation3] sm:$0xf]  ;;  %v9540_v41 = vshrl.u32 %v3412_v52, 7 }
 0x246   :  { %v3394_v15 = vsel %vm3298_vm0, %v3366_v12, 0.0  ;;  %v3396_v14 = vsel %vm3298_vm0, %v3367_v39, 0.0  ;;  %v3398_v42 = vsel %vm3298_vm0, %v3368_v37, 0.0  ;;  %v3950_v59 = vshll.u32 %v9532_v44, 16  ;;  %v3407_v49 = vld [vmem:[%s11017_s3] sm:$0x1] }
 0x247   :  { %v3379_v43 = vadd.f32 %v3378_v61, %v3377_v24  ;;  %v3947_v24 = vshrl.u32 %v9532_v44, 16  ;;  %v4059_v61 = vshrl.u32 %v9534_v34, 16  ;;  %11107 = vst [vmem:[#allocation7_spill] sm:$0xff] %v9540_v41 }
 0x249   :  { %v3381_v23 = vadd.f32 %v3380_v1, %v3379_v43  ;;  %v4062_v43 = vshll.u32 %v9534_v34, 16  ;;  %v3949_v28 = vrot.slane %v3947_v24, 4  ;;  %v3952_v1 = vrot.slane %v3950_v59, 5 }
 0x24a   :  { %v4061_v5 = vrot.slane %v4059_v61, 4 }
 0x24b   :  { %v3383_v8 = vadd.f32 %v3382_v20, %v3381_v23  ;;  %v4064_v23 = vrot.slane %v4062_v43, 5  ;;  %v3930_v20 = vld [vmem:[#allocation3 + $0x4] sm:$0x1]  ;;  %v3953_v19 = vor.u32 %v3952_v1, %v3949_v28  ;;  %v7009_v28 = vld [vmem:[%s11018_s4] ss:$0 sm:$0xff] }
 0x24d   :  { %v3385_v48 = vadd.f32 %v3384_v26, %v3383_v8  ;;  %v3938_v8 = vld [vmem:[#allocation3 + $0x54] sm:$0x1]  ;;  %v3956_v26 = vshll.u32 %v3930_v20, 16 }
 0x24e   :  { %v4068_v31 = vshll.u32 %v3938_v8, 16 }
 0x24f   :  { %v3387_v9 = vadd.f32 %v3386_v57, %v3385_v48  ;;  %v4065_v48 = vor.u32 %v4064_v23, %v4061_v5  ;;  %v4485_v57 = vld [vmem:[#allocation3] sm:$0xe]  ;;  %v9548_v12 = vrot.slane %v3956_v26, 5 }
 0x251   :  { %v3389_v51 = vadd.f32 %v3388_v55, %v3387_v9  ;;  %v4493_v9 = vld [vmem:[#allocation3 + $0x50] sm:$0xe]  ;;  %v11029_v55 = vsub.s32 0, %v9540_v41  ;;  %v3856_v41 = vld [vmem:[#allocation3 + $0x3c] sm:$0x1] }
 0x252   :  { %v7067_v37 = vrot.slane %v4493_v9, 9 }
 0x253   :  { %v3391_v0 = vadd.f32 %v3390_v30, %v3389_v51  ;;  %v9546_v51 = vrot.slane %v3953_v19, 4  ;;  %v9550_v30 = vrot.slane %v4065_v48, 4 }
 0x255   :  { %v3393_v45 = vadd.f32 %v3392_v13, %v3391_v0  ;;  %11108 = vst [vmem:[#allocation12_spill] sm:$0xff] %v9550_v30  ;;  %v9552_v0 = vrot.slane %v4068_v31, 5  ;;  %v7059_v13 = vrot.slane %v4485_v57, 9 }
 0x257   :  { %v3395_v27 = vadd.f32 %v3394_v15, %v3393_v45  ;;  %11109 = vst [vmem:[#allocation8_spill] sm:$0xff] %v9552_v0  ;;  %v4535_v45 = vrot.slane %v3930_v20, 5  ;;  %v4567_v15 = vrot.slane %v3938_v8, 5 }
 0x259   :  { %v3397_v33 = vadd.f32 %v3396_v14, %v3395_v27  ;;  %v9557_v14 = vld [vmem:[%s11016_s5 + $0x10] sm:$0xf] }
 0x25b   :  { %v3399_v4 = vadd.f32 %v3398_v42, %v3397_v33 }
 0x25d   :  { %v3400_v16 = vrot.slane %v3399_v4, 4 }
 0x25f   :  { %v3401_v56 = vadd.f32 %v3400_v16, %v3399_v4  ;;  %v9567_v16 = vsel %vm4220_vm2, %v9463_v53, 0  ;;  %v9587_v53 = vsel %vm8197_vm12, %v7067_v37, %v4567_v15 }
 0x260   :  { %11114 = vst [vmem:[#allocation10_spill] sm:$0xff] %v9587_v53 }
 0x261   :  { %v3402_v6 = vrot.slane %v3401_v56, 2 }
 0x263   :  { %v3403_v54 = vadd.f32 %v3402_v6, %v3401_v56  ;;  %v9571_v56 = vsel %vm4220_vm2, %v9517_v25, 0 }
 0x265   :  { %v3404_v47 = vrot.slane %v3403_v54, 1 }
 0x267   :  { %v3405_v63 = vadd.f32 %v3404_v47, %v3403_v54  ;;  %v9579_v47 = vsel %vm8197_vm12, %v7059_v13, %v4535_v45  ;;  %v3868_v54 = vld [vmem:[#allocation3 + $0x5c] sm:$0x1] }
 0x268   :  { %11112 = vst [vmem:[#allocation21_spill] sm:$0xff] %v9579_v47 }
 0x269   :  { %v3406_v50 = vmul.f32 0.0078125, %v3405_v63  ;;  %v9583_v63 = vsel %vm4220_vm2, %v9557_v14, 0 }
 0x26a   :  { %11113 = vst [vmem:[#allocation9_spill] sm:$0xff] %v9583_v63  ;;  %v3862_v63 = vld [vmem:[#allocation3 + $0x44] sm:$0x1] }
 0x26b   :  { %v3408_v7 = vadd.f32 1e-05, %v3406_v50 }
 0x26d   :  { %7844 = vrsqrt.f32 %v3408_v7 }
 0x27a   :  { %v7845_v39 = vpop.eup %7844 }
 0x27b   :  { %v3410_v27 = vmul.f32 %v7845_v39, %v3407_v49 }
 0x27d   :  { %v3415_v33 = vrot.slane %v3410_v27, %v11029_v55  ;;  %v3823_v55 = vld [vmem:[#allocation3 + $0x10] sm:$0xf] }
 0x27f   :  { %v3417_v25 = vmul.f32 %v3415_v33, %v9399_v36  ;;  %v3418_v50 = vmul.f32 %v3415_v33, %v9403_v62  ;;  %v3419_v7 = vmul.f32 %v3415_v33, %v9407_v29  ;;  %v3420_v24 = vmul.f32 %v3415_v33, %v9411_v11 }
 0x280   :  { %v3421_v59 = vmul.f32 %v3415_v33, %v9415_v46  ;;  %v3422_v61 = vmul.f32 %v3415_v33, %v9454_v10  ;;  %v3423_v43 = vmul.f32 %v3415_v33, %v9419_v32  ;;  %v3424_v52 = vmul.f32 %v3415_v33, %v9423_v58 }
 0x281   :  { %v3425_v36 = vmul.f32 %v3415_v33, %v9427_v18  ;;  %v3426_v62 = vmul.f32 %v3415_v33, %v9488_v40  ;;  %v3427_v29 = vmul.f32 %v3415_v33, %v9431_v35  ;;  %v3428_v11 = vmul.f32 %v3415_v33, %v9435_v38 }
 0x282   :  { %v3429_v46 = vmul.f32 %v3415_v33, %v9438_v21  ;;  %v3430_v10 = vmul.f32 %v3415_v33, %v9506_v3  ;;  %v3431_v32 = vmul.f32 %v3415_v33, %v9441_v22  ;;  %v3432_v58 = vmul.f32 %v3415_v33, %v9444_v60 }
 0x283   :  { %v3440_v1 = vadd.f32 %v7009_v28, %v3417_v25  ;;  %v3441_v5 = vadd.f32 %v7009_v28, %v3418_v50  ;;  %v3442_v23 = vadd.f32 %v7009_v28, %v3419_v7  ;;  %v3443_v20 = vadd.f32 %v7009_v28, %v3420_v24 }
 0x284   :  { %v3444_v8 = vadd.f32 %v7009_v28, %v3421_v59  ;;  %v3445_v18 = vadd.f32 %v7009_v28, %v3422_v61  ;;  %v3446_v19 = vadd.f32 %v7009_v28, %v3423_v43  ;;  %v3447_v40 = vadd.f32 %v7009_v28, %v3424_v52 }
 0x285   :  { %v3448_v26 = vadd.f32 %v7009_v28, %v3425_v36  ;;  %v3449_v35 = vadd.f32 %v7009_v28, %v3426_v62  ;;  %v3450_v48 = vadd.f32 %v7009_v28, %v3427_v29  ;;  %v3451_v38 = vadd.f32 %v7009_v28, %v3428_v11 }
 0x286   :  { %v3452_v31 = vadd.f32 %v7009_v28, %v3429_v46  ;;  %v3453_v21 = vadd.f32 %v7009_v28, %v3430_v10  ;;  %v3454_v57 = vadd.f32 %v7009_v28, %v3431_v32  ;;  %v3455_v3 = vadd.f32 %v7009_v28, %v3432_v58 }
 0x287   :  { %v3456_v9 = vmax.f32 %v3440_v1, 0.0  ;;  %v3457_v22 = vmax.f32 %v3441_v5, 0.0  ;;  %v3458_v49 = vmax.f32 %v3442_v23, 0.0  ;;  %v3459_v60 = vmax.f32 %v3443_v20, 0.0 }
 0x288   :  { %v3460_v39 = vmax.f32 %v3444_v8, 0.0  ;;  %v3461_v13 = vmax.f32 %v3445_v18, 0.0  ;;  %v3462_v45 = vmax.f32 %v3446_v19, 0.0  ;;  %v3463_v37 = vmax.f32 %v3447_v40, 0.0 }
 0x289   :  { %v3464_v15 = vmax.f32 %v3448_v26, 0.0  ;;  %v3465_v27 = vmax.f32 %v3449_v35, 0.0  ;;  %v3466_v33 = vmax.f32 %v3450_v48, 0.0  ;;  %v3467_v25 = vmax.f32 %v3451_v38, 0.0 }
 0x28a   :  { %v3468_v50 = vmax.f32 %v3452_v31, 0.0  ;;  %v3469_v7 = vmax.f32 %v3453_v21, 0.0  ;;  %v3470_v24 = vmax.f32 %v3454_v57, 0.0  ;;  %v3471_v59 = vmax.f32 %v3455_v3, 0.0 }
 0x28b   :  { %v7244_v61 = vpack.c.bf16 %v3456_v9, %v3456_v9  ;;  %v7245_v43 = vpack.c.bf16 %v3457_v22, %v3457_v22  ;;  %v7246_v52 = vpack.c.bf16 %v3458_v49, %v3458_v49  ;;  %v7247_v28 = vpack.c.bf16 %v3459_v60, %v3459_v60 }
 0x28c   :  { %v7248_v36 = vpack.c.bf16 %v3460_v39, %v3460_v39  ;;  %v7249_v62 = vpack.c.bf16 %v3461_v13, %v3461_v13  ;;  %v7250_v29 = vpack.c.bf16 %v3462_v45, %v3462_v45  ;;  %v7251_v11 = vpack.c.bf16 %v3463_v37, %v3463_v37 }
 0x28d   :  { %v7252_v46 = vpack.c.bf16 %v3464_v15, %v3464_v15  ;;  %v9608_v10 = vpack.c.bf16 %v3465_v27, %v3465_v27  ;;  %v9610_v32 = vpack.c.bf16 %v3466_v33, %v3466_v33  ;;  %v9612_v58 = vpack.c.bf16 %v3467_v25, %v3467_v25  ;;  %v3865_v25 = vld [vmem:[#allocation3 + $0x58] sm:$0xf] }
 0x28e   :  { %v9614_v1 = vpack.c.bf16 %v3468_v50, %v3468_v50  ;;  %v9616_v5 = vpack.c.bf16 %v3469_v7, %v3469_v7  ;;  %v9618_v23 = vpack.c.bf16 %v3470_v24, %v3470_v24  ;;  %v9620_v20 = vpack.c.bf16 %v3471_v59, %v3471_v59 }
 0x28f   :  { %v3655_v8 = vshrl.u32 %v7244_v61, 16  ;;  %v3658_v18 = vshll.u32 %v7244_v61, 16  ;;  %v3663_v19 = vshrl.u32 %v7245_v43, 16  ;;  %v3666_v40 = vshll.u32 %v7245_v43, 16 }
 0x290   :  { %v3671_v26 = vshrl.u32 %v7246_v52, 16  ;;  %v3674_v35 = vshll.u32 %v7246_v52, 16  ;;  %v3679_v48 = vshrl.u32 %v7247_v28, 16  ;;  %v3682_v38 = vshll.u32 %v7247_v28, 16 }
 0x291   :  { %v9622_v31 = vrot.slane %v3655_v8, 7  ;;  %v9624_v21 = vrot.slane %v3663_v19, 7  ;;  %v3687_v57 = vshrl.u32 %v7248_v36, 16  ;;  %v3690_v3 = vshll.u32 %v7248_v36, 16 }
 0x292   :  { %v9626_v9 = vrot.slane %v3671_v26, 7  ;;  %v9628_v22 = vrot.slane %v3679_v48, 7  ;;  %v3695_v49 = vshrl.u32 %v7249_v62, 16  ;;  %v3698_v60 = vshll.u32 %v7249_v62, 16 }
 0x293   :  { %v9631_v39 = vor.u32 %v3658_v18, %v9622_v31  ;;  %v9635_v45 = vor.u32 %v3666_v40, %v9624_v21  ;;  %v9646_v50 = vrot.slane %v3687_v57, 7  ;;  %v3703_v24 = vshrl.u32 %v7250_v29, 16  ;;  %v3847_v57 = vld [vmem:[#allocation3 + $0x30] sm:$0xf]  ;;  %v3850_v18 = vld [vmem:[#allocation3 + $0x34] sm:$0x1] }
 0x294   :  { %v9639_v15 = vor.u32 %v3674_v35, %v9626_v9  ;;  %v9643_v33 = vor.u32 %v3682_v38, %v9628_v22  ;;  %v9648_v7 = vrot.slane %v3695_v49, 7  ;;  %v3706_v59 = vshll.u32 %v7250_v29, 16 }
 0x295   :  { %v3711_v61 = vshrl.u32 %v7251_v11, 16  ;;  %v3714_v43 = vshll.u32 %v7251_v11, 16  ;;  %v3719_v52 = vshrl.u32 %v7252_v46, 16  ;;  %v3722_v28 = vshll.u32 %v7252_v46, 16 }
 0x296   :  { %v9651_v36 = vor.u32 %v3690_v3, %v9646_v50  ;;  %v9655_v8 = vor.u32 %v3698_v60, %v9648_v7  ;;  %v9658_v19 = vrot.slane %v3703_v24, 7  ;;  %v3727_v29 = vshrl.u32 %v9608_v10, 16 }
 0x297   :  { %v9660_v40 = vrot.slane %v3711_v61, 7  ;;  %v9662_v26 = vrot.slane %v3719_v52, 7  ;;  %v3730_v11 = vshll.u32 %v9608_v10, 16  ;;  %v3735_v46 = vshrl.u32 %v9610_v32, 16 }
 0x298   :  { %v3738_v35 = vshll.u32 %v9610_v32, 16  ;;  %v3743_v48 = vshrl.u32 %v9612_v58, 16  ;;  %v9670_v38 = vor.u32 %v3706_v59, %v9658_v19  ;;  %v9681_v24 = vrot.slane %v3727_v29, 7 }
 0x299   :  { %v9674_v3 = vor.u32 %v3714_v43, %v9660_v40  ;;  %v9678_v60 = vor.u32 %v3722_v28, %v9662_v26  ;;  %v9683_v32 = vrot.slane %v3735_v46, 7  ;;  %v3746_v59 = vshll.u32 %v9612_v58, 16  ;;  %v3826_v46 = vld [vmem:[#allocation3 + $0x14] sm:$0x1]  ;;  %v3838_v58 = vld [vmem:[#allocation3 + $0x24] sm:$0x1] }
 0x29a   :  { %v9685_v61 = vrot.slane %v3743_v48, 7  ;;  %v3751_v52 = vshrl.u32 %v9614_v1, 16  ;;  %v3754_v43 = vshll.u32 %v9614_v1, 16  ;;  %v9691_v6 = vor.u32 %v3730_v11, %v9681_v24  ;;  %v3829_v48 = vld [vmem:[#allocation3 + $0x18] sm:$0xf] }
 0x29b   :  { %v9695_v4 = vor.u32 %v3738_v35, %v9683_v32  ;;  %v3759_v1 = vshrl.u32 %v9616_v5, 16  ;;  %v3832_v35 = vld [vmem:[#allocation3 + $0x1c] sm:$0x1]  ;;  %v3762_v29 = vshll.u32 %v9616_v5, 16  ;;  %v3767_v28 = vshrl.u32 %v9618_v23, 16 }
 0x29c   :  { %v9699_v13 = vor.u32 %v3746_v59, %v9685_v61  ;;  %v9702_v10 = vrot.slane %v3751_v52, 7  ;;  %v3770_v59 = vshll.u32 %v9618_v23, 16  ;;  %v3775_v49 = vshrl.u32 %v9620_v20, 16  ;;  %v3844_v52 = vld [vmem:[#allocation3 + $0x2c] sm:$0x1] }
 0x29d   :  { %v9719_v27 = vrot.slane %v3759_v1, 7  ;;  %v3778_v37 = vshll.u32 %v9620_v20, 16  ;;  %v3853_v5 = vld [vmem:[#allocation3 + $0x38] sm:$0xf]  ;;  %v9722_v23 = vrot.slane %v3767_v28, 7  ;;  %v3824_v47 = vsel %vm9707_vm6, %v9635_v45, %v3823_v55 }
 0x29e   :  { %v9716_v62 = vor.u32 %v3754_v43, %v9702_v10  ;;  %v9724_v53 = vrot.slane %v3775_v49, 7  ;;  %v11117_v43 = vrot.slane %v9624_v21, 4  ;;  %v3871_v20 = vld [vmem:[#allocation3 + $0x60] sm:$0xf]  ;;  %v3830_v49 = vsel %vm9707_vm6, %v9639_v15, %v3829_v48  ;;  %v3874_v21 = vld [vmem:[#allocation3 + $0x64] sm:$0x1] }
 0x29f   :  { %v9734_v0 = vor.u32 %v3762_v29, %v9719_v27  ;;  %v3765_v28 = vrot.slane %v9719_v27, 4  ;;  %v11118_v30 = vrot.slane %v9626_v9, 4  ;;  %v3877_v45 = vld [vmem:[#allocation3 + $0x68] sm:$0xf]  ;;  %3825 = vst [vmem:[#allocation3 + $0x10] sm:$0xf] %v3824_v47 }
 0x2a0   :  { %v3827_v1 = vsel %vm9240_vm5, %v11117_v43, %v3826_v46  ;;  %v9745_v46 = vor.u32 %v3770_v59, %v9722_v23  ;;  %v3773_v29 = vrot.slane %v9722_v23, 4  ;;  %v9749_v27 = vor.u32 %v3778_v37, %v9724_v53  ;;  %v3880_v15 = vld [vmem:[#allocation3 + $0x6c] sm:$0x1]  ;;  %v3883_v9 = vld [vmem:[#allocation3 + $0x70] sm:$0xf] }
 0x2a1   :  { %v3833_v55 = vsel %vm9240_vm5, %v11118_v30, %v3832_v35  ;;  %3828 = vst [vmem:[#allocation3 + $0x14] sm:$0x1] %v3827_v1  ;;  %v3781_v43 = vrot.slane %v9724_v53, 4  ;;  %3831 = vst [vmem:[#allocation3 + $0x18] sm:$0xf] %v3830_v49  ;;  %v11119_v30 = vrot.slane %v9628_v22, 4  ;;  %v3848_v37 = vsel %vm9707_vm6, %v9655_v8, %v3847_v57 }
 0x2a2   :  { %3834 = vst [vmem:[#allocation3 + $0x1c] sm:$0x1] %v3833_v55  ;;  %v11120_v48 = vrot.slane %v9646_v50, 4  ;;  %v11121_v53 = vrot.slane %v9648_v7, 4  ;;  %v3886_v23 = vld [vmem:[#allocation3 + $0x74] sm:$0x1]  ;;  %v3860_v8 = vsel %vm9707_vm6, %v9674_v3, %v3859_v17 }
 0x2a3   :  { %v3839_v47 = vsel %vm9240_vm5, %v11119_v30, %v3838_v58  ;;  %v3889_v1 = vld [vmem:[#allocation3 + $0x78] sm:$0xf]  ;;  %v3892_v22 = vld [vmem:[#allocation3 + $0x7c] sm:$0x1]  ;;  %v3854_v58 = vsel %vm9707_vm6, %v9670_v38, %v3853_v5  ;;  %v11122_v50 = vrot.slane %v9658_v19, 4  ;;  %v11123_v7 = vrot.slane %v9660_v40, 4 }
 0x2a4   :  { %v3845_v35 = vsel %vm9240_vm5, %v11120_v48, %v3844_v52  ;;  %v3851_v59 = vsel %vm9240_vm5, %v11121_v53, %v3850_v18  ;;  %v3895_v57 = vld [vmem:[#allocation3 + $0x80] sm:$0xf]  ;;  %v3898_v49 = vld [vmem:[#allocation3 + $0x84] sm:$0x1]  ;;  %v3901_v55 = vld [vmem:[#allocation3 + $0x88] sm:$0xf] }
 0x2a5   :  { %v3857_v52 = vsel %vm9240_vm5, %v11122_v50, %v3856_v41  ;;  %v3863_v18 = vsel %vm9240_vm5, %v11123_v7, %v3862_v63  ;;  %3840 = vst [vmem:[#allocation3 + $0x24] sm:$0x1] %v3839_v47  ;;  %3846 = vst [vmem:[#allocation3 + $0x2c] sm:$0x1] %v3845_v35  ;;  %v3866_v41 = vsel %vm9707_vm6, %v9678_v60, %v3865_v25  ;;  %v11124_v19 = vrot.slane %v9662_v26, 4 }
 0x2a6   :  { %3849 = vst [vmem:[#allocation3 + $0x30] sm:$0xf] %v3848_v37  ;;  %3852 = vst [vmem:[#allocation3 + $0x34] sm:$0x1] %v3851_v59  ;;  %v3872_v63 = vsel %vm9707_vm6, %v9691_v6, %v3871_v20  ;;  %v11125_v40 = vrot.slane %v9681_v24, 4  ;;  %v11126_v6 = vrot.slane %v9683_v32, 4  ;;  %v3884_v26 = vsel %vm9707_vm6, %v9699_v13, %v3883_v9 }
 0x2a7   :  { %3864 = vst [vmem:[#allocation3 + $0x44] sm:$0x1] %v3863_v18  ;;  %v3869_v17 = vsel %vm9240_vm5, %v11124_v19, %v3868_v54  ;;  %v3904_v3 = vld [vmem:[#allocation3 + $0x8c] sm:$0x1]  ;;  %v3907_v5 = vld [vmem:[#allocation3 + $0x90] sm:$0xf]  ;;  %v3878_v54 = vsel %vm9707_vm6, %v9695_v4, %v3877_v45  ;;  %v3890_v4 = vsel %vm9707_vm6, %v9716_v62, %v3889_v1  ;;  %v3899_v45 = vsel %vm9240_vm5, %v3765_v28, %v3898_v49 }
 0x2a8   :  { %v3875_v38 = vsel %vm9240_vm5, %v11125_v40, %v3874_v21  ;;  %v3910_v30 = vld [vmem:[#allocation3 + $0x94] sm:$0x1]  ;;  %3855 = vst [vmem:[#allocation3 + $0x38] sm:$0xf] %v3854_v58  ;;  %3858 = vst [vmem:[#allocation3 + $0x3c] sm:$0x1] %v3857_v52  ;;  %v3881_v25 = vsel %vm9240_vm5, %v11126_v6, %v3880_v15  ;;  %v3902_v62 = vsel %vm9707_vm6, %v9745_v46, %v3901_v55 }
 0x2a9   :  { %3861 = vst [vmem:[#allocation3 + $0x40] sm:$0xf] %v3860_v8  ;;  %3870 = vst [vmem:[#allocation3 + $0x5c] sm:$0x1] %v3869_v17  ;;  %v11127_v60 = vrot.slane %v9685_v61, 4  ;;  %v11128_v32 = vrot.slane %v9702_v10, 4  ;;  %v3896_v61 = vsel %vm9707_vm6, %v9734_v0, %v3895_v57  ;;  %v3905_v10 = vsel %vm9240_vm5, %v3773_v29, %v3904_v3 }
 0x2aa   :  { %3873 = vst [vmem:[#allocation3 + $0x60] sm:$0xf] %v3872_v63  ;;  %3876 = vst [vmem:[#allocation3 + $0x64] sm:$0x1] %v3875_v38  ;;  %v3817_v20 = vld [vmem:[#allocation3 + $0x8] sm:$0xf]  ;;  %v3908_v0 = vsel %vm9707_vm6, %v9749_v27, %v3907_v5  ;;  %v3911_v28 = vsel %vm9240_vm5, %v3781_v43, %v3910_v30 }
 0x2ab   :  { %v3887_v24 = vsel %vm9240_vm5, %v11127_v60, %v3886_v23  ;;  %3867 = vst [vmem:[#allocation3 + $0x58] sm:$0xf] %v3866_v41  ;;  %v3835_v21 = vld [vmem:[#allocation3 + $0x20] sm:$0xf]  ;;  %3879 = vst [vmem:[#allocation3 + $0x68] sm:$0xf] %v3878_v54  ;;  %v3893_v13 = vsel %vm9240_vm5, %v11128_v32, %v3892_v22  ;;  %v3818_v46 = vsel %vm9707_vm6, %v9631_v39, %v3817_v20 }
 0x2ac   :  { %3882 = vst [vmem:[#allocation3 + $0x6c] sm:$0x1] %v3881_v25  ;;  %3885 = vst [vmem:[#allocation3 + $0x70] sm:$0xf] %v3884_v26  ;;  %v3841_v15 = vld [vmem:[#allocation3 + $0x28] sm:$0xf]  ;;  %v3836_v43 = vsel %vm9707_vm6, %v9643_v33, %v3835_v21 }
 0x2ad   :  { %3888 = vst [vmem:[#allocation3 + $0x74] sm:$0x1] %v3887_v24  ;;  %v3820_v9 = vld [vmem:[#allocation3 + $0xc] sm:$0x1]  ;;  %3891 = vst [vmem:[#allocation3 + $0x78] sm:$0xf] %v3890_v4  ;;  %v3842_v39 = vsel %vm9707_vm6, %v9651_v36, %v3841_v15 }
 0x2ae   :  { %3894 = vst [vmem:[#allocation3 + $0x7c] sm:$0x1] %v3893_v13  ;;  %3897 = vst [vmem:[#allocation3 + $0x80] sm:$0xf] %v3896_v61  ;;  %v9831_v47 = vld [vmem:[#allocation3 + $0x10] sm:$0xf] }
 0x2af   :  { %3900 = vst [vmem:[#allocation3 + $0x84] sm:$0x1] %v3899_v45  ;;  %v9833_v48 = vld [vmem:[#allocation3 + $0x14] sm:$0x1]  ;;  %3903 = vst [vmem:[#allocation3 + $0x88] sm:$0xf] %v3902_v62 }
 0x2b0   :  { %3906 = vst [vmem:[#allocation3 + $0x8c] sm:$0x1] %v3905_v10  ;;  %3909 = vst [vmem:[#allocation3 + $0x90] sm:$0xf] %v3908_v0  ;;  %v9838_v29 = vld [vmem:[#allocation3 + $0x18] sm:$0xf] }
 0x2b1   :  { %3912 = vst [vmem:[#allocation3 + $0x94] sm:$0x1] %v3911_v28  ;;  %v3975_v35 = vshrl.u32 %v9831_v47, 16  ;;  %v3978_v27 = vshll.u32 %v9831_v47, 16  ;;  %3819 = vst [vmem:[#allocation3 + $0x8] sm:$0xf] %v3818_v46  ;;  %v7044_v59 = vcombine.low %v9831_v47, %v9838_v29 }
 0x2b2   :  { %v3989_v37 = vshrl.u32 %v9838_v29, 16  ;;  %v3992_v53 = vshll.u32 %v9838_v29, 16  ;;  %3837 = vst [vmem:[#allocation3 + $0x20] sm:$0xf] %v3836_v43  ;;  %v9852_v23 = vld [vmem:[#allocation3 + $0x1c] sm:$0x1] }
 0x2b3   :  { %v3977_v1 = vrot.slane %v3975_v35, 4  ;;  %v3980_v22 = vrot.slane %v3978_v27, 5  ;;  %3843 = vst [vmem:[#allocation3 + $0x28] sm:$0xf] %v3842_v39  ;;  %v11129_v33 = vrot.slane %v9622_v31, 4  ;;  %v3984_v52 = vshll.u32 %v9833_v48, 16 }
 0x2b4   :  { %v9858_v50 = vld [vmem:[#allocation3 + $0x30] sm:$0xf]  ;;  %v3991_v8 = vrot.slane %v3989_v37, 4  ;;  %v3994_v7 = vrot.slane %v3992_v53, 5  ;;  %v9861_v18 = vld [vmem:[#allocation3 + $0x38] sm:$0xf] }
 0x2b5   :  { %v3821_v58 = vsel %vm9240_vm5, %v11129_v33, %v3820_v9  ;;  %v4031_v36 = vshrl.u32 %v9858_v50, 16  ;;  %v4034_v11 = vshll.u32 %v9858_v50, 16  ;;  %v4045_v57 = vshrl.u32 %v9861_v18, 16  ;;  %v9869_v41 = vld [vmem:[#allocation3 + $0x58] sm:$0xf] }
 0x2b6   :  { %3822 = vst [vmem:[#allocation3 + $0xc] sm:$0x1] %v3821_v58  ;;  %v4048_v31 = vshll.u32 %v9861_v18, 16  ;;  %v7046_v49 = vcombine.low %v9858_v50, %v9861_v18  ;;  %v3981_v55 = vor.u32 %v3980_v22, %v3977_v1  ;;  %v3986_v63 = vrot.slane %v3984_v52, 5  ;;  %v9875_v38 = vld [vmem:[#allocation3 + $0x24] sm:$0x1] }
 0x2b7   :  { %v9871_v19 = vrot.slane %v4031_v36, 4  ;;  %v9873_v17 = vrot.slane %v4034_v11, 5  ;;  %v3995_v40 = vor.u32 %v3994_v7, %v3991_v8  ;;  %v9877_v3 = vrot.slane %v4045_v57, 4  ;;  %v9882_v6 = vld [vmem:[#allocation3 + $0x60] sm:$0xf] }
 0x2b8   :  { %v9879_v5 = vrot.slane %v4048_v31, 5  ;;  %v3982_v30 = vrot.slane %v3981_v55, 4  ;;  %v3998_v54 = vshll.u32 %v9852_v23, 16  ;;  %v4073_v26 = vshrl.u32 %v9869_v41, 16  ;;  %v9888_v20 = vld [vmem:[#allocation3 + $0x68] sm:$0xf] }
 0x2b9   :  { %v3996_v25 = vrot.slane %v3995_v40, 4  ;;  %v4076_v60 = vshll.u32 %v9869_v41, 16  ;;  %v7047_v24 = vcombine.low %v9534_v34, %v9869_v41  ;;  %v3914_v21 = vld [vmem:[#allocation3 + $0x8] sm:$0xf]  ;;  %v3917_v4 = vld [vmem:[#allocation3 + $0x20] sm:$0xf]  ;;  %v7048_v45 = vcombine.low %v9882_v6, %v9888_v20 }
 0x2ba   :  { %v3987_v32 = vsel %vm8201_vm13, %v3982_v30, %v3986_v63  ;;  %v4000_v13 = vrot.slane %v3998_v54, 5  ;;  %v4012_v61 = vshll.u32 %v9875_v38, 16  ;;  %v3961_v15 = vshrl.u32 %v3914_v21, 16  ;;  %v3918_v10 = vld [vmem:[#allocation3 + $0x28] sm:$0xf] }
 0x2bb   :  { %v3964_v9 = vshll.u32 %v3914_v21, 16  ;;  %v7043_v62 = vcombine.low %v9532_v44, %v3914_v21  ;;  %v4003_v0 = vshrl.u32 %v3917_v4, 16  ;;  %v4006_v28 = vshll.u32 %v3917_v4, 16  ;;  %v9903_v39 = vld [vmem:[%s11016_s5 + $0x14] sm:$0xf] }
 0x2bc   :  { %v4017_v47 = vshrl.u32 %v3918_v10, 16  ;;  %v4020_v46 = vshll.u32 %v3918_v10, 16  ;;  %v7045_v29 = vcombine.low %v3917_v4, %v3918_v10  ;;  %v3963_v27 = vrot.slane %v3961_v15, 4  ;;  %v9908_v58 = vld [vmem:[#allocation3 + $0x2c] sm:$0x1] }
 0x2bd   :  { %v9896_v35 = vld [vmem:[#allocation3 + $0xc] sm:$0x1]  ;;  %v3966_v43 = vrot.slane %v3964_v9, 5  ;;  %7604 = vmatprep.mubr.msk.bf16.mxu0 %vm3298_vm0, %v7043_v62  ;;  %v4005_v37 = vrot.slane %v4003_v0, 4  ;;  %v4008_v44 = vrot.slane %v4006_v28, 5  ;;  %v4001_v33 = vsel %vm8201_vm13, %v3996_v25, %v4000_v13 }
 0x2be   :  { %v3970_v53 = vshll.u32 %v9896_v35, 16  ;;  %7605 = vmatmul.mubr.msk.bf16.vlgmr.msra.gmra.mxu0 %vm3298_vm0, %v7044_v59  ;;  %v4019_v1 = vrot.slane %v4017_v47, 4  ;;  %v4022_v22 = vrot.slane %v4020_v46, 5  ;;  %v7028_v7 = vcombine.low %v3987_v32, %v4001_v33  ;;  %v9919_v54 = vld [vmem:[#allocation3 + $0x34] sm:$0x1] }
 0x2bf   :  { %7608 = vmatprep.mubr.msk.bf16.mxu0 %vm3298_vm0, %v7045_v29  ;;  %v3967_v52 = vor.u32 %v3966_v43, %v3963_v27  ;;  %v9911_v36 = vrot.slane %v4073_v26, 4  ;;  %7639 = vmatpush3.bf16.msra.mxu0 %v9571_v56  ;;  %v4078_v11 = vrot.slane %v4076_v60, 5  ;;  %v4009_v57 = vor.u32 %v4008_v44, %v4005_v37  ;;  %v9923_v21 = vld [vmem:[#allocation3 + $0x3c] sm:$0x1]  ;;  %v9931_v15 = vld [vmem:[#allocation3 + $0x70] sm:$0xf] }
 0x2c0   :  { %v3972_v8 = vrot.slane %v3970_v53, 5  ;;  %v4014_v59 = vrot.slane %v4012_v61, 5  ;;  %v4023_v31 = vor.u32 %v4022_v22, %v4019_v1  ;;  %7760 = vmatprep.subr.msk.bf16.mxu0 %vm4220_vm2, %v9903_v39  ;;  %v4026_v63 = vshll.u32 %v9908_v58, 16  ;;  %v3926_v47 = vld [vmem:[#allocation3 + $0x78] sm:$0xf] }
 0x2c1   :  { %v3968_v55 = vrot.slane %v3967_v52, 4  ;;  %v4087_v40 = vshrl.u32 %v9882_v6, 16  ;;  %v4090_v30 = vshll.u32 %v9882_v6, 16  ;;  %v4010_v25 = vrot.slane %v4009_v57, 4  ;;  %v9966_v18 = vld [vmem:[#allocation3 + $0x80] sm:$0xf] }
 0x2c2   :  { %v4024_v26 = vrot.slane %v4023_v31, 4  ;;  %v4101_v56 = vshrl.u32 %v9888_v20, 16  ;;  %v4104_v60 = vshll.u32 %v9888_v20, 16  ;;  %v4028_v32 = vrot.slane %v4026_v63, 5  ;;  %v9970_v33 = vld [vmem:[#allocation3 + $0x88] sm:$0xf] }
 0x2c3   :  { %v3973_v4 = vsel %vm8201_vm13, %v3968_v55, %v3972_v8  ;;  %v9927_v13 = vrot.slane %v4087_v40, 4  ;;  %v9929_v61 = vrot.slane %v4090_v30, 5  ;;  %v11130_v9 = vsel %vm8201_vm13, %v9546_v51, %v9548_v12  ;;  %v9951_v12 = vld [vmem:[#allocation3 + $0x5c] sm:$0x1]  ;;  %v9976_v8 = vld [vmem:[#allocation3 + $0x64] sm:$0x1] }
 0x2c4   :  { %v7027_v62 = vcombine.low %v11130_v9, %v3973_v4  ;;  %v4015_v10 = vsel %vm8201_vm13, %v4010_v25, %v4014_v59  ;;  %v9940_v0 = vrot.slane %v4101_v56, 4  ;;  %v9942_v28 = vrot.slane %v4104_v60, 5  ;;  %v11131_v6 = vld [vmem:[#allocation12_spill] sm:$0xff] }
 0x2c5   :  { %v4029_v46 = vsel %vm8201_vm13, %v4024_v26, %v4028_v32  ;;  %v4037_v29 = vor.u32 %v9873_v17, %v9871_v19  ;;  %v4040_v27 = vshll.u32 %v9919_v54, 16  ;;  %v4051_v51 = vor.u32 %v9879_v5, %v9877_v3  ;;  %v9991_v26 = vld [vmem:[#allocation3 + $0x74] sm:$0x1]  ;;  %v11132_v20 = vld [vmem:[#allocation8_spill] sm:$0xff] }
 0x2c6   :  { %7586 = vmatprep.mubr.msk.bf16.mxu1 %vm3298_vm0, %v7027_v62  ;;  %7609 = vmatmul.mubr.msk.bf16.gmra.mxu0 %vm3298_vm0, %v7046_v49  ;;  %v7029_v43 = vcombine.low %v4015_v10, %v4029_v46  ;;  %v4054_v37 = vshll.u32 %v9923_v21, 16  ;;  %v4115_v53 = vshrl.u32 %v9931_v15, 16  ;;  %v4118_v19 = vshll.u32 %v9931_v15, 16  ;;  %v6288_v42 = vld [vmem:[#allocation3 + $0x40] sm:$0xe] }
 0x2c7   :  { %7587 = vmatmul.mubr.msk.bf16.vlgmr.msra.gmra.mxu1 %vm3298_vm0, %v7028_v7  ;;  %7612 = vmatprep.mubr.msk.bf16.mxu0 %vm3298_vm0, %v7047_v24  ;;  %v4038_v17 = vrot.slane %v4037_v29, 4  ;;  %v4042_v3 = vrot.slane %v4040_v27, 5  ;;  %v4052_v5 = vrot.slane %v4051_v51, 4  ;;  %v4129_v50 = vshrl.u32 %v3926_v47, 16  ;;  %v10014_v27 = vld [vmem:[#allocation3 + $0x84] sm:$0x1] }
 0x2c8   :  { %7621 = vmatpush3.bf16.msra.mxu1 %v9567_v16  ;;  %7590 = vmatprep.mubr.msk.bf16.mxu1 %vm3298_vm0, %v7029_v43  ;;  %v4056_v49 = vrot.slane %v4054_v37, 5  ;;  %v4117_v44 = vrot.slane %v4115_v53, 4  ;;  %v4120_v1 = vrot.slane %v4118_v19, 5  ;;  %v4132_v22 = vshll.u32 %v3926_v47, 16  ;;  %v4487_v37 = vld [vmem:[#allocation3 + $0x10] sm:$0xe] }
 0x2c9   :  { %v4043_v34 = vsel %vm8201_vm13, %v4038_v17, %v4042_v3  ;;  %v4131_v41 = vrot.slane %v4129_v50, 4  ;;  %v7049_v24 = vcombine.low %v9931_v15, %v3926_v47  ;;  %v4079_v52 = vor.u32 %v4078_v11, %v9911_v36  ;;  %7759 = vmatprep.subr.msk.bf16.mxu1 %vm4220_vm2, %v9557_v14  ;;  %v9986_v36 = vld [vmem:[#allocation3 + $0x6c] sm:$0x1]  ;;  %v10005_v47 = vld [vmem:[#allocation3 + $0x7c] sm:$0x1] }
 0x2ca   :  { %v4057_v16 = vsel %vm8201_vm13, %v4052_v5, %v4056_v49  ;;  %v4134_v7 = vrot.slane %v4132_v22, 5  ;;  %v4082_v57 = vshll.u32 %v9951_v12, 16  ;;  %v4143_v59 = vshrl.u32 %v9966_v18, 16  ;;  %v10021_v3 = vld [vmem:[#allocation3 + $0x8c] sm:$0x1] }
 0x2cb   :  { %v7030_v31 = vcombine.low %v4043_v34, %v4057_v16  ;;  %v4080_v55 = vrot.slane %v4079_v52, 4  ;;  %v4146_v63 = vshll.u32 %v9966_v18, 16  ;;  %v4157_v40 = vshrl.u32 %v9970_v33, 16  ;;  %v4486_v50 = vld [vmem:[#allocation3 + $0x8] sm:$0xe] }
 0x2cc   :  { %v4084_v11 = vrot.slane %v4082_v57, 5  ;;  %v4145_v30 = vrot.slane %v4143_v59, 4  ;;  %v4160_v14 = vshll.u32 %v9970_v33, 16  ;;  %v7050_v25 = vcombine.low %v9966_v18, %v9970_v33  ;;  %v4488_v22 = vld [vmem:[#allocation3 + $0x18] sm:$0xe] }
 0x2cd   :  { %v4148_v56 = vrot.slane %v4146_v63, 5  ;;  %v4159_v60 = vrot.slane %v4157_v40, 4  ;;  %v4093_v4 = vor.u32 %v9929_v61, %v9927_v13  ;;  %v4096_v32 = vshll.u32 %v9976_v8, 16  ;;  %v7828_v34 = vld [vmem:[#allocation3 + $0x8] ss:$8 sps:$4 sm:$0xff]  }
 0x2ce   :  { %7613 = vmatmul.mubr.msk.bf16.gmra.mxu0 %vm3298_vm0, %v7048_v45  ;;  %v4085_v15 = vsel %vm8201_vm13, %v4080_v55, %v4084_v11  ;;  %v4162_v9 = vrot.slane %v4160_v14, 5  ;;  %v4107_v62 = vor.u32 %v9942_v28, %v9940_v0  ;;  %v4110_v10 = vshll.u32 %v9986_v36, 16 }
 0x2cf   :  { %7591 = vmatmul.mubr.msk.bf16.gmra.mxu1 %vm3298_vm0, %v7030_v31  ;;  %7616 = vmatprep.mubr.msk.bf16.mxu0 %vm3298_vm0, %v7049_v24  ;;  %v11133_v45 = vsel %vm8201_vm13, %v11131_v6, %v11132_v20  ;;  %v4094_v61 = vrot.slane %v4093_v4, 4  ;;  %v4098_v46 = vrot.slane %v4096_v32, 5  ;;  %v4121_v29 = vor.u32 %v4120_v1, %v4117_v44  ;;  %v4489_v31 = vld [vmem:[#allocation3 + $0x20] sm:$0xe]  ;;  %v4491_v32 = vld [vmem:[#allocation3 + $0x30] sm:$0xe] }
 0x2d0   :  { %v7031_v13 = vcombine.low %v11133_v45, %v4085_v15  ;;  %v4108_v0 = vrot.slane %v4107_v62, 4  ;;  %v4112_v28 = vrot.slane %v4110_v10, 5  ;;  %v4124_v51 = vshll.u32 %v9991_v26, 16  ;;  %v11135_v6 = vld [vmem:[#allocation21_spill] sm:$0xff]  ;;  %v4492_v45 = vld [vmem:[#allocation3 + $0x38] sm:$0xe] }
 0x2d1   :  { %v4135_v43 = vor.u32 %v4134_v7, %v4131_v41  ;;  %v4099_v53 = vsel %vm8201_vm13, %v4094_v61, %v4098_v46  ;;  %v4122_v19 = vrot.slane %v4121_v29, 4  ;;  %v4138_v17 = vshll.u32 %v10005_v47, 16 }
 0x2d2   :  { %7594 = vmatprep.mubr.msk.bf16.mxu1 %vm3298_vm0, %v7031_v13  ;;  %v4149_v5 = vor.u32 %v4148_v56, %v4145_v30  ;;  %v4113_v18 = vsel %vm8201_vm13, %v4108_v0, %v4112_v28  ;;  %v4126_v49 = vrot.slane %v4124_v51, 5  ;;  %v4152_v1 = vshll.u32 %v10014_v27, 16  ;;  %v4490_v30 = vld [vmem:[#allocation3 + $0x28] sm:$0xe]  ;;  %v4494_v13 = vld [vmem:[#allocation3 + $0x58] sm:$0xe] }
 0x2d3   :  { %v4136_v44 = vrot.slane %v4135_v43, 4  ;;  %v7032_v33 = vcombine.low %v4099_v53, %v4113_v18  ;;  %v4140_v41 = vrot.slane %v4138_v17, 5  ;;  %v4163_v52 = vor.u32 %v4162_v9, %v4159_v60  ;;  %v7829_v28 = vld [vmem:[#allocation3 + $0x18] ss:$8 sps:$4 sm:$0xff]   ;;  %v7830_v53 = vld [vmem:[#allocation3 + $0x28] ss:$8 sps:$4 sm:$0xff]  }
 0x2d4   :  { %v4150_v24 = vrot.slane %v4149_v5, 4  ;;  %v4127_v16 = vsel %vm8201_vm13, %v4122_v19, %v4126_v49  ;;  %v4154_v7 = vrot.slane %v4152_v1, 5  ;;  %v4166_v57 = vshll.u32 %v10021_v3, 16  ;;  %v10074_v1 = vld [vmem:[#allocation3 + $0xc] sm:$0x1] }
 0x2d5   :  { %v7060_v59 = vrot.slane %v4486_v50, 9  ;;  %v4141_v55 = vsel %vm8201_vm13, %v4136_v44, %v4140_v41  ;;  %v4164_v63 = vrot.slane %v4163_v52, 4  ;;  %v4539_v40 = vrot.slane %v9896_v35, 5 }
 0x2d6   :  { %v7061_v11 = vrot.slane %v4487_v37, 9  ;;  %7617 = vmatmul.mubr.msk.bf16.gmra.mxu0 %vm3298_vm0, %v7050_v25  ;;  %v7033_v14 = vcombine.low %v4127_v16, %v4141_v55  ;;  %v4155_v56 = vsel %vm8201_vm13, %v4150_v24, %v4154_v7  ;;  %v4168_v60 = vrot.slane %v4166_v57, 5  ;;  %v4495_v37 = vld [vmem:[#allocation3 + $0x60] sm:$0xe]  ;;  %v5384_v7 = vld [vmem:[#allocation3 + $0x10] sm:$0xe] }
 0x2d7   :  { %v4543_v4 = vrot.slane %v9833_v48, 5  ;;  %7595 = vmatmul.mubr.msk.bf16.gmra.mxu1 %vm3298_vm0, %v7032_v33  ;;  %7640 = vmatprep.mubr.msk.bf16.mxu0 %vm3298_vm0, %v7828_v34  ;;  %v4540_v9 = vsel %vm8197_vm12, %v7060_v59, %v4539_v40  ;;  %v7062_v35 = vrot.slane %v4488_v22, 9  ;;  %v4547_v62 = vrot.slane %v9852_v23, 5  ;;  %v10076_v22 = vld [vmem:[#allocation3 + $0x14] sm:$0x1] }
 0x2d8   :  { %v7063_v10 = vrot.slane %v4489_v31, 9  ;;  %7598 = vmatprep.mubr.msk.bf16.mxu1 %vm3298_vm0, %v7033_v14  ;;  %v4169_v25 = vsel %vm8201_vm13, %v4164_v63, %v4168_v60  ;;  %v7076_v20 = vcombine.low %v11135_v6, %v4540_v9  ;;  %v4551_v48 = vrot.slane %v9875_v38, 5  ;;  %v4497_v31 = vld [vmem:[#allocation3 + $0x70] sm:$0xe]  ;;  %v5385_v9 = vld [vmem:[#allocation3 + $0x18] sm:$0xe] }
 0x2d9   :  { %v5546_v61 = vsel %vm4220_vm2, %v9903_v39, 0  ;;  %v10050_v46 = vsel %vm8197_vm12, %v7061_v11, %v4543_v4  ;;  %v10054_v23 = vsel %vm8197_vm12, %v7062_v35, %v4547_v62  ;;  %v7064_v29 = vrot.slane %v4490_v30, 9  ;;  %v4498_v11 = vld [vmem:[#allocation3 + $0x78] sm:$0xe]  ;;  %v10107_v30 = vld [vmem:[#allocation3 + $0x1c] sm:$0x1] }
 0x2da   :  { %v4555_v0 = vrot.slane %v9908_v58, 5  ;;  %v7034_v51 = vcombine.low %v4155_v56, %v4169_v25  ;;  %v10059_v38 = vsel %vm8197_vm12, %v7063_v10, %v4551_v48  ;;  %v7065_v43 = vrot.slane %v4491_v32, 9  ;;  %v4496_v58 = vld [vmem:[#allocation3 + $0x68] sm:$0xe]  ;;  %v10119_v32 = vld [vmem:[#allocation3 + $0x24] sm:$0x1] }
 0x2db   :  { %v4559_v39 = vrot.slane %v9919_v54, 5  ;;  %v7066_v17 = vrot.slane %v4492_v45, 9  ;;  %v4563_v5 = vrot.slane %v9923_v21, 5  ;;  %v7068_v50 = vrot.slane %v4494_v13, 9  ;;  %v10081_v21 = vld [vmem:[%s11016_s5 + $0x1c] sm:$0xf] }
 0x2dc   :  { %v10064_v19 = vsel %vm8197_vm12, %v7064_v29, %v4555_v0  ;;  %v7077_v18 = vcombine.low %v10050_v46, %v10054_v23  ;;  %v4571_v54 = vrot.slane %v9951_v12, 5  ;;  %v7069_v44 = vrot.slane %v4495_v37, 9  ;;  %v5383_v12 = vld [vmem:[#allocation3 + $0x8] sm:$0xe]  ;;  %v5386_v25 = vld [vmem:[#allocation3 + $0x20] sm:$0xe] }
 0x2dd   :  { %v10071_v49 = vsel %vm8197_vm12, %v7065_v43, %v4559_v39  ;;  %v10085_v33 = vsel %vm8197_vm12, %v7066_v17, %v4563_v5  ;;  %v4575_v34 = vrot.slane %v9976_v8, 5  ;;  %v7070_v41 = vrot.slane %v4496_v58, 9  ;;  %v4499_v29 = vld [vmem:[#allocation3 + $0x80] sm:$0xe]  ;;  %v10141_v39 = vld [vmem:[#allocation3 + $0x2c] sm:$0x1] }
 0x2de   :  { %v4579_v24 = vrot.slane %v9986_v36, 5  ;;  %7641 = vmatmul.mubr.msk.bf16.vlgmr.msra.gmra.mxu0 %vm3298_vm0, %v7829_v28  ;;  %v7078_v52 = vcombine.low %v10059_v38, %v10064_v19  ;;  %v10094_v16 = vsel %vm8197_vm12, %v7068_v50, %v4571_v54  ;;  %v7126_v57 = vrot.slane %v5383_v12, 9  ;;  %v11136_v36 = vld [vmem:[#allocation10_spill] sm:$0xff]  ;;  %v5387_v58 = vld [vmem:[#allocation3 + $0x28] sm:$0xe] }
 0x2df   :  { %v5433_v59 = vrot.slane %v10074_v1, 5  ;;  %7599 = vmatmul.mubr.msk.bf16.gmra.mxu1 %vm3298_vm0, %v7034_v51  ;;  %7644 = vmatprep.mubr.msk.bf16.mxu0 %vm3298_vm0, %v7830_v53  ;;  %v7079_v8 = vcombine.low %v10071_v49, %v10085_v33  ;;  %v7080_v55 = vcombine.low %v11136_v36, %v10094_v16  ;;  %v10105_v63 = vsel %vm8197_vm12, %v7069_v44, %v4575_v34  ;;  %v4500_v51 = vld [vmem:[#allocation3 + $0x88] sm:$0xe]  ;;  %v10152_v50 = vld [vmem:[#allocation3 + $0x34] sm:$0x1] }
 0x2e0   :  { %v7127_v40 = vrot.slane %v5384_v7, 9  ;;  %7622 = vmatprep.mubr.msk.bf16.mxu1 %vm3298_vm0, %v7076_v20  ;;  %v10112_v14 = vsel %vm8197_vm12, %v7070_v41, %v4579_v24  ;;  %v5437_v60 = vrot.slane %v10076_v22, 5  ;;  %v7071_v4 = vrot.slane %v4497_v31, 9  ;;  %7675 = vmatpush3.bf16.msra.mxu0 %v5546_v61  ;;  %v7831_v20 = vld [vmem:[#allocation3 + $0x38] ss:$8 sps:$4 sm:$0xff]  }
 0x2e1   :  { %v10116_v56 = vsel %vm8197_vm12, %v7126_v57, %v5433_v59  ;;  %v4583_v35 = vrot.slane %v9991_v26, 5  ;;  %v7072_v62 = vrot.slane %v4498_v11, 9  ;;  %v4587_v10 = vrot.slane %v10005_v47, 5  ;;  %7762 = vmatprep.subr.msk.bf16.mxu0 %vm4220_vm2, %v10081_v21  ;;  %v7832_v26 = vld [vmem:[#allocation3 + $0x58] ss:$8 sps:$4 sm:$0xff]  }
 0x2e2   :  { %v7128_v6 = vrot.slane %v5385_v9, 9  ;;  %v10127_v48 = vsel %vm8197_vm12, %v7127_v40, %v5437_v60  ;;  %v5441_v45 = vrot.slane %v10107_v30, 5  ;;  %v7129_v13 = vrot.slane %v5386_v25, 9  ;;  %v10157_v54 = vld [vmem:[%s11016_s5 + $0x18] sm:$0xf]  ;;  %v11137_v9 = vld [vmem:[#allocation9_spill] sm:$0xff] }
 0x2e3   :  { %v5445_v61 = vrot.slane %v10119_v32, 5  ;;  %v7081_v47 = vcombine.low %v10105_v63, %v10112_v14  ;;  %v10135_v0 = vsel %vm8197_vm12, %v7071_v4, %v4583_v35  ;;  %v10139_v28 = vsel %vm8197_vm12, %v7072_v62, %v4587_v10  ;;  %v5388_v24 = vld [vmem:[#allocation3 + $0x30] sm:$0xe]  ;;  %v4961_v31 = vld [vmem:[#allocation3 + $0x8] sm:$0xf] }
 0x2e4   :  { %v7073_v43 = vrot.slane %v4499_v29, 9  ;;  %v7143_v37 = vcombine.low %v10116_v56, %v10127_v48  ;;  %v7082_v53 = vcombine.low %v10135_v0, %v10139_v28  ;;  %v10149_v17 = vsel %vm8197_vm12, %v7128_v6, %v5441_v45  ;;  %v4963_v40 = vld [vmem:[#allocation3 + $0x10] sm:$0xf]  ;;  %v10194_v62 = vld [vmem:[#allocation3 + $0x3c] sm:$0x1] }
 0x2e5   :  { %v4591_v5 = vrot.slane %v10014_v27, 5  ;;  %v10161_v44 = vsel %vm8197_vm12, %v7129_v13, %v5445_v61  ;;  %v7074_v34 = vrot.slane %v4500_v51, 9  ;;  %v4595_v41 = vrot.slane %v10021_v3, 5  ;;  %v5389_v25 = vld [vmem:[#allocation3 + $0x38] sm:$0xe] }
 0x2e6   :  { %v7130_v12 = vrot.slane %v5387_v58, 9  ;;  %7645 = vmatmul.mubr.msk.bf16.gmra.mxu0 %vm3298_vm0, %v7831_v20  ;;  %v5449_v7 = vrot.slane %v10141_v39, 5  ;;  %v7131_v57 = vrot.slane %v5388_v24, 9  ;;  %v5453_v59 = vrot.slane %v10152_v50, 5  ;;  %v7833_v6 = vld [vmem:[#allocation3 + $0x68] ss:$8 sps:$4 sm:$0xff]  }
 0x2e7   :  { %v10167_v27 = vsel %vm8197_vm12, %v7073_v43, %v4591_v5  ;;  %7623 = vmatmul.mubr.msk.bf16.vlgmr.msra.gmra.mxu1 %vm3298_vm0, %v7077_v18  ;;  %7648 = vmatprep.mubr.msk.bf16.mxu0 %vm3298_vm0, %v7832_v26  ;;  %v10178_v3 = vsel %vm8197_vm12, %v7074_v34, %v4595_v41  ;;  %v4994_v11 = vshrl.u32 %v4961_v31, 16  ;;  %v4997_v60 = vshll.u32 %v4961_v31, 16  ;;  %v5390_v61 = vld [vmem:[#allocation3 + $0x40] sm:$0xe]  ;;  %v4965_v58 = vld [vmem:[#allocation3 + $0x18] sm:$0xf] }
 0x2e8   :  { %v5003_v4 = vshll.u32 %v10074_v1, 16  ;;  %7657 = vmatpush3.bf16.msra.mxu1 %v11137_v9  ;;  %7626 = vmatprep.mubr.msk.bf16.mxu1 %vm3298_vm0, %v7078_v52  ;;  %v7144_v46 = vcombine.low %v10149_v17, %v10161_v44  ;;  %v7083_v23 = vcombine.low %v10167_v27, %v10178_v3  ;;  %v10192_v18 = vsel %vm8197_vm12, %v7130_v12, %v5449_v7  ;;  %v10196_v1 = vld [vmem:[#allocation3 + $0x44] sm:$0x1]  ;;  %v4967_v24 = vld [vmem:[#allocation3 + $0x20] sm:$0xf] }
 0x2e9   :  { %v5008_v35 = vshrl.u32 %v4963_v40, 16  ;;  %v10200_v38 = vsel %vm8197_vm12, %v7131_v57, %v5453_v59  ;;  %v4996_v19 = vrot.slane %v4994_v11, 4  ;;  %v4999_v52 = vrot.slane %v4997_v60, 5  ;;  %7761 = vmatprep.subr.msk.bf16.mxu1 %vm4220_vm2, %v10157_v54  ;;  %v7834_v57 = vld [vmem:[#allocation3 + $0x78] ss:$8 sps:$4 sm:$0xff]  }
 0x2ea   :  { %v5005_v10 = vrot.slane %v5003_v4, 5  ;;  %v5011_v45 = vshll.u32 %v4963_v40, 16  ;;  %v5017_v13 = vshll.u32 %v10076_v22, 16  ;;  %v7132_v29 = vrot.slane %v5389_v25, 9  ;;  %v10216_v11 = vld [vmem:[#allocation3 + $0x5c] sm:$0x1] }
 0x2eb   :  { %v5010_v20 = vrot.slane %v5008_v35, 4  ;;  %v5000_v26 = vor.u32 %v4999_v52, %v4996_v19  ;;  %v5457_v51 = vrot.slane %v10194_v62, 5  ;;  %v7133_v43 = vrot.slane %v5390_v61, 9  ;;  %v5391_v19 = vld [vmem:[#allocation3 + $0x58] sm:$0xe] }
 0x2ec   :  { %v5461_v5 = vrot.slane %v10196_v1, 5  ;;  %v5013_v34 = vrot.slane %v5011_v45, 5  ;;  %v5019_v41 = vrot.slane %v5017_v13, 5  ;;  %v5022_v12 = vshrl.u32 %v4965_v58, 16  ;;  %v5392_v52 = vld [vmem:[#allocation3 + $0x60] sm:$0xe] }
 0x2ed   :  { %v5025_v7 = vshll.u32 %v4965_v58, 16  ;;  %v5001_v59 = vrot.slane %v5000_v26, 4  ;;  %v10209_v31 = vsel %vm8197_vm12, %v7132_v29, %v5457_v51  ;;  %v5031_v40 = vshll.u32 %v10107_v30, 16  ;;  %v4969_v51 = vld [vmem:[#allocation3 + $0x28] sm:$0xf] }
 0x2ee   :  { %v10213_v22 = vsel %vm8197_vm12, %v7133_v43, %v5461_v5  ;;  %7649 = vmatmul.mubr.msk.bf16.gmra.mxu0 %vm3298_vm0, %v7833_v6  ;;  %v7145_v60 = vcombine.low %v10192_v18, %v10200_v38  ;;  %v5014_v4 = vor.u32 %v5013_v34, %v5010_v20  ;;  %v5024_v9 = vrot.slane %v5022_v12, 4  ;;  %v10230_v20 = vld [vmem:[#allocation3 + $0x64] sm:$0x1]  ;;  %v4971_v36 = vld [vmem:[#allocation3 + $0x30] sm:$0xf] }
 0x2ef   :  { %v5027_v35 = vrot.slane %v5025_v7, 5  ;;  %7627 = vmatmul.mubr.msk.bf16.gmra.mxu1 %vm3298_vm0, %v7079_v8  ;;  %7652 = vmatprep.mubr.msk.bf16.mxu0 %vm3298_vm0, %v7834_v57  ;;  %v5006_v30 = vsel %vm8201_vm13, %v5001_v59, %v5005_v10  ;;  %v7146_v25 = vcombine.low %v10209_v31, %v10213_v22  ;;  %v5036_v6 = vshrl.u32 %v4967_v24, 16  ;;  %v4975_v56 = vld [vmem:[#allocation3 + $0x40] sm:$0xf]  ;;  %v10285_v0 = vld [vmem:[#allocation3 + $0x7c] sm:$0x1] }
 0x2f0   :  { %v5039_v45 = vshll.u32 %v4967_v24, 16  ;;  %7630 = vmatprep.mubr.msk.bf16.mxu1 %vm3298_vm0, %v7080_v55  ;;  %v5015_v49 = vrot.slane %v5014_v4, 4  ;;  %v5045_v8 = vshll.u32 %v10119_v32, 16  ;;  %v7134_v13 = vrot.slane %v5391_v19, 9  ;;  %v7835_v55 = vld [vmem:[#allocation3 + $0x88] ss:$8 sps:$4 sm:$0xff]  }
 0x2f1   :  { %v5028_v33 = vor.u32 %v5027_v35, %v5024_v9  ;;  %v5038_v61 = vrot.slane %v5036_v6, 4  ;;  %v5465_v10 = vrot.slane %v10216_v11, 5  ;;  %v7135_v26 = vrot.slane %v5392_v52, 9  ;;  %v10257_v4 = vld [vmem:[#allocation3 + $0x74] sm:$0x1] }
 0x2f2   :  { %v5041_v29 = vrot.slane %v5039_v45, 5  ;;  %v5020_v43 = vsel %vm8201_vm13, %v5015_v49, %v5019_v41  ;;  %v5033_v58 = vrot.slane %v5031_v40, 5  ;;  %v5469_v16 = vrot.slane %v10230_v20, 5  ;;  %v10255_v40 = vld [vmem:[#allocation3 + $0x6c] sm:$0x1] }
 0x2f3   :  { %v5029_v5 = vrot.slane %v5028_v33, 4  ;;  %v10241_v34 = vcombine.low %v5006_v30, %v5020_v43  ;;  %v5047_v32 = vrot.slane %v5045_v8, 5  ;;  %v10245_v12 = vsel %vm8197_vm12, %v7134_v13, %v5465_v10  ;;  %v5393_v9 = vld [vmem:[#allocation3 + $0x68] sm:$0xe]  ;;  %v5394_v6 = vld [vmem:[#allocation3 + $0x70] sm:$0xe] }
 0x2f4   :  { %v5042_v24 = vor.u32 %v5041_v29, %v5038_v61  ;;  %v10249_v7 = vsel %vm8197_vm12, %v7135_v26, %v5469_v16  ;;  %v10253_v41 = vsel %vm4220_vm2, %v10157_v54, 0  ;;  %v5050_v57 = vshrl.u32 %v4969_v51, 16  ;;  %v4973_v8 = vld [vmem:[#allocation3 + $0x38] sm:$0xf] }
 0x2f5   :  { %v5053_v59 = vshll.u32 %v4969_v51, 16  ;;  %v5034_v35 = vsel %vm8201_vm13, %v5029_v5, %v5033_v58  ;;  %v5059_v52 = vshll.u32 %v10141_v39, 16  ;;  %v5064_v30 = vshrl.u32 %v4971_v36, 16 }
 0x2f6   :  { %v5043_v19 = vrot.slane %v5042_v24, 4  ;;  %7653 = vmatmul.mubr.msk.bf16.gmra.mxu0 %vm3298_vm0, %v7835_v55  ;;  %v7147_v54 = vcombine.low %v10245_v12, %v10249_v7  ;;  %v5052_v45 = vrot.slane %v5050_v57, 4  ;;  %v5067_v33 = vshll.u32 %v4971_v36, 16  ;;  %v10295_v55 = vld [vmem:[#allocation3 + $0x84] sm:$0x1] }
 0x2f7   :  { %v5055_v49 = vrot.slane %v5053_v59, 5  ;;  %7631 = vmatmul.mubr.msk.bf16.gmra.mxu1 %vm3298_vm0, %v7081_v47  ;;  %7676 = vmatprep.mubr.msk.bf16.mxu0 %vm3298_vm0, %v7143_v37  ;;  %v5066_v13 = vrot.slane %v5064_v30, 4  ;;  %v5073_v61 = vshll.u32 %v10152_v50, 16  ;;  %v7136_v29 = vrot.slane %v5393_v9, 9  ;;  %v5395_v24 = vld [vmem:[#allocation3 + $0x78] sm:$0xe] }
 0x2f8   :  { %v5048_v39 = vsel %vm8201_vm13, %v5043_v19, %v5047_v32  ;;  %7634 = vmatprep.mubr.msk.bf16.mxu1 %vm3298_vm0, %v7082_v53  ;;  %v5061_v47 = vrot.slane %v5059_v52, 5  ;;  %v5069_v10 = vrot.slane %v5067_v33, 5  ;;  %v5473_v48 = vrot.slane %v10255_v40, 5  ;;  %v5396_v9 = vld [vmem:[#allocation3 + $0x80] sm:$0xe] }
 0x2f9   :  { %v10280_v63 = vcombine.low %v5034_v35, %v5048_v39  ;;  %v5056_v14 = vor.u32 %v5055_v49, %v5052_v45  ;;  %v7137_v37 = vrot.slane %v5394_v6, 9  ;;  %v5477_v26 = vrot.slane %v10257_v4, 5  ;;  %v4977_v6 = vld [vmem:[#allocation3 + $0x58] sm:$0xf]  ;;  %v4979_v39 = vld [vmem:[#allocation3 + $0x60] sm:$0xf] }
 0x2fa   :  { %v5078_v51 = vshrl.u32 %v4973_v8, 16  ;;  %v5070_v50 = vor.u32 %v5069_v10, %v5066_v13  ;;  %v5081_v5 = vshll.u32 %v4973_v8, 16  ;;  %v5087_v58 = vshll.u32 %v10194_v62, 16 }
 0x2fb   :  { %v5057_v43 = vrot.slane %v5056_v14, 4  ;;  %v10289_v28 = vsel %vm8197_vm12, %v7136_v29, %v5473_v48  ;;  %v10293_v53 = vsel %vm8197_vm12, %v7137_v37, %v5477_v26  ;;  %v5092_v36 = vshrl.u32 %v4975_v56, 16  ;;  %v5397_v14 = vld [vmem:[#allocation3 + $0x88] sm:$0xe]  ;;  %v5398_v48 = vld [vmem:[#allocation3 + $0x90] sm:$0xe] }
 0x2fc   :  { %v5080_v16 = vrot.slane %v5078_v51, 4  ;;  %v5071_v57 = vrot.slane %v5070_v50, 4  ;;  %v5075_v62 = vrot.slane %v5073_v61, 5  ;;  %v5083_v59 = vrot.slane %v5081_v5, 5  ;;  %v10335_v50 = vld [vmem:[#allocation3 + $0x94] sm:$0x1] }
 0x2fd   :  { %v5062_v32 = vsel %vm8201_vm13, %v5057_v43, %v5061_v47  ;;  %v7148_v35 = vcombine.low %v10289_v28, %v10293_v53  ;;  %v5094_v19 = vrot.slane %v5092_v36, 4  ;;  %v5095_v52 = vshll.u32 %v4975_v56, 16  ;;  %v4981_v36 = vld [vmem:[#allocation3 + $0x68] sm:$0xf] }
 0x2fe   :  { %v5101_v30 = vshll.u32 %v10196_v1, 16  ;;  %7677 = vmatmul.mubr.msk.bf16.vlgmr.msra.gmra.mxu0 %vm3298_vm0, %v7144_v46  ;;  %v5076_v45 = vsel %vm8201_vm13, %v5071_v57, %v5075_v62  ;;  %v5084_v49 = vor.u32 %v5083_v59, %v5080_v16  ;;  %v7138_v33 = vrot.slane %v5395_v24, 9  ;;  %v4983_v59 = vld [vmem:[#allocation3 + $0x70] sm:$0xf] }
 0x2ff   :  { %v5481_v8 = vrot.slane %v10285_v0, 5  ;;  %7635 = vmatmul.mubr.msk.bf16.gmra.mxu1 %vm3298_vm0, %v7083_v23  ;;  %7680 = vmatprep.mubr.msk.bf16.mxu0 %vm3298_vm0, %v7145_v60  ;;  %v7112_v17 = vcombine.low %v5062_v32, %v5076_v45  ;;  %v5089_v44 = vrot.slane %v5087_v58, 5  ;;  %v5097_v46 = vrot.slane %v5095_v52, 5  ;;  %v10324_v23 = vld [vmem:[#allocation3 + $0x8c] sm:$0x1] }
 0x300   :  { %v7139_v1 = vrot.slane %v5396_v9, 9  ;;  %7658 = vmatprep.mubr.msk.bf16.mxu1 %vm3298_vm0, %v10241_v34  ;;  %v5085_v13 = vrot.slane %v5084_v49, 4  ;;  %v5485_v27 = vrot.slane %v10295_v55, 5  ;;  %v5106_v3 = vshrl.u32 %v4977_v6, 16 }
 0x301   :  { %v10321_v61 = vsel %vm8197_vm12, %v7138_v33, %v5481_v8  ;;  %v5098_v18 = vor.u32 %v5097_v46, %v5094_v19  ;;  %v5109_v38 = vshll.u32 %v4977_v6, 16  ;;  %v5115_v60 = vshll.u32 %v10216_v11, 16  ;;  %v5860_v6 = vld [vmem:[#allocation3 + $0x10] sm:$0xf] }
 0x302   :  { %v5120_v29 = vshrl.u32 %v4979_v39, 16  ;;  %v5103_v47 = vrot.slane %v5101_v30, 5  ;;  %v10329_v34 = vsel %vm8197_vm12, %v7139_v1, %v5485_v27  ;;  %v5108_v10 = vrot.slane %v5106_v3, 4 }
 0x303   :  { %v5123_v56 = vshll.u32 %v4979_v39, 16  ;;  %v5090_v37 = vsel %vm8201_vm13, %v5085_v13, %v5089_v44  ;;  %v5099_v26 = vrot.slane %v5098_v18, 4  ;;  %v7149_v51 = vcombine.low %v10321_v61, %v10329_v34  ;;  %v5862_v44 = vld [vmem:[#allocation3 + $0x18] sm:$0xf]  ;;  %v10371_v13 = vld [vmem:[#allocation3 + $0x1c] sm:$0x1] }
 0x304   :  { %v5111_v43 = vrot.slane %v5109_v38, 5  ;;  %v5122_v11 = vrot.slane %v5120_v29, 4  ;;  %v5129_v58 = vshll.u32 %v10230_v20, 16  ;;  %v7140_v16 = vrot.slane %v5397_v14, 9  ;;  %v4985_v38 = vld [vmem:[#allocation3 + $0x78] sm:$0xf] }
 0x305   :  { %v5125_v5 = vrot.slane %v5123_v56, 5  ;;  %v5117_v32 = vrot.slane %v5115_v60, 5  ;;  %v5489_v57 = vrot.slane %v10324_v23, 5  ;;  %v7141_v62 = vrot.slane %v5398_v48, 9  ;;  %v5864_v34 = vld [vmem:[#allocation3 + $0x20] sm:$0xf] }
 0x306   :  { %v5112_v24 = vor.u32 %v5111_v43, %v5108_v10  ;;  %7681 = vmatmul.mubr.msk.bf16.gmra.mxu0 %vm3298_vm0, %v7146_v25  ;;  %v5104_v9 = vsel %vm8201_vm13, %v5099_v26, %v5103_v47  ;;  %v5131_v52 = vrot.slane %v5129_v58, 5  ;;  %v5493_v20 = vrot.slane %v10335_v50, 5  ;;  %v4987_v10 = vld [vmem:[#allocation3 + $0x80] sm:$0xf] }
 0x307   :  { %v5126_v19 = vor.u32 %v5125_v5, %v5122_v11  ;;  %7659 = vmatmul.mubr.msk.bf16.vlgmr.msra.gmra.mxu1 %vm3298_vm0, %v10280_v63  ;;  %7684 = vmatprep.mubr.msk.bf16.mxu0 %vm3298_vm0, %v7147_v54  ;;  %v10354_v31 = vsel %vm8197_vm12, %v7140_v16, %v5489_v57  ;;  %v5134_v22 = vshrl.u32 %v4981_v36, 16  ;;  %v5137_v25 = vshll.u32 %v4981_v36, 16  ;;  %v10363_v54 = vld [vmem:[#allocation3 + $0x14] sm:$0x1]  ;;  %v10378_v43 = vld [vmem:[%s11016_s5 + $0x20] sm:$0xf] }
 0x308   :  { %v5113_v30 = vrot.slane %v5112_v24, 4  ;;  %7693 = vmatpush3.bf16.msra.mxu1 %v10253_v41  ;;  %7662 = vmatprep.mubr.msk.bf16.mxu1 %vm3298_vm0, %v7112_v17  ;;  %v10360_v63 = vsel %vm8197_vm12, %v7141_v62, %v5493_v20  ;;  %v5143_v12 = vshll.u32 %v10255_v40, 16  ;;  %v5148_v7 = vshrl.u32 %v4983_v59, 16 }
 0x309   :  { %v5127_v45 = vrot.slane %v5126_v19, 4  ;;  %v7113_v49 = vcombine.low %v5090_v37, %v5104_v9  ;;  %v5136_v8 = vrot.slane %v5134_v22, 4  ;;  %v5139_v39 = vrot.slane %v5137_v25, 5  ;;  %7763 = vmatprep.subr.msk.bf16.mxu1 %vm4220_vm2, %v10378_v43 }
 0x30a   :  { %v5118_v33 = vsel %vm8201_vm13, %v5113_v30, %v5117_v32  ;;  %v7150_v17 = vcombine.low %v10354_v31, %v10360_v63  ;;  %v5150_v46 = vrot.slane %v5148_v7, 4  ;;  %v5151_v1 = vshll.u32 %v4983_v59, 16  ;;  %v10398_v30 = vld [vmem:[#allocation3 + $0x24] sm:$0x1] }
 0x30b   :  { %v5132_v41 = vsel %vm8201_vm13, %v5127_v45, %v5131_v52  ;;  %v5140_v40 = vor.u32 %v5139_v39, %v5136_v8  ;;  %v5145_v27 = vrot.slane %v5143_v12, 5  ;;  %v5157_v3 = vshll.u32 %v10257_v4, 16  ;;  %v5866_v45 = vld [vmem:[#allocation3 + $0x28] sm:$0xf] }
 0x30c   :  { %v5893_v18 = vshrl.u32 %v5860_v6, 16  ;;  %v5153_v60 = vrot.slane %v5151_v1, 5  ;;  %v5896_v29 = vshll.u32 %v5860_v6, 16  ;;  %v5902_v14 = vshll.u32 %v10363_v54, 16 }
 0x30d   :  { %v5907_v47 = vshrl.u32 %v5862_v44, 16  ;;  %v7114_v56 = vcombine.low %v5118_v33, %v5132_v41  ;;  %v5141_v48 = vrot.slane %v5140_v40, 4  ;;  %v5910_v26 = vshll.u32 %v5862_v44, 16 }
 0x30e   :  { %v5895_v37 = vrot.slane %v5893_v18, 4  ;;  %7685 = vmatmul.mubr.msk.bf16.gmra.mxu0 %vm3298_vm0, %v7148_v35  ;;  %v5154_v4 = vor.u32 %v5153_v60, %v5150_v46  ;;  %v5159_v11 = vrot.slane %v5157_v3, 5  ;;  %v5898_v5 = vrot.slane %v5896_v29, 5 }
 0x30f   :  { %v5909_v58 = vrot.slane %v5907_v47, 4  ;;  %7663 = vmatmul.mubr.msk.bf16.gmra.mxu1 %vm3298_vm0, %v7113_v49  ;;  %7688 = vmatprep.mubr.msk.bf16.mxu0 %vm3298_vm0, %v7149_v51  ;;  %v5904_v16 = vrot.slane %v5902_v14, 5  ;;  %v5912_v36 = vrot.slane %v5910_v26, 5  ;;  %v5916_v28 = vshll.u32 %v10371_v13, 16  ;;  %v10405_v49 = vld [vmem:[#allocation3 + $0x2c] sm:$0x1] }
 0x310   :  { %v5162_v53 = vshrl.u32 %v4985_v38, 16  ;;  %7666 = vmatprep.mubr.msk.bf16.mxu1 %vm3298_vm0, %v7114_v56  ;;  %v5146_v35 = vsel %vm8201_vm13, %v5141_v48, %v5145_v27  ;;  %v5155_v24 = vrot.slane %v5154_v4, 4  ;;  %v5899_v32 = vor.u32 %v5898_v5, %v5895_v37  ;;  %v4991_v14 = vld [vmem:[#allocation3 + $0x90] sm:$0xf] }
 0x311   :  { %v5165_v57 = vshll.u32 %v4985_v38, 16  ;;  %v5913_v62 = vor.u32 %v5912_v36, %v5909_v58  ;;  %v5171_v9 = vshll.u32 %v10285_v0, 16  ;;  %v5176_v61 = vshrl.u32 %v4987_v10, 16  ;;  %v5868_v5 = vld [vmem:[#allocation3 + $0x30] sm:$0xf] }
 0x312   :  { %v5164_v59 = vrot.slane %v5162_v53, 4  ;;  %v5160_v51 = vsel %vm8201_vm13, %v5155_v24, %v5159_v11  ;;  %v5900_v19 = vrot.slane %v5899_v32, 4  ;;  %v5918_v52 = vrot.slane %v5916_v28, 5 }
 0x313   :  { %v5167_v20 = vrot.slane %v5165_v57, 5  ;;  %v7115_v31 = vcombine.low %v5146_v35, %v5160_v51  ;;  %v5914_v22 = vrot.slane %v5913_v62, 4  ;;  %v5178_v25 = vrot.slane %v5176_v61, 4  ;;  %v10419_v57 = vld [vmem:[#allocation3 + $0x34] sm:$0x1] }
 0x314   :  { %v5179_v6 = vshll.u32 %v4987_v10, 16  ;;  %v5905_v63 = vsel %vm8201_vm13, %v5900_v19, %v5904_v16  ;;  %v5185_v0 = vshll.u32 %v10295_v55, 16  ;;  %v6167_v7 = vsel %vm4220_vm2, %v10081_v21, 0  ;;  %v4989_v55 = vld [vmem:[#allocation3 + $0x88] sm:$0xf] }
 0x315   :  { %v5168_v12 = vor.u32 %v5167_v20, %v5164_v59  ;;  %v5919_v33 = vsel %vm8201_vm13, %v5914_v22, %v5918_v52  ;;  %7711 = vmatpush3.bf16.msra.mxu0 %v6167_v7  ;;  %v5921_v39 = vshrl.u32 %v5864_v34, 16  ;;  %v5924_v44 = vshll.u32 %v5864_v34, 16  ;;  %v5870_v62 = vld [vmem:[#allocation3 + $0x38] sm:$0xf]  ;;  %v10424_v34 = vld [vmem:[#allocation3 + $0x3c] sm:$0x1] }
 0x316   :  { %v5181_v8 = vrot.slane %v5179_v6, 5  ;;  %7689 = vmatmul.mubr.msk.bf16.gmra.mxu0 %vm3298_vm0, %v7150_v17  ;;  %v7177_v41 = vcombine.low %v5905_v63, %v5919_v33  ;;  %v5173_v1 = vrot.slane %v5171_v9, 5  ;;  %v5930_v40 = vshll.u32 %v10398_v30, 16  ;;  %v3573_v22 = vld [vmem:[#allocation3 + $0x4c] sm:$0x1] }
 0x317   :  { %v5169_v46 = vrot.slane %v5168_v12, 4  ;;  %7667 = vmatmul.mubr.msk.bf16.gmra.mxu1 %vm3298_vm0, %v7115_v31  ;;  %v5923_v27 = vrot.slane %v5921_v39, 4  ;;  %v5926_v3 = vrot.slane %v5924_v44, 5  ;;  %v5935_v18 = vshrl.u32 %v5866_v45, 16  ;;  %v3512_v31 = vld [vmem:[#allocation3 + $0x48] sm:$0x1] }
 0x318   :  { %v5182_v21 = vor.u32 %v5181_v8, %v5178_v25  ;;  %7712 = vmatprep.mubr.msk.bf16.mxu0 %vm3298_vm0, %v7177_v41  ;;  %v5187_v60 = vrot.slane %v5185_v0, 5  ;;  %v5938_v29 = vshll.u32 %v5866_v45, 16  ;;  %v5944_v17 = vshll.u32 %v10405_v49, 16  ;;  %v5872_v25 = vld [vmem:[#allocation3 + $0x40] sm:$0xf] }
 0x319   :  { %v5174_v38 = vsel %vm8201_vm13, %v5169_v46, %v5173_v1  ;;  %v5927_v10 = vor.u32 %v5926_v3, %v5923_v27  ;;  %v5937_v56 = vrot.slane %v5935_v18, 4  ;;  %v5190_v48 = vshrl.u32 %v4989_v55, 16  ;;  %v10430_v46 = vld [vmem:[#allocation3 + $0x44] sm:$0x1]  ;;  %v5876_v27 = vld [vmem:[#allocation3 + $0x60] sm:$0xf] }
 0x31a   :  { %v5183_v47 = vrot.slane %v5182_v21, 4  ;;  %v5932_v37 = vrot.slane %v5930_v40, 5  ;;  %v5940_v26 = vrot.slane %v5938_v29, 5  ;;  %v5193_v4 = vshll.u32 %v4989_v55, 16  ;;  %v10435_v3 = vld [vmem:[#allocation3 + $0x64] sm:$0x1] }
 0x31b   :  { %v5199_v11 = vshll.u32 %v10324_v23, 16  ;;  %v5928_v16 = vrot.slane %v5927_v10, 4  ;;  %v5192_v36 = vrot.slane %v5190_v48, 4  ;;  %v5204_v28 = vshrl.u32 %v4991_v14, 16 }
 0x31c   :  { %v5188_v58 = vsel %vm8201_vm13, %v5183_v47, %v5187_v60  ;;  %v5941_v35 = vor.u32 %v5940_v26, %v5937_v56  ;;  %v5946_v24 = vrot.slane %v5944_v17, 5  ;;  %v5195_v32 = vrot.slane %v5193_v4, 5  ;;  %v7836_v26 = vld [vmem:[#allocation3 + $0x10] ss:$8 sps:$4 sm:$0xff]   ;;  %v10498_v60 = vld [vmem:[#allocation3 + $0x94] sm:$0x1] }
 0x31d   :  { %v7116_v53 = vcombine.low %v5174_v38, %v5188_v58  ;;  %v5933_v59 = vsel %vm8201_vm13, %v5928_v16, %v5932_v37  ;;  %v5206_v9 = vrot.slane %v5204_v28, 4  ;;  %v5207_v61 = vshll.u32 %v4991_v14, 16  ;;  %v5878_v14 = vld [vmem:[#allocation3 + $0x68] sm:$0xf] }
 0x31e   :  { %v5213_v23 = vshll.u32 %v10335_v50, 16  ;;  %v5942_v51 = vrot.slane %v5941_v35, 4  ;;  %v5196_v19 = vor.u32 %v5195_v32, %v5192_v36  ;;  %v5949_v52 = vshrl.u32 %v5868_v5, 16 }
 0x31f   :  { %7670 = vmatprep.mubr.msk.bf16.mxu1 %vm3298_vm0, %v7116_v53  ;;  %v5952_v20 = vshll.u32 %v5868_v5, 16  ;;  %v5201_v6 = vrot.slane %v5199_v11, 5  ;;  %v5209_v45 = vrot.slane %v5207_v61, 5  ;;  %v5958_v63 = vshll.u32 %v10419_v57, 16  ;;  %v10445_v5 = vld [vmem:[#allocation3 + $0x6c] sm:$0x1] }
 0x320   :  { %v5963_v12 = vshrl.u32 %v5870_v62, 16  ;;  %v5947_v0 = vsel %vm8201_vm13, %v5942_v51, %v5946_v24  ;;  %v5197_v50 = vrot.slane %v5196_v19, 4  ;;  %v5951_v7 = vrot.slane %v5949_v52, 4 }
 0x321   :  { %v5954_v33 = vrot.slane %v5952_v20, 5  ;;  %v7178_v8 = vcombine.low %v5933_v59, %v5947_v0  ;;  %v5210_v39 = vor.u32 %v5209_v45, %v5206_v9  ;;  %v5215_v44 = vrot.slane %v5213_v23, 5  ;;  %v5880_v59 = vld [vmem:[#allocation3 + $0x70] sm:$0xf] }
 0x322   :  { %v5965_v41 = vrot.slane %v5963_v12, 4  ;;  %v5202_v1 = vsel %vm8201_vm13, %v5197_v50, %v5201_v6  ;;  %v5966_v55 = vshll.u32 %v5870_v62, 16  ;;  %v5972_v21 = vshll.u32 %v10424_v34, 16 }
 0x323   :  { %v5955_v40 = vor.u32 %v5954_v33, %v5951_v7  ;;  %7713 = vmatmul.mubr.msk.bf16.vlgmr.msra.gmra.mxu0 %vm3298_vm0, %v7178_v8  ;;  %v5211_v18 = vrot.slane %v5210_v39, 4  ;;  %v3513_v38 = vsel %vm9240_vm5, 0, %v3512_v31  ;;  %v3574_v29 = vsel %vm9278_vm3, 0, %v3573_v22  ;;  %v10454_v31 = vld [vmem:[#allocation3 + $0x74] sm:$0x1] }
 0x324   :  { %v5977_v17 = vshrl.u32 %v5872_v25, 16  ;;  %v5960_v10 = vrot.slane %v5958_v63, 5  ;;  %v5968_v56 = vrot.slane %v5966_v55, 5  ;;  %3514 = vst [vmem:[#allocation3 + $0x48] sm:$0x1] %v3513_v38  ;;  %v5980_v48 = vshll.u32 %v5872_v25, 16 }
 0x325   :  { %v5956_v47 = vrot.slane %v5955_v40, 4  ;;  %3575 = vst [vmem:[#allocation3 + $0x4c] sm:$0x1] %v3574_v29  ;;  %v5216_v37 = vsel %vm8201_vm13, %v5211_v18, %v5215_v44  ;;  %v5986_v11 = vshll.u32 %v10430_v46, 16  ;;  %v6005_v58 = vshrl.u32 %v5876_v27, 16 }
 0x326   :  { %v5979_v4 = vrot.slane %v5977_v17, 4  ;;  %v7117_v16 = vcombine.low %v5202_v1, %v5216_v37  ;;  %v5969_v36 = vor.u32 %v5968_v56, %v5965_v41  ;;  %v5974_v28 = vrot.slane %v5972_v21, 5  ;;  %v5882_v63 = vld [vmem:[#allocation3 + $0x78] sm:$0xf]  ;;  %v7837_v40 = vld [vmem:[#allocation3 + $0x20] ss:$8 sps:$4 sm:$0xff]  }
 0x327   :  { %v5982_v53 = vrot.slane %v5980_v48, 5  ;;  %v5961_v35 = vsel %vm8201_vm13, %v5956_v47, %v5960_v10  ;;  %v6007_v24 = vrot.slane %v6005_v58, 4  ;;  %v6008_v32 = vshll.u32 %v5876_v27, 16  ;;  %v10465_v27 = vld [vmem:[#allocation3 + $0x7c] sm:$0x1] }
 0x328   :  { %v6014_v62 = vshll.u32 %v10435_v3, 16  ;;  %7671 = vmatmul.mubr.msk.bf16.gmra.mxu1 %vm3298_vm0, %v7117_v16  ;;  %v5970_v9 = vrot.slane %v5969_v36, 4  ;;  %v6019_v23 = vshrl.u32 %v5878_v14, 16  ;;  %v6022_v51 = vshll.u32 %v5878_v14, 16  ;;  %v5884_v47 = vld [vmem:[#allocation3 + $0x80] sm:$0xf] }
 0x329   :  { %v5983_v61 = vor.u32 %v5982_v53, %v5979_v4  ;;  %7694 = vmatprep.mubr.msk.bf16.mxu1 %vm3298_vm0, %v7836_v26  ;;  %v10452_v19 = vrot.slane %v5986_v11, 5  ;;  %v6010_v52 = vrot.slane %v6008_v32, 5  ;;  %v6028_v45 = vshll.u32 %v10445_v5, 16  ;;  %v7838_v48 = vld [vmem:[#allocation3 + $0x30] ss:$8 sps:$4 sm:$0xff]  }
 0x32a   :  { %v6016_v20 = vrot.slane %v6014_v62, 5  ;;  %v5975_v22 = vsel %vm8201_vm13, %v5970_v9, %v5974_v28  ;;  %v6021_v25 = vrot.slane %v6019_v23, 4  ;;  %v6024_v6 = vrot.slane %v6022_v51, 5  ;;  %v3542_v23 = vld [vmem:[#allocation3 + $0x98] sm:$0x1] }
 0x32b   :  { %v7179_v12 = vcombine.low %v5961_v35, %v5975_v22  ;;  %v5874_v0 = vld [vmem:[#allocation3 + $0x48] sm:$0xf]  ;;  %v6011_v7 = vor.u32 %v6010_v52, %v6007_v24  ;;  %v6445_v33 = vsel %vm4220_vm2, %v10378_v43, 0  ;;  %v6033_v8 = vshrl.u32 %v5880_v59, 16 }
 0x32c   :  { %v10459_v50 = vld [vmem:[#allocation3 + $0x4c] sm:$0x1]  ;;  %v5984_v39 = vrot.slane %v5983_v61, 4  ;;  %v5991_v44 = vshrl.u32 %v5874_v0, 16  ;;  %v5994_v41 = vshll.u32 %v5874_v0, 16  ;;  %v6025_v21 = vor.u32 %v6024_v6, %v6021_v25 }
 0x32d   :  { %v6000_v1 = vshll.u32 %v10459_v50, 16  ;;  %7716 = vmatprep.mubr.msk.bf16.mxu0 %vm3298_vm0, %v7179_v12  ;;  %v6012_v55 = vrot.slane %v6011_v7, 4  ;;  %v6035_v18 = vrot.slane %v6033_v8, 4  ;;  %v6036_v38 = vshll.u32 %v5880_v59, 16  ;;  %v5886_v35 = vld [vmem:[#allocation3 + $0x88] sm:$0xf] }
 0x32e   :  { %v5993_v29 = vrot.slane %v5991_v44, 4  ;;  %v5996_v17 = vrot.slane %v5994_v41, 5  ;;  %v6030_v14 = vrot.slane %v6028_v45, 5  ;;  %v6042_v43 = vshll.u32 %v10454_v31, 16  ;;  %v10478_v61 = vld [vmem:[#allocation3 + $0x84] sm:$0x1] }
 0x32f   :  { %v6002_v10 = vrot.slane %v6000_v1, 5  ;;  %v6026_v56 = vrot.slane %v6025_v21, 4  ;;  %v6038_v37 = vrot.slane %v6036_v38, 5  ;;  %v6047_v26 = vshrl.u32 %v5882_v63, 16  ;;  %v3603_v0 = vld [vmem:[#allocation3 + $0x9c] sm:$0x1] }
 0x330   :  { %v5997_v4 = vor.u32 %v5996_v17, %v5993_v29  ;;  %7695 = vmatmul.mubr.msk.bf16.vlgmr.msra.gmra.mxu1 %vm3298_vm0, %v7837_v40  ;;  %v6017_v11 = vsel %vm8201_vm13, %v6012_v55, %v6016_v20  ;;  %v6050_v58 = vshll.u32 %v5882_v63, 16  ;;  %v6056_v16 = vshll.u32 %v10465_v27, 16  ;;  %v10480_v20 = vld [vmem:[#allocation3 + $0x8c] sm:$0x1]  ;;  %v7839_v41 = vld [vmem:[#allocation3 + $0x40] ss:$8 sps:$4 sm:$0xff]  }
 0x331   :  { %v6031_v36 = vsel %vm8201_vm13, %v6026_v56, %v6030_v14  ;;  %7729 = vmatpush3.bf16.msra.mxu1 %v6445_v33  ;;  %7698 = vmatprep.mubr.msk.bf16.mxu1 %vm3298_vm0, %v7838_v48  ;;  %v6039_v28 = vor.u32 %v6038_v37, %v6035_v18  ;;  %v6049_v53 = vrot.slane %v6047_v26, 4  ;;  %v6061_v24 = vshrl.u32 %v5884_v47, 16  ;;  %v7840_v18 = vld [vmem:[#allocation3 + $0x60] ss:$8 sps:$4 sm:$0xff]  }
 0x332   :  { %v5989_v32 = vsel %vm8201_vm13, %v5984_v39, %v10452_v19  ;;  %v5998_v62 = vrot.slane %v5997_v4, 4  ;;  %v6044_v59 = vrot.slane %v6042_v43, 5  ;;  %v6052_v9 = vrot.slane %v6050_v58, 5  ;;  %v5888_v19 = vld [vmem:[#allocation3 + $0x90] sm:$0xf] }
 0x333   :  { %v7181_v51 = vcombine.low %v6017_v11, %v6031_v36  ;;  %v6058_v52 = vrot.slane %v6056_v16, 5  ;;  %v6063_v22 = vrot.slane %v6061_v24, 4  ;;  %v6064_v25 = vshll.u32 %v5884_v47, 16  ;;  %v6282_v11 = vld [vmem:[#allocation3 + $0x10] sm:$0xe] }
 0x334   :  { %v6003_v6 = vsel %vm8201_vm13, %v5998_v62, %v6002_v10  ;;  %v6053_v45 = vor.u32 %v6052_v9, %v6049_v53  ;;  %v6075_v63 = vshrl.u32 %v5886_v35, 16  ;;  %v6078_v12 = vshll.u32 %v5886_v35, 16  ;;  %v6283_v16 = vld [vmem:[#allocation3 + $0x18] sm:$0xe] }
 0x335   :  { %v7180_v7 = vcombine.low %v5989_v32, %v6003_v6  ;;  %v6040_v33 = vrot.slane %v6039_v28, 4  ;;  %v6066_v8 = vrot.slane %v6064_v25, 5  ;;  %v6070_v39 = vshll.u32 %v10478_v61, 16  ;;  %v7841_v62 = vld [vmem:[#allocation3 + $0x70] ss:$8 sps:$4 sm:$0xff]  }
 0x336   :  { %v6054_v44 = vrot.slane %v6053_v45, 4  ;;  %v6077_v1 = vrot.slane %v6075_v63, 4  ;;  %v6080_v40 = vrot.slane %v6078_v12, 5  ;;  %v6084_v55 = vshll.u32 %v10480_v20, 16 }
 0x337   :  { %7717 = vmatmul.mubr.msk.bf16.gmra.mxu0 %vm3298_vm0, %v7180_v7  ;;  %v6067_v21 = vor.u32 %v6066_v8, %v6063_v22  ;;  %v3543_v38 = vsel %vm9240_vm5, 0, %v3542_v23  ;;  %v3604_v29 = vsel %vm9278_vm3, 0, %v3603_v0  ;;  %v6089_v17 = vshrl.u32 %v5888_v19, 16 }
 0x338   :  { %7720 = vmatprep.mubr.msk.bf16.mxu0 %vm3298_vm0, %v7181_v51  ;;  %7699 = vmatmul.mubr.msk.bf16.gmra.mxu1 %vm3298_vm0, %v7839_v41  ;;  %v6081_v14 = vor.u32 %v6080_v40, %v6077_v1  ;;  %3544 = vst [vmem:[#allocation3 + $0x98] sm:$0x1] %v3543_v38  ;;  %3605 = vst [vmem:[#allocation3 + $0x9c] sm:$0x1] %v3604_v29  ;;  %v6092_v43 = vshll.u32 %v5888_v19, 16  ;;  %v6045_v47 = vsel %vm8201_vm13, %v6040_v33, %v6044_v59 }
 0x339   :  { %v6059_v10 = vsel %vm8201_vm13, %v6054_v44, %v6058_v52  ;;  %v6068_v2 = vrot.slane %v6067_v21, 4  ;;  %v6072_v56 = vrot.slane %v6070_v39, 5  ;;  %7702 = vmatprep.mubr.msk.bf16.mxu1 %vm3298_vm0, %v7840_v18  ;;  %v6086_v37 = vrot.slane %v6084_v55, 5  ;;  %v7842_v59 = vld [vmem:[#allocation3 + $0x80] ss:$8 sps:$4 sm:$0xff]  }
 0x33a   :  { %v6082_v48 = vrot.slane %v6081_v14, 4  ;;  %v6091_v26 = vrot.slane %v6089_v17, 4  ;;  %v6094_v4 = vrot.slane %v6092_v43, 5  ;;  %v7182_v28 = vcombine.low %v6045_v47, %v6059_v10  ;;  %v6284_v19 = vld [vmem:[#allocation3 + $0x20] sm:$0xe] }
 0x33b   :  { %v6073_v58 = vsel %vm8201_vm13, %v6068_v2, %v6072_v56  ;;  %v6098_v53 = vshll.u32 %v10498_v60, 16  ;;  %v7193_v35 = vrot.slane %v6282_v11, 9  ;;  %v6332_v9 = vrot.slane %v10363_v54, 5  ;;  %v6285_v44 = vld [vmem:[#allocation3 + $0x28] sm:$0xe] }
 0x33c   :  { %v6087_v36 = vsel %vm8201_vm13, %v6082_v48, %v6086_v37  ;;  %v6095_v32 = vor.u32 %v6094_v4, %v6091_v26  ;;  %v7194_v23 = vrot.slane %v6283_v16, 9  ;;  %v6336_v45 = vrot.slane %v10371_v13, 5  ;;  %v6286_v41 = vld [vmem:[#allocation3 + $0x30] sm:$0xe]  ;;  %v6287_v1 = vld [vmem:[#allocation3 + $0x38] sm:$0xe] }
 0x33d   :  { %v7183_v24 = vcombine.low %v6073_v58, %v6087_v36  ;;  %v6100_v0 = vrot.slane %v6098_v53, 5  ;;  %v6333_v8 = vsel %vm8197_vm12, %v7193_v35, %v6332_v9  ;;  %v7195_v21 = vrot.slane %v6284_v19, 9  ;;  %v6289_v37 = vld [vmem:[#allocation3 + $0x48] sm:$0xe] }
 0x33e   :  { %v6096_v63 = vrot.slane %v6095_v32, 4  ;;  %v6337_v39 = vsel %vm8197_vm12, %v7194_v23, %v6336_v45  ;;  %v6340_v18 = vrot.slane %v10398_v30, 5  ;;  %v7196_v29 = vrot.slane %v6285_v44, 9  ;;  %v6291_v26 = vld [vmem:[#allocation3 + $0x68] sm:$0xe] }
 0x33f   :  { %7721 = vmatmul.mubr.msk.bf16.gmra.mxu0 %vm3298_vm0, %v7182_v28  ;;  %v5890_v51 = vld [vmem:[#allocation3 + $0x98] sm:$0xf]  ;;  %v10507_v52 = vld [vmem:[#allocation3 + $0x9c] sm:$0x1]  ;;  %v7210_v38 = vcombine.low %v6333_v8, %v6337_v39  ;;  %v6344_v17 = vrot.slane %v10405_v49, 5  ;;  %v7197_v14 = vrot.slane %v6286_v41, 9 }
 0x340   :  { %7724 = vmatprep.mubr.msk.bf16.mxu0 %vm3298_vm0, %v7183_v24  ;;  %v6103_v22 = vshrl.u32 %v5890_v51, 16  ;;  %v6106_v25 = vshll.u32 %v5890_v51, 16  ;;  %v6112_v6 = vshll.u32 %v10507_v52, 16  ;;  %7703 = vmatmul.mubr.msk.bf16.gmra.mxu1 %vm3298_vm0, %v7841_v62  ;;  %v6101_v13 = vsel %vm8201_vm13, %v6096_v63, %v6100_v0  ;;  %v7843_v55 = vld [vmem:[#allocation3 + $0x90] ss:$8 sps:$4 sm:$0xff]  }
 0x341   :  { %7706 = vmatprep.mubr.msk.bf16.mxu1 %vm3298_vm0, %v7842_v59  ;;  %v6348_v47 = vrot.slane %v10419_v57, 5  ;;  %v7198_v10 = vrot.slane %v6287_v1, 9  ;;  %v6352_v2 = vrot.slane %v10424_v34, 5  ;;  %v6341_v30 = vsel %vm8197_vm12, %v7195_v21, %v6340_v18  ;;  %v6290_v34 = vld [vmem:[#allocation3 + $0x60] sm:$0xe] }
 0x342   :  { %v6105_v54 = vrot.slane %v6103_v22, 4  ;;  %v6108_v12 = vrot.slane %v6106_v25, 5  ;;  %v6114_v33 = vrot.slane %v6112_v6, 5  ;;  %v6345_v49 = vsel %vm8197_vm12, %v7196_v29, %v6344_v17  ;;  %v6293_v23 = vld [vmem:[#allocation3 + $0x78] sm:$0xe] }
 0x343   :  { %v6349_v48 = vsel %vm8197_vm12, %v7197_v14, %v6348_v47  ;;  %v6353_v57 = vsel %vm8197_vm12, %v7198_v10, %v6352_v2  ;;  %v7211_v4 = vcombine.low %v6341_v30, %v6345_v49  ;;  %v7199_v11 = vrot.slane %v6288_v42, 9  ;;  %v6295_v51 = vld [vmem:[#allocation3 + $0x88] sm:$0xe]  ;;  %v6297_v39 = vld [vmem:[#allocation3 + $0x98] sm:$0xe] }
 0x344   :  { %v6109_v7 = vor.u32 %v6108_v12, %v6105_v54  ;;  %v7212_v58 = vcombine.low %v6349_v48, %v6353_v57  ;;  %v6356_v16 = vrot.slane %v10430_v46, 5  ;;  %v7200_v36 = vrot.slane %v6289_v37, 9  ;;  %v6292_v46 = vld [vmem:[#allocation3 + $0x70] sm:$0xe] }
 0x345   :  { %v6360_v28 = vrot.slane %v10459_v50, 5  ;;  %v7201_v53 = vrot.slane %v6290_v34, 9  ;;  %v6364_v35 = vrot.slane %v10435_v3, 5  ;;  %v7202_v24 = vrot.slane %v6291_v26, 9  ;;  %v6294_v3 = vld [vmem:[#allocation3 + $0x80] sm:$0xe] }
 0x346   :  { %v6110_v40 = vrot.slane %v6109_v7, 4  ;;  %v6368_v32 = vrot.slane %v10445_v5, 5  ;;  %v6357_v62 = vsel %vm8197_vm12, %v7199_v11, %v6356_v16  ;;  %v7203_v5 = vrot.slane %v6292_v46, 9 }
 0x347   :  { %v6361_v59 = vsel %vm8197_vm12, %v7200_v36, %v6360_v28  ;;  %v6365_v50 = vsel %vm8197_vm12, %v7201_v53, %v6364_v35  ;;  %v6372_v6 = vrot.slane %v10454_v31, 5  ;;  %v7204_v45 = vrot.slane %v6293_v23, 9  ;;  %v6296_v31 = vld [vmem:[#allocation3 + $0x90] sm:$0xe] }
 0x348   :  { %v6115_v43 = vsel %vm8201_vm13, %v6110_v40, %v6114_v33  ;;  %7707 = vmatmul.mubr.msk.bf16.gmra.mxu1 %vm3298_vm0, %v7843_v55  ;;  %v6369_v9 = vsel %vm8197_vm12, %v7202_v24, %v6368_v32  ;;  %v7213_v22 = vcombine.low %v6357_v62, %v6361_v59  ;;  %v6376_v63 = vrot.slane %v10465_v27, 5 }
 0x349   :  { %v7184_v56 = vcombine.low %v6101_v13, %v6115_v43  ;;  %7730 = vmatprep.mubr.msk.bf16.mxu1 %vm3298_vm0, %v7210_v38  ;;  %v7214_v25 = vcombine.low %v6365_v50, %v6369_v9  ;;  %v7205_v54 = vrot.slane %v6294_v3, 9  ;;  %v6380_v12 = vrot.slane %v10478_v61, 5 }
 0x34a   :  { %v7206_v0 = vrot.slane %v6295_v51, 9  ;;  %v6384_v19 = vrot.slane %v10480_v20, 5  ;;  %v6373_v7 = vsel %vm8197_vm12, %v7203_v5, %v6372_v6  ;;  %v6377_v33 = vsel %vm8197_vm12, %v7204_v45, %v6376_v63 }
 0x34b   :  { %7725 = vmatmul.mubr.msk.bf16.gmra.mxu0 %vm3298_vm0, %v7184_v56  ;;  %v6381_v27 = vsel %vm8197_vm12, %v7205_v54, %v6380_v12  ;;  %v7215_v61 = vcombine.low %v6373_v7, %v6377_v33  ;;  %v7207_v44 = vrot.slane %v6296_v31, 9  ;;  %v6388_v20 = vrot.slane %v10498_v60, 5 }
 0x34c   :  { %v6385_v8 = vsel %vm8197_vm12, %v7206_v0, %v6384_v19  ;;  %v7208_v1 = vrot.slane %v6297_v39, 9  ;;  %v6392_v13 = vrot.slane %v10507_v52, 5 }
 0x34d   :  { %v7216_v41 = vcombine.low %v6381_v27, %v6385_v8  ;;  %v6389_v40 = vsel %vm8197_vm12, %v7207_v44, %v6388_v20 }
 0x34e   :  { %v6393_v55 = vsel %vm8197_vm12, %v7208_v1, %v6392_v13 }
 0x34f   :  { %v7217_v21 = vcombine.low %v6389_v40, %v6393_v55 }
 0x350   :  { %7731 = vmatmul.mubr.msk.bf16.vlgmr.msra.gmra.mxu1 %vm3298_vm0, %v7211_v4 }
 0x351   :  { %7734 = vmatprep.mubr.msk.bf16.mxu1 %vm3298_vm0, %v7212_v58 }
 0x358   :  { %7735 = vmatmul.mubr.msk.bf16.gmra.mxu1 %vm3298_vm0, %v7213_v22 }
 0x359   :  { %7738 = vmatprep.mubr.msk.bf16.mxu1 %vm3298_vm0, %v7214_v25 }
 0x360   :  { %7739 = vmatmul.mubr.msk.bf16.gmra.mxu1 %vm3298_vm0, %v7215_v61 }
 0x361   :  { %7742 = vmatprep.mubr.msk.bf16.mxu1 %vm3298_vm0, %v7216_v41 }
 0x368   :  { %7743 = vmatmul.mubr.msk.bf16.gmra.mxu1 %vm3298_vm0, %v7217_v21 }
 0x37e   :  { %v7606_v18 = vpop.f32.mrf.mxu0 }
 0x380   :  { %v4422_v38 = vpop.f32.mrf.mxu0 }
 0x382   :  { %v7607_v29 = vpop.f32.mrf.mxu0 }
 0x384   :  { %v4425_v60 = vpop.f32.mrf.mxu0 }
 0x386   :  { %v7610_v17 = vpop.f32.mrf.mxu0 }
 0x387   :  { %v7588_v14 = vpop.f32.mrf.mxu1 }
 0x388   :  { %v4431_v52 = vadd.f32 %v7606_v18, %v7588_v14  ;;  %v4438_v43 = vpop.f32.mrf.mxu0 }
 0x389   :  { %v4258_v47 = vpop.f32.mrf.mxu1 }
 0x38a   :  { %v4423_v10 = vadd.f32 %v4422_v38, %v4258_v47  ;;  %v7611_v2 = vpop.f32.mrf.mxu0 }
 0x38b   :  { %v7589_v56 = vpop.f32.mrf.mxu1 }
 0x38c   :  { %v4434_v30 = vadd.f32 %v7607_v29, %v7589_v56  ;;  %v4441_v49 = vpop.f32.mrf.mxu0 }
 0x38d   :  { %v4261_v42 = vpop.f32.mrf.mxu1 }
 0x38e   :  { %v4426_v15 = vadd.f32 %v4425_v60, %v4261_v42  ;;  %v7614_v48 = vpop.f32.mrf.mxu0 }
 0x38f   :  { %v7592_v57 = vpop.f32.mrf.mxu1 }
 0x390   :  { %v4447_v37 = vadd.f32 %v7610_v17, %v7592_v57  ;;  %v4454_v34 = vpop.f32.mrf.mxu0 }
 0x391   :  { %v4274_v26 = vpop.f32.mrf.mxu1 }
 0x392   :  { %v4439_v4 = vadd.f32 %v4438_v43, %v4274_v26  ;;  %v7615_v11 = vpop.f32.mrf.mxu0 }
 0x393   :  { %v7593_v58 = vpop.f32.mrf.mxu1 }
 0x394   :  { %v4450_v16 = vadd.f32 %v7611_v2, %v7593_v58  ;;  %v4457_v36 = vpop.f32.mrf.mxu0 }
 0x395   :  { %v4277_v28 = vpop.f32.mrf.mxu1 }
 0x396   :  { %v4442_v53 = vadd.f32 %v4441_v49, %v4277_v28  ;;  %v7618_v35 = vpop.f32.mrf.mxu0 }
 0x397   :  { %v7596_v24 = vpop.f32.mrf.mxu1 }
 0x398   :  { %v4463_v32 = vadd.f32 %v7614_v48, %v7596_v24  ;;  %v4470_v62 = vpop.f32.mrf.mxu0 }
 0x399   :  { %v4290_v59 = vpop.f32.mrf.mxu1 }
 0x39a   :  { %v4455_v46 = vadd.f32 %v4454_v34, %v4290_v59  ;;  %v7619_v50 = vpop.f32.mrf.mxu0 }
 0x39b   :  { %v7597_v9 = vpop.f32.mrf.mxu1 }
 0x39c   :  { %v4466_v23 = vadd.f32 %v7615_v11, %v7597_v9  ;;  %v4473_v3 = vpop.f32.mrf.mxu0 }
 0x39d   :  { %v4293_v51 = vpop.f32.mrf.mxu1 }
 0x39e   :  { %v4458_v22 = vadd.f32 %v4457_v36, %v4293_v51  ;;  %v7642_v5 = vpop.f32.mrf.mxu0 }
 0x39f   :  { %v7600_v25 = vpop.f32.mrf.mxu1 }
 0x3a0   :  { %v4479_v6 = vadd.f32 %v7618_v35, %v7600_v25  ;;  %v10574_v45 = vpop.f32.mrf.mxu0 }
 0x3a1   :  { %v4306_v63 = vpop.f32.mrf.mxu1 }
 0x3a2   :  { %v4471_v54 = vadd.f32 %v4470_v62, %v4306_v63  ;;  %v10576_v12 = vpop.f32.mrf.mxu0 }
 0x3a3   :  { %v7601_v0 = vpop.f32.mrf.mxu1 }
 0x3a4   :  { %v4482_v19 = vadd.f32 %v7619_v50, %v7601_v0  ;;  %v10578_v7 = vpop.f32.mrf.mxu0 }
 0x3a5   :  { %v4309_v33 = vpop.f32.mrf.mxu1 }
 0x3a6   :  { %v4474_v31 = vadd.f32 %v4473_v3, %v4309_v33  ;;  %v7646_v27 = vpop.f32.mrf.mxu0 }
 0x3a7   :  { %v7624_v8 = vpop.f32.mrf.mxu1 }
 0x3a8   :  { %v4749_v39 = vadd.f32 %v7624_v8, %v4431_v52  ;;  %v10580_v61 = vpop.f32.mrf.mxu0 }
 0x3a9   :  { %v4684_v44 = vpop.f32.mrf.mxu1 }
 0x3aa   :  { %v10582_v41 = vadd.f32 %v4684_v44, %v4423_v10  ;;  %v10584_v20 = vpop.f32.mrf.mxu0  ;;  %v4947_v1 = vadd.f32 %v7642_v5, %v4749_v39 }
 0x3ab   :  { %v7625_v13 = vpop.f32.mrf.mxu1 }
 0x3ac   :  { %v10586_v40 = vadd.f32 %v7625_v13, %v4434_v30  ;;  %v10588_v55 = vpop.f32.mrf.mxu0 }
 0x3ad   :  { %v4687_v21 = vpop.f32.mrf.mxu1 }
 0x3ae   :  { %v10590_v18 = vadd.f32 %v4687_v21, %v4426_v15  ;;  %v7650_v38 = vpop.f32.mrf.mxu0 }
 0x3af   :  { %v7628_v29 = vpop.f32.mrf.mxu1 }
 0x3b0   :  { %v4753_v60 = vadd.f32 %v7628_v29, %v4447_v37  ;;  %v10592_v17 = vpop.f32.mrf.mxu0 }
 0x3b1   :  { %v4700_v14 = vpop.f32.mrf.mxu1 }
 0x3b2   :  { %v10594_v52 = vadd.f32 %v4700_v14, %v4439_v4  ;;  %v10596_v43 = vpop.f32.mrf.mxu0  ;;  %v4951_v47 = vadd.f32 %v7646_v27, %v4753_v60 }
 0x3b3   :  { %v7629_v10 = vpop.f32.mrf.mxu1 }
 0x3b4   :  { %v10598_v2 = vadd.f32 %v7629_v10, %v4450_v16  ;;  %v10600_v56 = vpop.f32.mrf.mxu0 }
 0x3b5   :  { %v4703_v30 = vpop.f32.mrf.mxu1 }
 0x3b6   :  { %v10602_v49 = vadd.f32 %v4703_v30, %v4442_v53  ;;  %v7654_v42 = vpop.f32.mrf.mxu0 }
 0x3b7   :  { %v7632_v15 = vpop.f32.mrf.mxu1 }
 0x3b8   :  { %v4757_v48 = vadd.f32 %v7632_v15, %v4463_v32  ;;  %v10604_v57 = vpop.f32.mrf.mxu0 }
 0x3b9   :  { %v4716_v37 = vpop.f32.mrf.mxu1 }
 0x3ba   :  { %v10606_v34 = vadd.f32 %v4716_v37, %v4455_v46  ;;  %v10608_v26 = vpop.f32.mrf.mxu0  ;;  %v4955_v4 = vadd.f32 %v7650_v38, %v4757_v48 }
 0x3bb   :  { %v7633_v11 = vpop.f32.mrf.mxu1 }
 0x3bc   :  { %v10610_v58 = vadd.f32 %v7633_v11, %v4466_v23  ;;  %v10612_v16 = vpop.f32.mrf.mxu0 }
 0x3bd   :  { %11139 = vst [vmem:[#allocation11_spill] sm:$0xff] %v10612_v16  ;;  %v4719_v36 = vpop.f32.mrf.mxu1 }
 0x3be   :  { %v10614_v28 = vadd.f32 %v4719_v36, %v4458_v22  ;;  %v10616_v53 = vpop.f32.mrf.mxu0 }
 0x3bf   :  { %v7636_v35 = vpop.f32.mrf.mxu1 }
 0x3c0   :  { %v4761_v24 = vadd.f32 %v7636_v35, %v4479_v6  ;;  %v10618_v32 = vpop.f32.mrf.mxu0 }
 0x3c1   :  { %v4732_v62 = vpop.f32.mrf.mxu1 }
 0x3c2   :  { %v10620_v59 = vadd.f32 %v4732_v62, %v4471_v54  ;;  %v10622_v46 = vpop.f32.mrf.mxu0  ;;  %v4959_v50 = vadd.f32 %v7654_v42, %v4761_v24 }
 0x3c3   :  { %v7637_v9 = vpop.f32.mrf.mxu1 }
 0x3c4   :  { %v10624_v23 = vadd.f32 %v7637_v9, %v4482_v19  ;;  %v10626_v3 = vpop.f32.mrf.mxu0 }
 0x3c5   :  { %v4735_v51 = vpop.f32.mrf.mxu1 }
 0x3c6   :  { %v10628_v22 = vadd.f32 %v4735_v51, %v4474_v31  ;;  %v10630_v5 = vpop.f32.mrf.mxu0 }
 0x3c7   :  { %v7660_v25 = vpop.f32.mrf.mxu1 }
 0x3c8   :  { %11140 = vst [vmem:[#allocation17_spill] sm:$0xff] %v10628_v22  ;;  %v5369_v6 = vadd.f32 %v7660_v25, %v4947_v1  ;;  %v10632_v63 = vpop.f32.mrf.mxu0 }
 0x3c9   :  { %v5304_v0 = vpop.f32.mrf.mxu1 }
 0x3ca   :  { %v10634_v54 = vpop.f32.mrf.mxu0 }
 0x3cb   :  { %v7661_v33 = vpop.f32.mrf.mxu1 }
 0x3cc   :  { %v10636_v27 = vpop.f32.mrf.mxu0 }
 0x3cd   :  { %v5307_v8 = vpop.f32.mrf.mxu1 }
 0x3ce   :  { %v10638_v39 = vpop.f32.mrf.mxu0 }
 0x3cf   :  { %v7664_v19 = vpop.f32.mrf.mxu1  ;;  %11141 = vst [vmem:[#allocation13_spill] sm:$0xff] %v10638_v39 }
 0x3d0   :  { %v10640_v44 = vadd.f32 %v7664_v19, %v4951_v47  ;;  %v10644_v21 = vpop.f32.mrf.mxu0 }
 0x3d1   :  { %v5320_v31 = vpop.f32.mrf.mxu1  ;;  %11142 = vst [vmem:[#allocation19_spill] sm:$0xff] %v10644_v21 }
 0x3d2   :  { %v10648_v29 = vpop.f32.mrf.mxu0 }
 0x3d3   :  { %v10642_v13 = vpop.f32.mrf.mxu1  ;;  %11143 = vst [vmem:[#allocation14_spill] sm:$0xff] %v10648_v29 }
 0x3d4   :  { %v10652_v14 = vpop.f32.mrf.mxu0 }
 0x3d5   :  { %v10646_v1 = vpop.f32.mrf.mxu1  ;;  %11145 = vst [vmem:[#allocation20_spill] sm:$0xff] %v10652_v14  ;;  %v4945_v14 = vadd.f32 %v10574_v45, %v10582_v41 }
 0x3d6   :  { %v10656_v30 = vpop.f32.mrf.mxu0 }
 0x3d7   :  { %v7668_v38 = vpop.f32.mrf.mxu1  ;;  %11146 = vst [vmem:[#allocation24_spill] sm:$0xff] %v10656_v30 }
 0x3d8   :  { %v10650_v60 = vadd.f32 %v7668_v38, %v4955_v4  ;;  %v10660_v42 = vpop.f32.mrf.mxu0 }
 0x3d9   :  { %v10654_v10 = vpop.f32.mrf.mxu1  ;;  %11147 = vst [vmem:[#allocation25_spill] sm:$0xff] %v10660_v42 }
 0x3da   :  { %11144 = vst [vmem:[#allocation18_spill] sm:$0xff] %v10650_v60  ;;  %v10664_v48 = vpop.f32.mrf.mxu0 }
 0x3db   :  { %v10658_v47 = vpop.f32.mrf.mxu1  ;;  %11149 = vst [vmem:[#allocation27_spill] sm:$0xff] %v10664_v48 }
 0x3dc   :  { %v10670_v4 = vpop.f32.mrf.mxu0 }
 0x3dd   :  { %v10662_v15 = vpop.f32.mrf.mxu1  ;;  %11152 = vst [vmem:[#allocation30_spill] sm:$0xff] %v10670_v4 }
 0x3de   :  { %11148 = vst [vmem:[#allocation22_spill] sm:$0xff] %v10662_v15 }
 0x3e3   :  { %v7714_v62 = vpop.f32.mrf.mxu0 }
 0x3e5   :  { %v6203_v25 = vpop.f32.mrf.mxu0 }
 0x3e7   :  { %v7715_v30 = vpop.f32.mrf.mxu0 }
 0x3e8   :  { %v7672_v37 = vpop.f32.mrf.mxu1 }
 0x3e9   :  { %v10666_v11 = vadd.f32 %v7672_v37, %v4959_v50  ;;  %v6206_v16 = vpop.f32.mrf.mxu0 }
 0x3ea   :  { %v10668_v36 = vpop.f32.mrf.mxu1 }
 0x3eb   :  { %11150 = vst [vmem:[#allocation23_spill] sm:$0xff] %v10666_v11  ;;  %11151 = vst [vmem:[#allocation29_spill] sm:$0xff] %v10668_v36  ;;  %v5367_v36 = vadd.f32 %v5304_v0, %v4945_v14  ;;  %v4949_v0 = vadd.f32 %v10580_v61, %v10594_v52  ;;  %v5647_v14 = vadd.f32 %v10616_v53, %v5369_v6 }
 0x3ec   :  { %v10672_v35 = vpop.f32.mrf.mxu1  ;;  %v4950_v61 = vadd.f32 %v10588_v55, %v10602_v49 }
 0x3ed   :  { %11153 = vst [vmem:[#allocation15_spill] sm:$0xff] %v10672_v35  ;;  %v5645_v15 = vadd.f32 %v10618_v32, %v5367_v36  ;;  %v4952_v32 = vadd.f32 %v10584_v20, %v10598_v2  ;;  %v4953_v20 = vadd.f32 %v10592_v17, %v10606_v34  ;;  %v5651_v2 = vadd.f32 %v10630_v5, %v10640_v44  ;;  %v10736_v17 = vld [vmem:[%s11019_s6] ss:$0 sm:$0xff] }
 0x3ee   :  { %v10674_v24 = vpop.f32.mrf.mxu1  ;;  %v5372_v36 = vadd.f32 %v10646_v1, %v4950_v61  ;;  %v4956_v1 = vadd.f32 %v10596_v43, %v10610_v58  ;;  %v4957_v43 = vadd.f32 %v10604_v57, %v10620_v59  ;;  %v4960_v58 = vadd.f32 %v10608_v26, %v10624_v23  ;;  %v11160_v57 = vld [vmem:[#allocation22_spill] sm:$0xff] }
 0x3ef   :  { %11154 = vst [vmem:[#allocation16_spill] sm:$0xff] %v10674_v24 }
 0x3f0   :  { %v7696_v9 = vpop.f32.mrf.mxu1  ;;  %v5650_v5 = vadd.f32 %v10636_v27, %v5372_v36 }
 0x3f2   :  { %v5781_v51 = vpop.f32.mrf.mxu1  ;;  %v11166_v36 = vld [vmem:[#allocation29_spill] sm:$0xff] }
 0x3f4   :  { %v7697_v19 = vpop.f32.mrf.mxu1 }
 0x3f6   :  { %v5784_v38 = vpop.f32.mrf.mxu1 }
 0x3f7   :  { %v10680_v11 = vpop.f32.mrf.mxu0 }
 0x3f8   :  { %v7700_v42 = vpop.f32.mrf.mxu1  ;;  %11155 = vst [vmem:[#allocation26_spill] sm:$0xff] %v10680_v11  ;;  %v4948_v11 = vadd.f32 %v10576_v12, %v10586_v40  ;;  %v5371_v40 = vadd.f32 %v5320_v31, %v4949_v0 }
 0x3f9   :  { %v10686_v24 = vpop.f32.mrf.mxu0 }
 0x3fa   :  { %v5797_v48 = vpop.f32.mrf.mxu1  ;;  %v5370_v21 = vadd.f32 %v7661_v33, %v4948_v11 }
 0x3fb   :  { %v10694_v39 = vpop.f32.mrf.mxu0 }
 0x3fc   :  { %v10676_v50 = vpop.f32.mrf.mxu1 }
 0x3fd   :  { %v10705_v45 = vpop.f32.mrf.mxu0 }
 0x3fe   :  { %v10678_v37 = vpop.f32.mrf.mxu1 }
 0x3ff   :  { %v5849_v27 = vadd.f32 %v10678_v37, %v5650_v5  ;;  %v11162_v23 = vld [vmem:[#allocation26_spill] sm:$0xff] }
 0x400   :  { %v10682_v4 = vpop.f32.mrf.mxu1 }
 0x401   :  { %11156 = vst [vmem:[#allocation28_spill] sm:$0xff] %v10682_v4  ;;  %v4946_v4 = vadd.f32 %v10578_v7, %v10590_v18  ;;  %v5846_v7 = vadd.f32 %v7696_v9, %v5647_v14  ;;  %v5648_v18 = vadd.f32 %v10622_v46, %v5370_v21  ;;  %v5649_v46 = vadd.f32 %v10632_v63, %v5371_v40 }
 0x402   :  { %v10684_v35 = vpop.f32.mrf.mxu1  ;;  %v5850_v63 = vadd.f32 %v7700_v42, %v5651_v2 }
 0x403   :  { %11157 = vst [vmem:[#allocation31_spill] sm:$0xff] %v10684_v35  ;;  %v5847_v52 = vadd.f32 %v7697_v19, %v5648_v18  ;;  %v5848_v49 = vadd.f32 %v5797_v48, %v5649_v46  ;;  %v11161_v19 = vld [vmem:[#allocation19_spill] sm:$0xff]  ;;  %v5379_v46 = vadd.f32 %v11166_v36, %v4957_v43 }
 0x404   :  { %v10688_v22 = vpop.f32.mrf.mxu1 }
 0x405   :  { %11158 = vst [vmem:[#allocation5_spill] sm:$0xff] %v10688_v22  ;;  %v5368_v22 = vadd.f32 %v5307_v8, %v4946_v4  ;;  %v10718_v8 = vpop.f32.mrf.mxu0 }
 0x406   :  { %v10692_v29 = vpop.f32.mrf.mxu1 }
 0x407   :  { %v5646_v33 = vadd.f32 %v10626_v3, %v5368_v22  ;;  %v6268_v3 = vadd.f32 %v7714_v62, %v5846_v7  ;;  %v6235_v21 = vpop.f32.mrf.mxu0  ;;  %v11163_v7 = vld [vmem:[#allocation18_spill] sm:$0xff] }
 0x408   :  { %v10696_v60 = vpop.f32.mrf.mxu1 }
 0x409   :  { %11159 = vst [vmem:[#allocation12_spill] sm:$0xff] %v10696_v60  ;;  %v5844_v60 = vadd.f32 %v5781_v51, %v5645_v15  ;;  %v5845_v53 = vadd.f32 %v5784_v38, %v5646_v33  ;;  %v5374_v15 = vadd.f32 %v10642_v13, %v4952_v32  ;;  %v5375_v13 = vadd.f32 %v10654_v10, %v4953_v20  ;;  %v11168_v20 = vld [vmem:[#allocation20_spill] sm:$0xff] }
 0x40a   :  { %v10702_v35 = vpop.f32.mrf.mxu1  ;;  %v4954_v10 = vadd.f32 %v10600_v56, %v10614_v28  ;;  %v6270_v56 = vadd.f32 %v10686_v24, %v5848_v49  ;;  %v5378_v28 = vadd.f32 %v10658_v47, %v4956_v1  ;;  %v6272_v38 = vadd.f32 %v11162_v23, %v5850_v63  ;;  %v11164_v47 = vld [vmem:[#allocation13_spill] sm:$0xff]  ;;  %v11165_v33 = vld [vmem:[#allocation31_spill] sm:$0xff] }
 0x40b   :  { %v6266_v6 = vadd.f32 %v6203_v25, %v5844_v60  ;;  %v6269_v60 = vadd.f32 %v7715_v30, %v5847_v52  ;;  %v6267_v9 = vadd.f32 %v6206_v16, %v5845_v53  ;;  %v5652_v62 = vadd.f32 %v10634_v54, %v5374_v15  ;;  %v7723_v54 = vpop.f32.mrf.mxu0  ;;  %v11170_v1 = vld [vmem:[#allocation17_spill] sm:$0xff]  ;;  %v11171_v63 = vld [vmem:[#allocation11_spill] sm:$0xff] }
 0x40c   :  { %v10707_v41 = vpop.f32.mrf.mxu1  ;;  %v5376_v59 = vadd.f32 %v11160_v57, %v4954_v10  ;;  %v5653_v26 = vadd.f32 %v11161_v19, %v5375_v13  ;;  %v5655_v18 = vadd.f32 %v11164_v47, %v11163_v7  ;;  %v11174_v57 = vld [vmem:[#allocation16_spill] sm:$0xff]  ;;  %v11175_v19 = vld [vmem:[#allocation25_spill] sm:$0xff] }
 0x40d   :  { %v5851_v42 = vadd.f32 %v10676_v50, %v5652_v62  ;;  %v6238_v24 = vpop.f32.mrf.mxu0  ;;  %v4958_v62 = vadd.f32 %v11171_v63, %v11170_v1  ;;  %v11177_v7 = vld [vmem:[#allocation24_spill] sm:$0xff] }
 0x40e   :  { %v10712_v12 = vpop.f32.mrf.mxu1  ;;  %v5852_v32 = vadd.f32 %v11165_v33, %v5653_v26  ;;  %v5654_v2 = vadd.f32 %v11168_v20, %v5376_v59  ;;  %v5657_v26 = vadd.f32 %v11175_v19, %v5379_v46 }
 0x40f   :  { %v6273_v61 = vadd.f32 %v10694_v39, %v5851_v42  ;;  %v5380_v59 = vadd.f32 %v11174_v57, %v4958_v62 }
 0x410   :  { %v7732_v11 = vpop.f32.mrf.mxu1  ;;  %v6274_v10 = vadd.f32 %v6235_v21, %v5852_v32  ;;  %v5853_v43 = vadd.f32 %v10692_v29, %v5654_v2 }
 0x411   :  { %v6546_v4 = vadd.f32 %v7732_v11, %v6268_v3  ;;  %v11167_v3 = vld [vmem:[#allocation14_spill] sm:$0xff] }
 0x412   :  { %v6481_v31 = vpop.f32.mrf.mxu1 }
 0x413   :  { %v6544_v22 = vadd.f32 %v6481_v31, %v6266_v6  ;;  %v10751_v51 = vadd.f32 %v10736_v17, %v6546_v4  ;;  %v6271_v31 = vadd.f32 %v10705_v45, %v5849_v27  ;;  %v11169_v4 = vld [vmem:[#allocation28_spill] sm:$0xff]  ;;  %v11172_v45 = vld [vmem:[#allocation5_spill] sm:$0xff] }
 0x414   :  { %v7733_v55 = vpop.f32.mrf.mxu1  ;;  %v5854_v39 = vadd.f32 %v11169_v4, %v5655_v18 }
 0x415   :  { %v10740_v44 = vadd.f32 %v10736_v17, %v6544_v22  ;;  %v6547_v16 = vadd.f32 %v7733_v55, %v6269_v60  ;;  %v6586_v53 = vsel %vm3298_vm0, %v10751_v51, 0.0  ;;  %v5656_v22 = vadd.f32 %v11167_v3, %v5378_v28 }
 0x416   :  { %v6484_v34 = vpop.f32.mrf.mxu1 }
 0x417   :  { %v6545_v30 = vadd.f32 %v6484_v34, %v6267_v9  ;;  %v6583_v37 = vsel %vm3298_vm0, %v10740_v44, 0.0  ;;  %v10764_v0 = vadd.f32 %v10736_v17, %v6547_v16  ;;  %v7726_v34 = vpop.f32.mrf.mxu0  ;;  %v5855_v5 = vadd.f32 %v11172_v45, %v5656_v22  ;;  %v11180_v22 = vld [vmem:[#allocation12_spill] sm:$0xff] }
 0x418   :  { %v7736_v48 = vpop.f32.mrf.mxu1 }
 0x419   :  { %v10754_v25 = vadd.f32 %v10736_v17, %v6545_v30  ;;  %v6550_v6 = vadd.f32 %v7736_v48, %v6272_v38  ;;  %v6588_v60 = vsel %vm3298_vm0, %v10764_v0, 0.0  ;;  %v6277_v33 = vadd.f32 %v7723_v54, %v5855_v5 }
 0x41a   :  { %v6497_v50 = vpop.f32.mrf.mxu1 }
 0x41b   :  { %v6584_v14 = vsel %vm3298_vm0, %v10754_v25, 0.0  ;;  %v6548_v40 = vadd.f32 %v6497_v50, %v6270_v56  ;;  %v10789_v42 = vadd.f32 %v10736_v17, %v6550_v6  ;;  %v11173_v56 = vld [vmem:[#allocation15_spill] sm:$0xff]  ;;  %v6276_v50 = vadd.f32 %v10718_v8, %v5854_v39 }
 0x41c   :  { %v6585_v11 = vadd.f32 %v6584_v14, %v6583_v37  ;;  %v7737_v52 = vpop.f32.mrf.mxu1  ;;  %v5382_v28 = vadd.f32 %v11173_v56, %v4960_v58  ;;  %v6251_v14 = vpop.f32.mrf.mxu0  ;;  %v5856_v58 = vadd.f32 %v10702_v35, %v5657_v26  ;;  %v11178_v6 = vld [vmem:[#allocation27_spill] sm:$0xff] }
 0x41d   :  { %v10775_v15 = vadd.f32 %v10736_v17, %v6548_v40  ;;  %v6551_v9 = vadd.f32 %v7737_v52, %v6273_v61  ;;  %v11176_v40 = vld [vmem:[#allocation23_spill] sm:$0xff] }
 0x41e   :  { %v6587_v55 = vadd.f32 %v6586_v53, %v6585_v11  ;;  %v6500_v49 = vpop.f32.mrf.mxu1  ;;  %v5659_v47 = vadd.f32 %v11177_v7, %v11176_v40  ;;  %v6594_v11 = vsel %vm3298_vm0, %v10789_v42, 0.0  ;;  %v6275_v53 = vadd.f32 %v6238_v24, %v5853_v43 }
 0x41f   :  { %v6549_v13 = vadd.f32 %v6500_v49, %v6271_v31  ;;  %v6590_v48 = vsel %vm3298_vm0, %v10775_v15, 0.0  ;;  %v10800_v21 = vadd.f32 %v10736_v17, %v6551_v9  ;;  %v5660_v8 = vadd.f32 %v11178_v6, %v5382_v28  ;;  %v11179_v31 = vld [vmem:[#allocation30_spill] sm:$0xff] }
 0x420   :  { %v6589_v16 = vadd.f32 %v6588_v60, %v6587_v55  ;;  %v7740_v30 = vpop.f32.mrf.mxu1  ;;  %v5658_v36 = vadd.f32 %v11179_v31, %v5380_v59  ;;  %v5858_v20 = vadd.f32 %v11180_v22, %v5659_v47  ;;  %v7727_v55 = vpop.f32.mrf.mxu0  ;;  %v6278_v60 = vadd.f32 %v6251_v14, %v5856_v58 }
 0x421   :  { %v10794_v27 = vadd.f32 %v10736_v17, %v6549_v13  ;;  %v6554_v61 = vadd.f32 %v7740_v30, %v6276_v50  ;;  %v6596_v35 = vsel %vm3298_vm0, %v10800_v21, 0.0  ;;  %v5859_v49 = vadd.f32 %v10707_v41, %v5660_v8 }
 0x422   :  { %v6591_v23 = vadd.f32 %v6590_v48, %v6589_v16  ;;  %v6513_v38 = vpop.f32.mrf.mxu1  ;;  %v5857_v24 = vadd.f32 %v10712_v12, %v5658_v36  ;;  %v6280_v16 = vadd.f32 %v7726_v34, %v5858_v20  ;;  %v6254_v30 = vpop.f32.mrf.mxu0 }
 0x423   :  { %v6592_v29 = vsel %vm3298_vm0, %v10794_v27, 0.0  ;;  %v6552_v37 = vadd.f32 %v6513_v38, %v6274_v10  ;;  %v6577_v9 = vadd.f32 %v10736_v17, %v6554_v61  ;;  %v6281_v43 = vadd.f32 %v7727_v55, %v5859_v49 }
 0x424   :  { %v6593_v18 = vadd.f32 %v6592_v29, %v6591_v23  ;;  %v7741_v32 = vpop.f32.mrf.mxu1  ;;  %v6279_v57 = vadd.f32 %v6254_v30, %v5857_v24 }
 0x425   :  { %v10811_v52 = vadd.f32 %v10736_v17, %v6552_v37  ;;  %v6555_v54 = vadd.f32 %v7741_v32, %v6277_v33  ;;  %v6602_v12 = vsel %vm3298_vm0, %v6577_v9, 0.0 }
 0x426   :  { %v6595_v46 = vadd.f32 %v6594_v11, %v6593_v18  ;;  %v6516_v3 = vpop.f32.mrf.mxu1 }
 0x427   :  { %v6553_v2 = vadd.f32 %v6516_v3, %v6275_v53  ;;  %v6598_v13 = vsel %vm3298_vm0, %v10811_v52, 0.0  ;;  %v6578_v45 = vadd.f32 %v10736_v17, %v6555_v54 }
 0x428   :  { %v6597_v4 = vadd.f32 %v6596_v35, %v6595_v46  ;;  %v7744_v39 = vpop.f32.mrf.mxu1 }
 0x429   :  { %v6576_v1 = vadd.f32 %v10736_v17, %v6553_v2  ;;  %v6558_v56 = vadd.f32 %v7744_v39, %v6280_v16  ;;  %v6604_v26 = vsel %vm3298_vm0, %v6578_v45, 0.0 }
 0x42a   :  { %v6599_v63 = vadd.f32 %v6598_v13, %v6597_v4  ;;  %v6529_v62 = vpop.f32.mrf.mxu1 }
 0x42b   :  { %v6600_v5 = vsel %vm3298_vm0, %v6576_v1, 0.0  ;;  %v6556_v41 = vadd.f32 %v6529_v62, %v6278_v60  ;;  %v6581_v34 = vadd.f32 %v10736_v17, %v6558_v56 }
 0x42c   :  { %v6601_v10 = vadd.f32 %v6600_v5, %v6599_v63  ;;  %v7745_v48 = vpop.f32.mrf.mxu1 }
 0x42d   :  { %v6579_v28 = vadd.f32 %v10736_v17, %v6556_v41  ;;  %v6559_v23 = vadd.f32 %v7745_v48, %v6281_v43  ;;  %v6610_v58 = vsel %vm3298_vm0, %v6581_v34, 0.0 }
 0x42e   :  { %v6603_v59 = vadd.f32 %v6602_v12, %v6601_v10  ;;  %v6532_v19 = vpop.f32.mrf.mxu1 }
 0x42f   :  { %v6557_v38 = vadd.f32 %v6532_v19, %v6279_v57  ;;  %v6606_v50 = vsel %vm3298_vm0, %v6579_v28, 0.0  ;;  %v6582_v40 = vadd.f32 %v10736_v17, %v6559_v23 }
 0x430   :  { %v6605_v29 = vadd.f32 %v6604_v26, %v6603_v59 }
 0x431   :  { %v6580_v37 = vadd.f32 %v10736_v17, %v6557_v38  ;;  %v6612_v33 = vsel %vm3298_vm0, %v6582_v40, 0.0 }
 0x432   :  { %v6607_v14 = vadd.f32 %v6606_v50, %v6605_v29 }
 0x433   :  { %v6608_v7 = vsel %vm3298_vm0, %v6580_v37, 0.0 }
 0x434   :  { %v6609_v47 = vadd.f32 %v6608_v7, %v6607_v14 }
 0x436   :  { %v6611_v18 = vadd.f32 %v6610_v58, %v6609_v47 }
 0x438   :  { %v6613_v32 = vadd.f32 %v6612_v33, %v6611_v18 }
 0x43a   :  { %v6614_v11 = vrot.slane %v6613_v32, 4 }
 0x43c   :  { %v6615_v61 = vadd.f32 %v6614_v11, %v6613_v32 }
 0x43e   :  { %v6616_v53 = vrot.slane %v6615_v61, 2 }
 0x440   :  { %v6617_v6 = vadd.f32 %v6616_v53, %v6615_v61 }
 0x442   :  { %v6618_v8 = vrot.slane %v6617_v6, 1 }
 0x444   :  { %v6619_v31 = vadd.f32 %v6618_v8, %v6617_v6 }
 0x446   :  { %v6620_v36 = vmul.f32 0.0078125, %v6619_v31 }
 0x448   :  { %v10837_v46 = vsub.f32 %v10740_v44, %v6620_v36  ;;  %v10840_v17 = vsub.f32 %v10754_v25, %v6620_v36  ;;  %v10843_v3 = vsub.f32 %v10751_v51, %v6620_v36  ;;  %v10846_v22 = vsub.f32 %v10764_v0, %v6620_v36 }
 0x449   :  { %v10849_v20 = vsub.f32 %v10775_v15, %v6620_v36  ;;  %v10852_v35 = vsub.f32 %v10794_v27, %v6620_v36  ;;  %v10855_v54 = vsub.f32 %v10789_v42, %v6620_v36  ;;  %v10858_v44 = vsub.f32 %v10800_v21, %v6620_v36 }
 0x44a   :  { %v10861_v25 = vsub.f32 %v10811_v52, %v6620_v36  ;;  %v10863_v51 = vsub.f32 %v6576_v1, %v6620_v36  ;;  %v10865_v2 = vsub.f32 %v6577_v9, %v6620_v36  ;;  %v10867_v0 = vsub.f32 %v6578_v45, %v6620_v36 }
 0x44b   :  { %v10869_v15 = vsub.f32 %v6579_v28, %v6620_v36  ;;  %v10871_v55 = vsub.f32 %v6580_v37, %v6620_v36  ;;  %v10873_v27 = vsub.f32 %v6581_v34, %v6620_v36  ;;  %v10875_v42 = vsub.f32 %v6582_v40, %v6620_v36 }
 0x44c   :  { %v6637_v21 = vmul.f32 %v10837_v46, %v10837_v46  ;;  %v6638_v52 = vmul.f32 %v10840_v17, %v10840_v17  ;;  %v6639_v49 = vmul.f32 %v10843_v3, %v10843_v3  ;;  %v6640_v4 = vmul.f32 %v10846_v22, %v10846_v22 }
 0x44d   :  { %v6641_v9 = vmul.f32 %v10849_v20, %v10849_v20  ;;  %v6642_v63 = vmul.f32 %v10852_v35, %v10852_v35  ;;  %v6643_v5 = vmul.f32 %v10855_v54, %v10855_v54  ;;  %v6644_v30 = vmul.f32 %v10858_v44, %v10858_v44 }
 0x44e   :  { %v6653_v39 = vsel %vm3298_vm0, %v6637_v21, 0.0  ;;  %v6654_v60 = vsel %vm3298_vm0, %v6638_v52, 0.0  ;;  %v6656_v13 = vsel %vm3298_vm0, %v6639_v49, 0.0  ;;  %v6658_v62 = vsel %vm3298_vm0, %v6640_v4, 0.0 }
 0x44f   :  { %v6655_v24 = vadd.f32 %v6654_v60, %v6653_v39  ;;  %v6660_v16 = vsel %vm3298_vm0, %v6641_v9, 0.0  ;;  %v6662_v10 = vsel %vm3298_vm0, %v6642_v63, 0.0  ;;  %v6645_v48 = vmul.f32 %v10861_v25, %v10861_v25  ;;  %v6691_v9 = vld [vmem:[%s11020_s7] sm:$0x1]  ;;  %v11181_v63 = vld [vmem:[#allocation7_spill] sm:$0xff] }
 0x450   :  { %v6664_v12 = vsel %vm3298_vm0, %v6643_v5, 0.0  ;;  %v6646_v28 = vmul.f32 %v10863_v51, %v10863_v51  ;;  %v6666_v57 = vsel %vm3298_vm0, %v6644_v30, 0.0  ;;  %v6647_v19 = vmul.f32 %v10865_v2, %v10865_v2 }
 0x451   :  { %v6657_v1 = vadd.f32 %v6656_v13, %v6655_v24  ;;  %v6668_v26 = vsel %vm3298_vm0, %v6645_v48, 0.0  ;;  %v6648_v38 = vmul.f32 %v10867_v0, %v10867_v0  ;;  %v6649_v50 = vmul.f32 %v10869_v15, %v10869_v15 }
 0x452   :  { %v6670_v29 = vsel %vm3298_vm0, %v6646_v28, 0.0  ;;  %v6672_v37 = vsel %vm3298_vm0, %v6647_v19, 0.0  ;;  %v6650_v40 = vmul.f32 %v10871_v55, %v10871_v55  ;;  %v6651_v58 = vmul.f32 %v10873_v27, %v10873_v27 }
 0x453   :  { %v6659_v45 = vadd.f32 %v6658_v62, %v6657_v1  ;;  %v6674_v7 = vsel %vm3298_vm0, %v6648_v38, 0.0  ;;  %v6676_v18 = vsel %vm3298_vm0, %v6649_v50, 0.0  ;;  %v6652_v32 = vmul.f32 %v10875_v42, %v10875_v42 }
 0x454   :  { %v6678_v11 = vsel %vm3298_vm0, %v6650_v40, 0.0  ;;  %v6680_v53 = vsel %vm3298_vm0, %v6651_v58, 0.0  ;;  %v11182_v62 = vsub.s32 0, %v11181_v63 }
 0x455   :  { %v6661_v41 = vadd.f32 %v6660_v16, %v6659_v45  ;;  %v6682_v8 = vsel %vm3298_vm0, %v6652_v32, 0.0 }
 0x457   :  { %v6663_v43 = vadd.f32 %v6662_v10, %v6661_v41 }
 0x459   :  { %v6665_v56 = vadd.f32 %v6664_v12, %v6663_v43 }
 0x45b   :  { %v6667_v59 = vadd.f32 %v6666_v57, %v6665_v56  ;;  %v7227_v56 = vld [vmem:[%s11021_s8] ss:$0 sm:$0xff] }
 0x45d   :  { %v6669_v23 = vadd.f32 %v6668_v26, %v6667_v59 }
 0x45f   :  { %v6671_v34 = vadd.f32 %v6670_v29, %v6669_v23 }
 0x461   :  { %v6673_v14 = vadd.f32 %v6672_v37, %v6671_v34 }
 0x463   :  { %v6675_v47 = vadd.f32 %v6674_v7, %v6673_v14 }
 0x465   :  { %v6677_v33 = vadd.f32 %v6676_v18, %v6675_v47 }
 0x467   :  { %v6679_v61 = vadd.f32 %v6678_v11, %v6677_v33 }
 0x469   :  { %v6681_v6 = vadd.f32 %v6680_v53, %v6679_v61 }
 0x46b   :  { %v6683_v31 = vadd.f32 %v6682_v8, %v6681_v6 }
 0x46d   :  { %v6684_v36 = vrot.slane %v6683_v31, 4 }
 0x46f   :  { %v6685_v21 = vadd.f32 %v6684_v36, %v6683_v31 }
 0x471   :  { %v6686_v52 = vrot.slane %v6685_v21, 2 }
 0x473   :  { %v6687_v49 = vadd.f32 %v6686_v52, %v6685_v21 }
 0x475   :  { %v6688_v4 = vrot.slane %v6687_v49, 1 }
 0x477   :  { %v6689_v39 = vadd.f32 %v6688_v4, %v6687_v49 }
 0x479   :  { %v6690_v60 = vmul.f32 0.0078125, %v6689_v39 }
 0x47b   :  { %v6692_v24 = vadd.f32 1e-05, %v6690_v60 }
 0x47d   :  { %7846 = vrsqrt.f32 %v6692_v24 }
 0x48a   :  { %v7847_v13 = vpop.eup %7846 }
 0x48b   :  { %v6694_v1 = vmul.f32 %v7847_v13, %v6691_v9 }
 0x48d   :  { %v6699_v45 = vrot.slane %v6694_v1, %v11182_v62 }
 0x48f   :  { %v6701_v5 = vmul.f32 %v6699_v45, %v10837_v46  ;;  %v6702_v16 = vmul.f32 %v6699_v45, %v10840_v17  ;;  %v6703_v41 = vmul.f32 %v6699_v45, %v10843_v3  ;;  %v6704_v30 = vmul.f32 %v6699_v45, %v10846_v22 }
 0x490   :  { %v6705_v10 = vmul.f32 %v6699_v45, %v10849_v20  ;;  %v6706_v43 = vmul.f32 %v6699_v45, %v10852_v35  ;;  %v6707_v48 = vmul.f32 %v6699_v45, %v10855_v54  ;;  %v6708_v12 = vmul.f32 %v6699_v45, %v10858_v44 }
 0x491   :  { %v6709_v46 = vmul.f32 %v6699_v45, %v10861_v25  ;;  %v6710_v17 = vmul.f32 %v6699_v45, %v10863_v51  ;;  %v6711_v3 = vmul.f32 %v6699_v45, %v10865_v2  ;;  %v6712_v22 = vmul.f32 %v6699_v45, %v10867_v0 }
 0x492   :  { %v6713_v20 = vmul.f32 %v6699_v45, %v10869_v15  ;;  %v6714_v35 = vmul.f32 %v6699_v45, %v10871_v55  ;;  %v6715_v54 = vmul.f32 %v6699_v45, %v10873_v27  ;;  %v6716_v44 = vmul.f32 %v6699_v45, %v10875_v42 }
 0x493   :  { %v6724_v28 = vadd.f32 %v7227_v56, %v6701_v5  ;;  %v6725_v57 = vadd.f32 %v7227_v56, %v6702_v16  ;;  %v6726_v59 = vadd.f32 %v7227_v56, %v6703_v41  ;;  %v6727_v19 = vadd.f32 %v7227_v56, %v6704_v30 }
 0x494   :  { %v6728_v26 = vadd.f32 %v7227_v56, %v6705_v10  ;;  %v6729_v25 = vadd.f32 %v7227_v56, %v6706_v43  ;;  %v6730_v23 = vadd.f32 %v7227_v56, %v6707_v48  ;;  %v6731_v51 = vadd.f32 %v7227_v56, %v6708_v12 }
 0x495   :  { %v6732_v38 = vadd.f32 %v7227_v56, %v6709_v46  ;;  %v6733_v2 = vadd.f32 %v7227_v56, %v6710_v17  ;;  %v6734_v29 = vadd.f32 %v7227_v56, %v6711_v3  ;;  %v6735_v0 = vadd.f32 %v7227_v56, %v6712_v22 }
 0x496   :  { %v6736_v34 = vadd.f32 %v7227_v56, %v6713_v20  ;;  %v6737_v15 = vadd.f32 %v7227_v56, %v6714_v35  ;;  %v6738_v50 = vadd.f32 %v7227_v56, %v6715_v54  ;;  %v6739_v55 = vadd.f32 %v7227_v56, %v6716_v44 }
 0x497   :  { %v6740_v37 = vmax.f32 %v6724_v28, 0.0  ;;  %v6741_v27 = vmax.f32 %v6725_v57, 0.0  ;;  %v6742_v14 = vmax.f32 %v6726_v59, 0.0  ;;  %v6743_v42 = vmax.f32 %v6727_v19, 0.0 }
 0x498   :  { %v6744_v40 = vmax.f32 %v6728_v26, 0.0  ;;  %v6745_v7 = vmax.f32 %v6729_v25, 0.0  ;;  %v6746_v47 = vmax.f32 %v6730_v23, 0.0  ;;  %v6747_v58 = vmax.f32 %v6731_v51, 0.0 }
 0x499   :  { %v6748_v18 = vmax.f32 %v6732_v38, 0.0  ;;  %v6749_v33 = vmax.f32 %v6733_v2, 0.0  ;;  %v6750_v32 = vmax.f32 %v6734_v29, 0.0  ;;  %v6751_v11 = vmax.f32 %v6735_v0, 0.0  ;;  %6756 = vst.msk [vmem:[%s11022_s9] sm:$0xff] %vm3298_vm0, %v6740_v37  ;;  %6757 = vst.msk [vmem:[%s11022_s9 + $0x8] sm:$0xff] %vm3298_vm0, %v6741_v27 }
 0x49a   :  { %6758 = vst.msk [vmem:[%s11022_s9 + $0x10] sm:$0xff] %vm3298_vm0, %v6742_v14  ;;  %6759 = vst.msk [vmem:[%s11022_s9 + $0x18] sm:$0xff] %vm3298_vm0, %v6743_v42  ;;  %v6752_v61 = vmax.f32 %v6736_v34, 0.0  ;;  %v6753_v53 = vmax.f32 %v6737_v15, 0.0  ;;  %v6754_v6 = vmax.f32 %v6738_v50, 0.0  ;;  %v6755_v8 = vmax.f32 %v6739_v55, 0.0 }
 0x49b   :  { %6760 = vst.msk [vmem:[%s11022_s9 + $0x20] sm:$0xff] %vm3298_vm0, %v6744_v40  ;;  %6761 = vst.msk [vmem:[%s11022_s9 + $0x28] sm:$0xff] %vm3298_vm0, %v6745_v7 }
 0x49c   :  { %6762 = vst.msk [vmem:[%s11022_s9 + $0x30] sm:$0xff] %vm3298_vm0, %v6746_v47  ;;  %6763 = vst.msk [vmem:[%s11022_s9 + $0x38] sm:$0xff] %vm3298_vm0, %v6747_v58 }
 0x49d   :  { %6764 = vst.msk [vmem:[%s11022_s9 + $0x40] sm:$0xff] %vm3298_vm0, %v6748_v18  ;;  %6765 = vst.msk [vmem:[%s11022_s9 + $0x48] sm:$0xff] %vm3298_vm0, %v6749_v33 }
 0x49e   :  { %6766 = vst.msk [vmem:[%s11022_s9 + $0x50] sm:$0xff] %vm3298_vm0, %v6750_v32  ;;  %6767 = vst.msk [vmem:[%s11022_s9 + $0x58] sm:$0xff] %vm3298_vm0, %v6751_v11 }
 0x49f   :  { %6768 = vst.msk [vmem:[%s11022_s9 + $0x60] sm:$0xff] %vm3298_vm0, %v6752_v61  ;;  %6769 = vst.msk [vmem:[%s11022_s9 + $0x68] sm:$0xff] %vm3298_vm0, %v6753_v53 }
 0x4a0   :  { %6770 = vst.msk [vmem:[%s11022_s9 + $0x70] sm:$0xff] %vm3298_vm0, %v6754_v6  ;;  %6771 = vst.msk [vmem:[%s11022_s9 + $0x78] sm:$0xff] %vm3298_vm0, %v6755_v8 }

</bundles_post_ra>
